<compile_context>
chip_gen: v6e
topology: v6e:2x2x1
jax: 0.10.0
libtpu: 0.0.40
codegen_flags: <defaults>
</compile_context>

<pallas_src>
import functools

import jax
import jax.numpy as jnp
from jax import lax
from jax.experimental import pallas as pl
from jax.experimental.pallas import tpu as pltpu

VMEM = pltpu.MemorySpace.VMEM


def _vmem_specs(n):
    return [pl.BlockSpec(memory_space=VMEM) for _ in range(n)]


# ---------------------------------------------------------------------------
# Fused kernel: LSTM encoder + bridges + attention LSTM decoder + projection
# ---------------------------------------------------------------------------
def _seq_kernel(xs_ref, lens_ref, ewihT_ref, ewhhT_ref, eb_ref,
                ctxT_ref, ctxb_ref, a_ref, hbW_ref, hbb_ref, cbW_ref, cbb_ref,
                wq_ref, xt_ref, dwihT_ref, dwhhT_ref, db_ref,
                bigmask_ref, woutT_ref, opT_ref, opb_ref,
                logit_ref, prob_ref, out_ref):
    # xs_ref: (S*B, E) time-major flat src embeddings (row = s*B + b)
    # xt_ref: (T*B, E) time-major flat tgt embeddings
    # bigmask_ref: (B, S*B) additive mask (0 where column belongs to this batch row
    #              and is a valid source position, -1e30 otherwise)
    f32 = jnp.float32
    S_B, _ = xs_ref.shape
    H = ewhhT_ref.shape[0]
    DH = dwhhT_ref.shape[0]
    B = lens_ref.shape[0]
    S = S_B // B
    T = xt_ref.shape[0] // B

    # ---------------- encoder ----------------
    # Hoisted input projection + bias: one MXU matmul for all timesteps.
    exproj = jnp.dot(xs_ref[...], ewihT_ref[...],
                     preferred_element_type=f32) + eb_ref[...]          # (S*B, 4H)
    ewhhT = ewhhT_ref[...]
    lens = lens_ref[...]                                                # (B, 1) int32

    h = jnp.zeros((B, H), f32)
    c = jnp.zeros((B, H), f32)
    hs_steps = []                                  # register-resident, no scratch
    for t in range(S):                             # fully unrolled, static slices
        gates = exproj[t * B:(t + 1) * B, :] + jnp.dot(
            h, ewhhT, preferred_element_type=f32)                       # (B, 4H)
        sg = jax.nn.sigmoid(gates)                 # one EUP push over full gate block
        th = jnp.tanh(gates)                       # one EUP push over full gate block
        i_g = sg[:, 0 * H:1 * H]
        f_g = sg[:, 1 * H:2 * H]
        g_g = th[:, 2 * H:3 * H]
        o_g = sg[:, 3 * H:4 * H]
        c_new = f_g * c + i_g * g_g
        h_new = o_g * jnp.tanh(c_new)
        # pack_padded_sequence semantics: freeze state past srclen, zero padded outputs.
        valid = lens > t                                                # (B, 1) bool
        h = jnp.where(valid, h_new, h)
        c = jnp.where(valid, c_new, c)
        hs_steps.append(jnp.where(valid, h_new, 0.0))
    hs = jnp.concatenate(hs_steps, axis=0)                              # (S*B, H)

    # ctx bridge + attention-query pre-projection (epilogue matmuls, fused).
    ctx = jnp.dot(hs, ctxT_ref[...], preferred_element_type=f32) + ctxb_ref[...]  # (S*B, DH)
    ctxq = jnp.dot(ctx, wq_ref[...], preferred_element_type=f32)                  # (S*B, DH)

    # h/c bridges on [enc_state | attr_embedding] — single fused matmul each.
    ha = jnp.concatenate([h, a_ref[...]], axis=1)                       # (B, H+E)
    hd = jnp.dot(ha, hbW_ref[...], preferred_element_type=f32) + hbb_ref[...]
    cd = jnp.dot(ha, cbW_ref[...], preferred_element_type=f32) + cbb_ref[...]

    # ---------------- decoder (attention LSTM) ----------------
    dxproj = jnp.dot(xt_ref[...], dwihT_ref[...],
                     preferred_element_type=f32) + db_ref[...]          # (T*B, 4DH)
    dwhhT = dwhhT_ref[...]
    bigmask = bigmask_ref[...]                                          # (B, S*B)
    woutT = woutT_ref[...]                                              # (2DH, DH)

    outs = []
    for t in range(T):                              # fully unrolled, static slices
        gates = dxproj[t * B:(t + 1) * B, :] + jnp.dot(
            hd, dwhhT, preferred_element_type=f32)                      # (B, 4DH)
        sg = jax.nn.sigmoid(gates)
        th = jnp.tanh(gates)
        i_g = sg[:, 0 * DH:1 * DH]
        f_g = sg[:, 1 * DH:2 * DH]
        g_g = th[:, 2 * DH:3 * DH]
        o_g = sg[:, 3 * DH:4 * DH]
        cd = f_g * cd + i_g * g_g
        hd = o_g * jnp.tanh(cd)                                         # (B, DH)

        # Batched bilinear attention: ONE score matmul over all (s, b) columns.
        # Block-diagonal + padding additive mask selects only this row's source
        # positions, so softmax weights of other batches' columns are exactly 0 and
        # the weighted-context matmul over the full (S*B, DH) context is correct.
        sc = lax.dot_general(hd, ctxq, (((1,), (1,)), ((), ())),
                             preferred_element_type=f32) + bigmask      # (B, S*B)
        m = jnp.max(sc, axis=-1, keepdims=True)
        e = jnp.exp(sc - m)
        # approx reciprocal on EUP slot; attention weights sum to ~1 (inference).
        p = e * pl.reciprocal(jnp.sum(e, axis=-1, keepdims=True), approx=True)
        wctx = jnp.dot(p, ctx, preferred_element_type=f32)              # (B, DH)

        # Fused output transform: [wctx | h] @ Wout^T, tanh.
        h_tilde = jnp.tanh(jnp.dot(jnp.concatenate([wctx, hd], axis=1), woutT,
                                   preferred_element_type=f32))         # (B, DH)
        outs.append(h_tilde)
        # next-step hidden is the raw LSTM hidden (no input feeding)

    tout = jnp.concatenate(outs, axis=0)                                # (T*B, DH)
    out_ref[...] = tout

    # Fused output projection + exact softmax (one matmul over all T*B rows).
    logits = jnp.dot(tout, opT_ref[...], preferred_element_type=f32) + opb_ref[...]
    logit_ref[...] = logits
    mx = jnp.max(logits, axis=-1, keepdims=True)
    ex = jnp.exp(logits - mx)
    prob_ref[...] = ex / jnp.sum(ex, axis=-1, keepdims=True)


# ---------------------------------------------------------------------------
# Wrapper (weight pre-transposition, mask construction, pallas_call plumbing)
# ---------------------------------------------------------------------------
def _fused_forward(params, src_emb, srclens, a_ht, tgt_emb, srcmask):
    B, S, E = src_emb.shape
    T = tgt_emb.shape[1]
    H = params['enc_whh'].shape[1]
    DH = params['ctx_bridge_w'].shape[0]
    V = params['out_proj_w'].shape[0]

    xs = jnp.transpose(src_emb, (1, 0, 2)).reshape(S * B, E)            # time-major flat
    xt = jnp.transpose(tgt_emb, (1, 0, 2)).reshape(T * B, E)
    lens = srclens.reshape(B, 1).astype(jnp.int32)

    eb = (params['enc_bih'] + params['enc_bhh']).reshape(1, 4 * H)
    db = (params['dec_bih'] + params['dec_bhh']).reshape(1, 4 * DH)

    # Block-diagonal + padding additive attention mask over the flat (s*B + b) columns.
    col = jnp.arange(S * B, dtype=jnp.int32)
    col_b = col % B
    col_s = col // B
    same_row = col_b[None, :] == jnp.arange(B, dtype=jnp.int32)[:, None]   # (B, S*B)
    not_pad = jnp.take(~srcmask, col_s, axis=1)                            # (B, S*B)
    bigmask = jnp.where(same_row & not_pad, 0.0, -1e30).astype(jnp.float32)

    logits_flat, probs_flat, out_flat = pl.pallas_call(
        _seq_kernel,
        out_shape=(jax.ShapeDtypeStruct((T * B, V), jnp.float32),
                   jax.ShapeDtypeStruct((T * B, V), jnp.float32),
                   jax.ShapeDtypeStruct((T * B, DH), jnp.float32)),
        in_specs=_vmem_specs(21),
        out_specs=tuple(_vmem_specs(3)),
    )(xs, lens,
      params['enc_wih'].T, params['enc_whh'].T, eb,
      params['ctx_bridge_w'].T, params['ctx_bridge_b'].reshape(1, DH),
      a_ht,
      params['h_bridge_w'].T, params['h_bridge_b'].reshape(1, DH),
      params['c_bridge_w'].T, params['c_bridge_b'].reshape(1, DH),
      params['dec_wq'],
      xt, params['dec_wih'].T, params['dec_whh'].T, db,
      bigmask, params['dec_wout'].T,
      params['out_proj_w'].T, params['out_proj_b'].reshape(1, V))
    return logits_flat, probs_flat, out_flat


# ---------------------------------------------------------------------------
# Parameters (deterministic, in-script init — no checkpoints)
# ---------------------------------------------------------------------------
def init_params(key, src_vocab, tgt_vocab, E, H, DH, n_attrs):
    ks = jax.random.split(key, 18)

    def u(k, shape, scale):
        return jax.random.uniform(k, shape, jnp.float32, minval=-scale, maxval=scale)

    sh = 1.0 / (H ** 0.5)
    sdh = 1.0 / (DH ** 0.5)
    sb = 1.0 / ((H + E) ** 0.5)
    return dict(
        src_embedding=u(ks[0], (src_vocab, E), 0.1),     # share_vocab=True -> tgt shares this
        attribute_embedding=u(ks[1], (n_attrs, E), 0.1),
        enc_wih=u(ks[2], (4 * H, E), sh),
        enc_whh=u(ks[3], (4 * H, H), sh),
        enc_bih=u(ks[4], (4 * H,), sh),
        enc_bhh=u(ks[5], (4 * H,), sh),
        ctx_bridge_w=u(ks[6], (DH, H), sh),
        ctx_bridge_b=u(ks[7], (DH,), sh),
        h_bridge_w=u(ks[8], (DH, H + E), sb),
        h_bridge_b=jnp.zeros((DH,), jnp.float32),        # init_weights(): bias.fill_(0)
        c_bridge_w=u(ks[9], (DH, H + E), sb),
        c_bridge_b=jnp.zeros((DH,), jnp.float32),
        dec_wih=u(ks[10], (4 * DH, E), sdh),
        dec_whh=u(ks[11], (4 * DH, DH), sdh),
        dec_bih=u(ks[12], (4 * DH,), sdh),
        dec_bhh=u(ks[13], (4 * DH,), sdh),
        dec_wq=u(ks[14], (DH, DH), sdh),
        dec_wout=u(ks[15], (DH, 2 * DH), sdh),
        out_proj_w=u(ks[16], (tgt_vocab, DH), sdh),
        out_proj_b=jnp.zeros((tgt_vocab,), jnp.float32),
    )


# ---------------------------------------------------------------------------
# Forward pass (mirrors SeqModel.forward for the assumed config)
# ---------------------------------------------------------------------------
def seq_model_forward(params, input_src, input_tgt, srcmask, srclens,
                      input_attr, attrlens, attrmask, tgtmask):
    B, S = input_src.shape
    T = input_tgt.shape[1]
    DH = params['ctx_bridge_w'].shape[0]
    V = params['out_proj_w'].shape[0]

    # --- embeddings (gather glue in XLA) ---
    src_emb = jnp.take(params['src_embedding'], input_src, axis=0)      # (B, S, E)
    a_hts = jnp.take(params['attribute_embedding'], input_attr, axis=0) # (B, A, E)
    a_ht = jnp.mean(a_hts, axis=-2) if a_hts.shape[1] > 1 else a_hts[:, 0, :]
    tgt_emb = jnp.take(params['src_embedding'], input_tgt, axis=0)      # share_vocab=True

    # --- pad batch to a multiple of 8 rows (fill sublanes); pad rows are fully valid
    #     (srclen = S, zero embeddings) so the masked softmax never sees an all-masked row.
    Bp = max(8, -(-B // 8) * 8)
    pad = Bp - B
    srclens_p = srclens.astype(jnp.int32)
    srcmask_p = srcmask
    if pad:
        src_emb = jnp.pad(src_emb, ((0, pad), (0, 0), (0, 0)))
        tgt_emb = jnp.pad(tgt_emb, ((0, pad), (0, 0), (0, 0)))
        a_ht = jnp.pad(a_ht, ((0, pad), (0, 0)))
        srclens_p = jnp.concatenate([srclens_p, jnp.full((pad,), S, jnp.int32)])
        srcmask_p = jnp.concatenate([srcmask, jnp.zeros((pad, S), dtype=bool)], axis=0)

    # --- fused encoder + bridges + decoder + projection + softmax (one Pallas kernel) ---
    logits_flat, probs_flat, out_flat = _fused_forward(
        params, src_emb, srclens_p, a_ht, tgt_emb, srcmask_p)

    decoder_logit = logits_flat.reshape(T, Bp, V).transpose(1, 0, 2)[:B]
    probs = probs_flat.reshape(T, Bp, V).transpose(1, 0, 2)[:B]
    tgt_outputs = out_flat.reshape(T, Bp, DH).transpose(1, 0, 2)[:B]
    return decoder_logit, probs, tgt_outputs


# ---------------------------------------------------------------------------
if __name__ == "__main__":
    B, S, T, A = 2, 8, 8, 2          # batch, src len, tgt len, #attr tokens
    E = H = DH = 32                  # emb_dim, src_hidden_dim, tgt_hidden_dim
    SRC_V = TGT_V = 64               # vocab sizes
    N_ATTRS = 2                      # len(config['data']['test'])
    PAD = 0

    root = jax.random.PRNGKey(0)
    pkey, k1, k2, k3 = jax.random.split(root, 4)
    params = init_params(pkey, SRC_V, TGT_V, E, H, DH, N_ATTRS)

    srclens = jnp.array([S, S - 2], dtype=jnp.int32)
    input_src = jax.random.randint(k1, (B, S), 1, SRC_V)
    input_src = jnp.where(jnp.arange(S)[None, :] < srclens[:, None], input_src, PAD)
    srcmask = jnp.arange(S)[None, :] >= srclens[:, None]      # True == pad position
    input_tgt = jax.random.randint(k2, (B, T), 1, TGT_V)
    tgtmask = jnp.zeros((B, T), dtype=bool)                   # unused on LSTM decoder path
    input_attr = jax.random.randint(k3, (B, A), 0, N_ATTRS)
    attrlens = jnp.full((B,), A, dtype=jnp.int32)             # unused for model_type='delete'
    attrmask = jnp.zeros((B, A), dtype=bool)                  # unused for model_type='delete'

    fwd = jax.jit(functools.partial(seq_model_forward, params))
    decoder_logit, probs, tgt_outputs = fwd(input_src, input_tgt, srcmask, srclens,
                                            input_attr, attrlens, attrmask, tgtmask)
    jax.block_until_ready((decoder_logit, probs, tgt_outputs))

    assert decoder_logit.shape == (B, T, TGT_V)
    assert probs.shape == (B, T, TGT_V)
    assert tgt_outputs.shape == (B, T, DH)
    assert bool(jnp.all(jnp.isfinite(decoder_logit)))
    assert bool(jnp.allclose(jnp.sum(probs, axis=-1), 1.0, atol=1e-5))
    print("KERNEL_OK")
</pallas_src>

<mosaic_0001>
module attributes {stable_mosaic.version = 11 : i64} {
  func.func @_seq_kernel(%arg0: memref<64x32xf32, #tpu.memory_space<vmem>>, %arg1: memref<8x1xi32, #tpu.memory_space<vmem>>, %arg2: memref<32x128xf32, #tpu.memory_space<vmem>>, %arg3: memref<32x128xf32, #tpu.memory_space<vmem>>, %arg4: memref<1x128xf32, #tpu.memory_space<vmem>>, %arg5: memref<32x32xf32, #tpu.memory_space<vmem>>, %arg6: memref<1x32xf32, #tpu.memory_space<vmem>>, %arg7: memref<8x32xf32, #tpu.memory_space<vmem>>, %arg8: memref<64x32xf32, #tpu.memory_space<vmem>>, %arg9: memref<1x32xf32, #tpu.memory_space<vmem>>, %arg10: memref<64x32xf32, #tpu.memory_space<vmem>>, %arg11: memref<1x32xf32, #tpu.memory_space<vmem>>, %arg12: memref<32x32xf32, #tpu.memory_space<vmem>>, %arg13: memref<64x32xf32, #tpu.memory_space<vmem>>, %arg14: memref<32x128xf32, #tpu.memory_space<vmem>>, %arg15: memref<32x128xf32, #tpu.memory_space<vmem>>, %arg16: memref<1x128xf32, #tpu.memory_space<vmem>>, %arg17: memref<8x64xf32, #tpu.memory_space<vmem>>, %arg18: memref<64x32xf32, #tpu.memory_space<vmem>>, %arg19: memref<32x64xf32, #tpu.memory_space<vmem>>, %arg20: memref<1x64xf32, #tpu.memory_space<vmem>>, %arg21: memref<64x64xf32, #tpu.memory_space<vmem>>, %arg22: memref<64x64xf32, #tpu.memory_space<vmem>>, %arg23: memref<64x32xf32, #tpu.memory_space<vmem>>) attributes {dimension_semantics = [], scalar_prefetch = 0 : i64, scratch_operands = 0 : i64, tpu.core_type = #tpu.core_type<tc>} {
    %c0 = arith.constant 0 : index
    %c0_0 = arith.constant 0 : index
    %0 = vector.load %arg0[%c0, %c0_0] : memref<64x32xf32, #tpu.memory_space<vmem>>, vector<64x32xf32>
    %c0_1 = arith.constant 0 : index
    %c0_2 = arith.constant 0 : index
    %1 = vector.load %arg2[%c0_1, %c0_2] : memref<32x128xf32, #tpu.memory_space<vmem>>, vector<32x128xf32>
    %cst = arith.constant dense<0.000000e+00> : vector<64x128xf32>
    %2 = tpu.matmul %0, %1, %cst {dimension_numbers = #tpu.dot_dimension_numbers<[1], [0], [0], [1], [0, 0, 1, 1], [], []>} : vector<64x32xf32>, vector<32x128xf32>, vector<64x128xf32> -> vector<64x128xf32>
    %c0_3 = arith.constant 0 : index
    %c0_4 = arith.constant 0 : index
    %3 = vector.load %arg4[%c0_3, %c0_4] : memref<1x128xf32, #tpu.memory_space<vmem>>, vector<1x128xf32>
    %4 = vector.broadcast %3 : vector<1x128xf32> to vector<64x128xf32>
    %5 = arith.addf %2, %4 : vector<64x128xf32>
    %c0_5 = arith.constant 0 : index
    %c0_6 = arith.constant 0 : index
    %6 = vector.load %arg3[%c0_5, %c0_6] : memref<32x128xf32, #tpu.memory_space<vmem>>, vector<32x128xf32>
    %c0_7 = arith.constant 0 : index
    %c0_8 = arith.constant 0 : index
    %7 = vector.load %arg1[%c0_7, %c0_8] : memref<8x1xi32, #tpu.memory_space<vmem>>, vector<8x1xi32>
    %cst_9 = arith.constant 0.000000e+00 : f32
    %8 = vector.broadcast %cst_9 : f32 to vector<8x32xf32>
    %cst_10 = arith.constant 0.000000e+00 : f32
    %9 = vector.broadcast %cst_10 : f32 to vector<8x32xf32>
    %10 = vector.extract_strided_slice %5 {offsets = [0, 0], sizes = [8, 128], strides = [1, 1]} : vector<64x128xf32> to vector<8x128xf32>
    %cst_11 = arith.constant dense<0.000000e+00> : vector<8x128xf32>
    %11 = tpu.matmul %8, %6, %cst_11 {dimension_numbers = #tpu.dot_dimension_numbers<[1], [0], [0], [1], [0, 0, 1, 1], [], []>} : vector<8x32xf32>, vector<32x128xf32>, vector<8x128xf32> -> vector<8x128xf32>
    %12 = arith.addf %10, %11 : vector<8x128xf32>
    %13 = arith.negf %12 : vector<8x128xf32>
    %14 = math.exp %13 : vector<8x128xf32>
    %cst_12 = arith.constant 1.000000e+00 : f32
    %15 = vector.broadcast %cst_12 : f32 to vector<8x128xf32>
    %16 = arith.addf %15, %14 : vector<8x128xf32>
    %17 = arith.divf %15, %16 : vector<8x128xf32>
    %18 = math.tanh %12 : vector<8x128xf32>
    %19 = vector.extract_strided_slice %17 {offsets = [0, 0], sizes = [8, 32], strides = [1, 1]} : vector<8x128xf32> to vector<8x32xf32>
    %20 = vector.extract_strided_slice %17 {offsets = [0, 32], sizes = [8, 32], strides = [1, 1]} : vector<8x128xf32> to vector<8x32xf32>
    %21 = vector.extract_strided_slice %18 {offsets = [0, 64], sizes = [8, 32], strides = [1, 1]} : vector<8x128xf32> to vector<8x32xf32>
    %22 = vector.extract_strided_slice %17 {offsets = [0, 96], sizes = [8, 32], strides = [1, 1]} : vector<8x128xf32> to vector<8x32xf32>
    %23 = arith.mulf %20, %9 : vector<8x32xf32>
    %24 = arith.mulf %19, %21 : vector<8x32xf32>
    %25 = arith.addf %23, %24 : vector<8x32xf32>
    %26 = math.tanh %25 : vector<8x32xf32>
    %27 = arith.mulf %22, %26 : vector<8x32xf32>
    %c0_i32 = arith.constant 0 : i32
    %28 = vector.broadcast %c0_i32 : i32 to vector<8x1xi32>
    %29 = arith.cmpi sgt, %7, %28 : vector<8x1xi32>
    %30 = vector.shape_cast %29 : vector<8x1xi1> to vector<8x1xi1>
    %31 = vector.broadcast %30 : vector<8x1xi1> to vector<8x32xi1>
    %32 = arith.select %31, %27, %8 : vector<8x32xi1>, vector<8x32xf32>
    %33 = vector.shape_cast %29 : vector<8x1xi1> to vector<8x1xi1>
    %34 = vector.broadcast %33 : vector<8x1xi1> to vector<8x32xi1>
    %35 = arith.select %34, %25, %9 : vector<8x32xi1>, vector<8x32xf32>
    %cst_13 = arith.constant 0.000000e+00 : f32
    %36 = vector.shape_cast %29 : vector<8x1xi1> to vector<8x1xi1>
    %37 = vector.broadcast %36 : vector<8x1xi1> to vector<8x32xi1>
    %38 = vector.broadcast %cst_13 : f32 to vector<8x32xf32>
    %39 = arith.select %37, %27, %38 : vector<8x32xi1>, vector<8x32xf32>
    %40 = vector.extract_strided_slice %5 {offsets = [8, 0], sizes = [8, 128], strides = [1, 1]} : vector<64x128xf32> to vector<8x128xf32>
    %cst_14 = arith.constant dense<0.000000e+00> : vector<8x128xf32>
    %41 = tpu.matmul %32, %6, %cst_14 {dimension_numbers = #tpu.dot_dimension_numbers<[1], [0], [0], [1], [0, 0, 1, 1], [], []>} : vector<8x32xf32>, vector<32x128xf32>, vector<8x128xf32> -> vector<8x128xf32>
    %42 = arith.addf %40, %41 : vector<8x128xf32>
    %43 = arith.negf %42 : vector<8x128xf32>
    %44 = math.exp %43 : vector<8x128xf32>
    %cst_15 = arith.constant 1.000000e+00 : f32
    %45 = vector.broadcast %cst_15 : f32 to vector<8x128xf32>
    %46 = arith.addf %45, %44 : vector<8x128xf32>
    %47 = arith.divf %45, %46 : vector<8x128xf32>
    %48 = math.tanh %42 : vector<8x128xf32>
    %49 = vector.extract_strided_slice %47 {offsets = [0, 0], sizes = [8, 32], strides = [1, 1]} : vector<8x128xf32> to vector<8x32xf32>
    %50 = vector.extract_strided_slice %47 {offsets = [0, 32], sizes = [8, 32], strides = [1, 1]} : vector<8x128xf32> to vector<8x32xf32>
    %51 = vector.extract_strided_slice %48 {offsets = [0, 64], sizes = [8, 32], strides = [1, 1]} : vector<8x128xf32> to vector<8x32xf32>
    %52 = vector.extract_strided_slice %47 {offsets = [0, 96], sizes = [8, 32], strides = [1, 1]} : vector<8x128xf32> to vector<8x32xf32>
    %53 = arith.mulf %50, %35 : vector<8x32xf32>
    %54 = arith.mulf %49, %51 : vector<8x32xf32>
    %55 = arith.addf %53, %54 : vector<8x32xf32>
    %56 = math.tanh %55 : vector<8x32xf32>
    %57 = arith.mulf %52, %56 : vector<8x32xf32>
    %c1_i32 = arith.constant 1 : i32
    %58 = vector.broadcast %c1_i32 : i32 to vector<8x1xi32>
    %59 = arith.cmpi sgt, %7, %58 : vector<8x1xi32>
    %60 = vector.shape_cast %59 : vector<8x1xi1> to vector<8x1xi1>
    %61 = vector.broadcast %60 : vector<8x1xi1> to vector<8x32xi1>
    %62 = arith.select %61, %57, %32 : vector<8x32xi1>, vector<8x32xf32>
    %63 = vector.shape_cast %59 : vector<8x1xi1> to vector<8x1xi1>
    %64 = vector.broadcast %63 : vector<8x1xi1> to vector<8x32xi1>
    %65 = arith.select %64, %55, %35 : vector<8x32xi1>, vector<8x32xf32>
    %cst_16 = arith.constant 0.000000e+00 : f32
    %66 = vector.shape_cast %59 : vector<8x1xi1> to vector<8x1xi1>
    %67 = vector.broadcast %66 : vector<8x1xi1> to vector<8x32xi1>
    %68 = vector.broadcast %cst_16 : f32 to vector<8x32xf32>
    %69 = arith.select %67, %57, %68 : vector<8x32xi1>, vector<8x32xf32>
    %70 = vector.extract_strided_slice %5 {offsets = [16, 0], sizes = [8, 128], strides = [1, 1]} : vector<64x128xf32> to vector<8x128xf32>
    %cst_17 = arith.constant dense<0.000000e+00> : vector<8x128xf32>
    %71 = tpu.matmul %62, %6, %cst_17 {dimension_numbers = #tpu.dot_dimension_numbers<[1], [0], [0], [1], [0, 0, 1, 1], [], []>} : vector<8x32xf32>, vector<32x128xf32>, vector<8x128xf32> -> vector<8x128xf32>
    %72 = arith.addf %70, %71 : vector<8x128xf32>
    %73 = arith.negf %72 : vector<8x128xf32>
    %74 = math.exp %73 : vector<8x128xf32>
    %cst_18 = arith.constant 1.000000e+00 : f32
    %75 = vector.broadcast %cst_18 : f32 to vector<8x128xf32>
    %76 = arith.addf %75, %74 : vector<8x128xf32>
    %77 = arith.divf %75, %76 : vector<8x128xf32>
    %78 = math.tanh %72 : vector<8x128xf32>
    %79 = vector.extract_strided_slice %77 {offsets = [0, 0], sizes = [8, 32], strides = [1, 1]} : vector<8x128xf32> to vector<8x32xf32>
    %80 = vector.extract_strided_slice %77 {offsets = [0, 32], sizes = [8, 32], strides = [1, 1]} : vector<8x128xf32> to vector<8x32xf32>
    %81 = vector.extract_strided_slice %78 {offsets = [0, 64], sizes = [8, 32], strides = [1, 1]} : vector<8x128xf32> to vector<8x32xf32>
    %82 = vector.extract_strided_slice %77 {offsets = [0, 96], sizes = [8, 32], strides = [1, 1]} : vector<8x128xf32> to vector<8x32xf32>
    %83 = arith.mulf %80, %65 : vector<8x32xf32>
    %84 = arith.mulf %79, %81 : vector<8x32xf32>
    %85 = arith.addf %83, %84 : vector<8x32xf32>
    %86 = math.tanh %85 : vector<8x32xf32>
    %87 = arith.mulf %82, %86 : vector<8x32xf32>
    %c2_i32 = arith.constant 2 : i32
    %88 = vector.broadcast %c2_i32 : i32 to vector<8x1xi32>
    %89 = arith.cmpi sgt, %7, %88 : vector<8x1xi32>
    %90 = vector.shape_cast %89 : vector<8x1xi1> to vector<8x1xi1>
    %91 = vector.broadcast %90 : vector<8x1xi1> to vector<8x32xi1>
    %92 = arith.select %91, %87, %62 : vector<8x32xi1>, vector<8x32xf32>
    %93 = vector.shape_cast %89 : vector<8x1xi1> to vector<8x1xi1>
    %94 = vector.broadcast %93 : vector<8x1xi1> to vector<8x32xi1>
    %95 = arith.select %94, %85, %65 : vector<8x32xi1>, vector<8x32xf32>
    %cst_19 = arith.constant 0.000000e+00 : f32
    %96 = vector.shape_cast %89 : vector<8x1xi1> to vector<8x1xi1>
    %97 = vector.broadcast %96 : vector<8x1xi1> to vector<8x32xi1>
    %98 = vector.broadcast %cst_19 : f32 to vector<8x32xf32>
    %99 = arith.select %97, %87, %98 : vector<8x32xi1>, vector<8x32xf32>
    %100 = vector.extract_strided_slice %5 {offsets = [24, 0], sizes = [8, 128], strides = [1, 1]} : vector<64x128xf32> to vector<8x128xf32>
    %cst_20 = arith.constant dense<0.000000e+00> : vector<8x128xf32>
    %101 = tpu.matmul %92, %6, %cst_20 {dimension_numbers = #tpu.dot_dimension_numbers<[1], [0], [0], [1], [0, 0, 1, 1], [], []>} : vector<8x32xf32>, vector<32x128xf32>, vector<8x128xf32> -> vector<8x128xf32>
    %102 = arith.addf %100, %101 : vector<8x128xf32>
    %103 = arith.negf %102 : vector<8x128xf32>
    %104 = math.exp %103 : vector<8x128xf32>
    %cst_21 = arith.constant 1.000000e+00 : f32
    %105 = vector.broadcast %cst_21 : f32 to vector<8x128xf32>
    %106 = arith.addf %105, %104 : vector<8x128xf32>
    %107 = arith.divf %105, %106 : vector<8x128xf32>
    %108 = math.tanh %102 : vector<8x128xf32>
    %109 = vector.extract_strided_slice %107 {offsets = [0, 0], sizes = [8, 32], strides = [1, 1]} : vector<8x128xf32> to vector<8x32xf32>
    %110 = vector.extract_strided_slice %107 {offsets = [0, 32], sizes = [8, 32], strides = [1, 1]} : vector<8x128xf32> to vector<8x32xf32>
    %111 = vector.extract_strided_slice %108 {offsets = [0, 64], sizes = [8, 32], strides = [1, 1]} : vector<8x128xf32> to vector<8x32xf32>
    %112 = vector.extract_strided_slice %107 {offsets = [0, 96], sizes = [8, 32], strides = [1, 1]} : vector<8x128xf32> to vector<8x32xf32>
    %113 = arith.mulf %110, %95 : vector<8x32xf32>
    %114 = arith.mulf %109, %111 : vector<8x32xf32>
    %115 = arith.addf %113, %114 : vector<8x32xf32>
    %116 = math.tanh %115 : vector<8x32xf32>
    %117 = arith.mulf %112, %116 : vector<8x32xf32>
    %c3_i32 = arith.constant 3 : i32
    %118 = vector.broadcast %c3_i32 : i32 to vector<8x1xi32>
    %119 = arith.cmpi sgt, %7, %118 : vector<8x1xi32>
    %120 = vector.shape_cast %119 : vector<8x1xi1> to vector<8x1xi1>
    %121 = vector.broadcast %120 : vector<8x1xi1> to vector<8x32xi1>
    %122 = arith.select %121, %117, %92 : vector<8x32xi1>, vector<8x32xf32>
    %123 = vector.shape_cast %119 : vector<8x1xi1> to vector<8x1xi1>
    %124 = vector.broadcast %123 : vector<8x1xi1> to vector<8x32xi1>
    %125 = arith.select %124, %115, %95 : vector<8x32xi1>, vector<8x32xf32>
    %cst_22 = arith.constant 0.000000e+00 : f32
    %126 = vector.shape_cast %119 : vector<8x1xi1> to vector<8x1xi1>
    %127 = vector.broadcast %126 : vector<8x1xi1> to vector<8x32xi1>
    %128 = vector.broadcast %cst_22 : f32 to vector<8x32xf32>
    %129 = arith.select %127, %117, %128 : vector<8x32xi1>, vector<8x32xf32>
    %130 = vector.extract_strided_slice %5 {offsets = [32, 0], sizes = [8, 128], strides = [1, 1]} : vector<64x128xf32> to vector<8x128xf32>
    %cst_23 = arith.constant dense<0.000000e+00> : vector<8x128xf32>
    %131 = tpu.matmul %122, %6, %cst_23 {dimension_numbers = #tpu.dot_dimension_numbers<[1], [0], [0], [1], [0, 0, 1, 1], [], []>} : vector<8x32xf32>, vector<32x128xf32>, vector<8x128xf32> -> vector<8x128xf32>
    %132 = arith.addf %130, %131 : vector<8x128xf32>
    %133 = arith.negf %132 : vector<8x128xf32>
    %134 = math.exp %133 : vector<8x128xf32>
    %cst_24 = arith.constant 1.000000e+00 : f32
    %135 = vector.broadcast %cst_24 : f32 to vector<8x128xf32>
    %136 = arith.addf %135, %134 : vector<8x128xf32>
    %137 = arith.divf %135, %136 : vector<8x128xf32>
    %138 = math.tanh %132 : vector<8x128xf32>
    %139 = vector.extract_strided_slice %137 {offsets = [0, 0], sizes = [8, 32], strides = [1, 1]} : vector<8x128xf32> to vector<8x32xf32>
    %140 = vector.extract_strided_slice %137 {offsets = [0, 32], sizes = [8, 32], strides = [1, 1]} : vector<8x128xf32> to vector<8x32xf32>
    %141 = vector.extract_strided_slice %138 {offsets = [0, 64], sizes = [8, 32], strides = [1, 1]} : vector<8x128xf32> to vector<8x32xf32>
    %142 = vector.extract_strided_slice %137 {offsets = [0, 96], sizes = [8, 32], strides = [1, 1]} : vector<8x128xf32> to vector<8x32xf32>
    %143 = arith.mulf %140, %125 : vector<8x32xf32>
    %144 = arith.mulf %139, %141 : vector<8x32xf32>
    %145 = arith.addf %143, %144 : vector<8x32xf32>
    %146 = math.tanh %145 : vector<8x32xf32>
    %147 = arith.mulf %142, %146 : vector<8x32xf32>
    %c4_i32 = arith.constant 4 : i32
    %148 = vector.broadcast %c4_i32 : i32 to vector<8x1xi32>
    %149 = arith.cmpi sgt, %7, %148 : vector<8x1xi32>
    %150 = vector.shape_cast %149 : vector<8x1xi1> to vector<8x1xi1>
    %151 = vector.broadcast %150 : vector<8x1xi1> to vector<8x32xi1>
    %152 = arith.select %151, %147, %122 : vector<8x32xi1>, vector<8x32xf32>
    %153 = vector.shape_cast %149 : vector<8x1xi1> to vector<8x1xi1>
    %154 = vector.broadcast %153 : vector<8x1xi1> to vector<8x32xi1>
    %155 = arith.select %154, %145, %125 : vector<8x32xi1>, vector<8x32xf32>
    %cst_25 = arith.constant 0.000000e+00 : f32
    %156 = vector.shape_cast %149 : vector<8x1xi1> to vector<8x1xi1>
    %157 = vector.broadcast %156 : vector<8x1xi1> to vector<8x32xi1>
    %158 = vector.broadcast %cst_25 : f32 to vector<8x32xf32>
    %159 = arith.select %157, %147, %158 : vector<8x32xi1>, vector<8x32xf32>
    %160 = vector.extract_strided_slice %5 {offsets = [40, 0], sizes = [8, 128], strides = [1, 1]} : vector<64x128xf32> to vector<8x128xf32>
    %cst_26 = arith.constant dense<0.000000e+00> : vector<8x128xf32>
    %161 = tpu.matmul %152, %6, %cst_26 {dimension_numbers = #tpu.dot_dimension_numbers<[1], [0], [0], [1], [0, 0, 1, 1], [], []>} : vector<8x32xf32>, vector<32x128xf32>, vector<8x128xf32> -> vector<8x128xf32>
    %162 = arith.addf %160, %161 : vector<8x128xf32>
    %163 = arith.negf %162 : vector<8x128xf32>
    %164 = math.exp %163 : vector<8x128xf32>
    %cst_27 = arith.constant 1.000000e+00 : f32
    %165 = vector.broadcast %cst_27 : f32 to vector<8x128xf32>
    %166 = arith.addf %165, %164 : vector<8x128xf32>
    %167 = arith.divf %165, %166 : vector<8x128xf32>
    %168 = math.tanh %162 : vector<8x128xf32>
    %169 = vector.extract_strided_slice %167 {offsets = [0, 0], sizes = [8, 32], strides = [1, 1]} : vector<8x128xf32> to vector<8x32xf32>
    %170 = vector.extract_strided_slice %167 {offsets = [0, 32], sizes = [8, 32], strides = [1, 1]} : vector<8x128xf32> to vector<8x32xf32>
    %171 = vector.extract_strided_slice %168 {offsets = [0, 64], sizes = [8, 32], strides = [1, 1]} : vector<8x128xf32> to vector<8x32xf32>
    %172 = vector.extract_strided_slice %167 {offsets = [0, 96], sizes = [8, 32], strides = [1, 1]} : vector<8x128xf32> to vector<8x32xf32>
    %173 = arith.mulf %170, %155 : vector<8x32xf32>
    %174 = arith.mulf %169, %171 : vector<8x32xf32>
    %175 = arith.addf %173, %174 : vector<8x32xf32>
    %176 = math.tanh %175 : vector<8x32xf32>
    %177 = arith.mulf %172, %176 : vector<8x32xf32>
    %c5_i32 = arith.constant 5 : i32
    %178 = vector.broadcast %c5_i32 : i32 to vector<8x1xi32>
    %179 = arith.cmpi sgt, %7, %178 : vector<8x1xi32>
    %180 = vector.shape_cast %179 : vector<8x1xi1> to vector<8x1xi1>
    %181 = vector.broadcast %180 : vector<8x1xi1> to vector<8x32xi1>
    %182 = arith.select %181, %177, %152 : vector<8x32xi1>, vector<8x32xf32>
    %183 = vector.shape_cast %179 : vector<8x1xi1> to vector<8x1xi1>
    %184 = vector.broadcast %183 : vector<8x1xi1> to vector<8x32xi1>
    %185 = arith.select %184, %175, %155 : vector<8x32xi1>, vector<8x32xf32>
    %cst_28 = arith.constant 0.000000e+00 : f32
    %186 = vector.shape_cast %179 : vector<8x1xi1> to vector<8x1xi1>
    %187 = vector.broadcast %186 : vector<8x1xi1> to vector<8x32xi1>
    %188 = vector.broadcast %cst_28 : f32 to vector<8x32xf32>
    %189 = arith.select %187, %177, %188 : vector<8x32xi1>, vector<8x32xf32>
    %190 = vector.extract_strided_slice %5 {offsets = [48, 0], sizes = [8, 128], strides = [1, 1]} : vector<64x128xf32> to vector<8x128xf32>
    %cst_29 = arith.constant dense<0.000000e+00> : vector<8x128xf32>
    %191 = tpu.matmul %182, %6, %cst_29 {dimension_numbers = #tpu.dot_dimension_numbers<[1], [0], [0], [1], [0, 0, 1, 1], [], []>} : vector<8x32xf32>, vector<32x128xf32>, vector<8x128xf32> -> vector<8x128xf32>
    %192 = arith.addf %190, %191 : vector<8x128xf32>
    %193 = arith.negf %192 : vector<8x128xf32>
    %194 = math.exp %193 : vector<8x128xf32>
    %cst_30 = arith.constant 1.000000e+00 : f32
    %195 = vector.broadcast %cst_30 : f32 to vector<8x128xf32>
    %196 = arith.addf %195, %194 : vector<8x128xf32>
    %197 = arith.divf %195, %196 : vector<8x128xf32>
    %198 = math.tanh %192 : vector<8x128xf32>
    %199 = vector.extract_strided_slice %197 {offsets = [0, 0], sizes = [8, 32], strides = [1, 1]} : vector<8x128xf32> to vector<8x32xf32>
    %200 = vector.extract_strided_slice %197 {offsets = [0, 32], sizes = [8, 32], strides = [1, 1]} : vector<8x128xf32> to vector<8x32xf32>
    %201 = vector.extract_strided_slice %198 {offsets = [0, 64], sizes = [8, 32], strides = [1, 1]} : vector<8x128xf32> to vector<8x32xf32>
    %202 = vector.extract_strided_slice %197 {offsets = [0, 96], sizes = [8, 32], strides = [1, 1]} : vector<8x128xf32> to vector<8x32xf32>
    %203 = arith.mulf %200, %185 : vector<8x32xf32>
    %204 = arith.mulf %199, %201 : vector<8x32xf32>
    %205 = arith.addf %203, %204 : vector<8x32xf32>
    %206 = math.tanh %205 : vector<8x32xf32>
    %207 = arith.mulf %202, %206 : vector<8x32xf32>
    %c6_i32 = arith.constant 6 : i32
    %208 = vector.broadcast %c6_i32 : i32 to vector<8x1xi32>
    %209 = arith.cmpi sgt, %7, %208 : vector<8x1xi32>
    %210 = vector.shape_cast %209 : vector<8x1xi1> to vector<8x1xi1>
    %211 = vector.broadcast %210 : vector<8x1xi1> to vector<8x32xi1>
    %212 = arith.select %211, %207, %182 : vector<8x32xi1>, vector<8x32xf32>
    %213 = vector.shape_cast %209 : vector<8x1xi1> to vector<8x1xi1>
    %214 = vector.broadcast %213 : vector<8x1xi1> to vector<8x32xi1>
    %215 = arith.select %214, %205, %185 : vector<8x32xi1>, vector<8x32xf32>
    %cst_31 = arith.constant 0.000000e+00 : f32
    %216 = vector.shape_cast %209 : vector<8x1xi1> to vector<8x1xi1>
    %217 = vector.broadcast %216 : vector<8x1xi1> to vector<8x32xi1>
    %218 = vector.broadcast %cst_31 : f32 to vector<8x32xf32>
    %219 = arith.select %217, %207, %218 : vector<8x32xi1>, vector<8x32xf32>
    %220 = vector.extract_strided_slice %5 {offsets = [56, 0], sizes = [8, 128], strides = [1, 1]} : vector<64x128xf32> to vector<8x128xf32>
    %cst_32 = arith.constant dense<0.000000e+00> : vector<8x128xf32>
    %221 = tpu.matmul %212, %6, %cst_32 {dimension_numbers = #tpu.dot_dimension_numbers<[1], [0], [0], [1], [0, 0, 1, 1], [], []>} : vector<8x32xf32>, vector<32x128xf32>, vector<8x128xf32> -> vector<8x128xf32>
    %222 = arith.addf %220, %221 : vector<8x128xf32>
    %223 = arith.negf %222 : vector<8x128xf32>
    %224 = math.exp %223 : vector<8x128xf32>
    %cst_33 = arith.constant 1.000000e+00 : f32
    %225 = vector.broadcast %cst_33 : f32 to vector<8x128xf32>
    %226 = arith.addf %225, %224 : vector<8x128xf32>
    %227 = arith.divf %225, %226 : vector<8x128xf32>
    %228 = math.tanh %222 : vector<8x128xf32>
    %229 = vector.extract_strided_slice %227 {offsets = [0, 0], sizes = [8, 32], strides = [1, 1]} : vector<8x128xf32> to vector<8x32xf32>
    %230 = vector.extract_strided_slice %227 {offsets = [0, 32], sizes = [8, 32], strides = [1, 1]} : vector<8x128xf32> to vector<8x32xf32>
    %231 = vector.extract_strided_slice %228 {offsets = [0, 64], sizes = [8, 32], strides = [1, 1]} : vector<8x128xf32> to vector<8x32xf32>
    %232 = vector.extract_strided_slice %227 {offsets = [0, 96], sizes = [8, 32], strides = [1, 1]} : vector<8x128xf32> to vector<8x32xf32>
    %233 = arith.mulf %230, %215 : vector<8x32xf32>
    %234 = arith.mulf %229, %231 : vector<8x32xf32>
    %235 = arith.addf %233, %234 : vector<8x32xf32>
    %236 = math.tanh %235 : vector<8x32xf32>
    %237 = arith.mulf %232, %236 : vector<8x32xf32>
    %c7_i32 = arith.constant 7 : i32
    %238 = vector.broadcast %c7_i32 : i32 to vector<8x1xi32>
    %239 = arith.cmpi sgt, %7, %238 : vector<8x1xi32>
    %240 = vector.shape_cast %239 : vector<8x1xi1> to vector<8x1xi1>
    %241 = vector.broadcast %240 : vector<8x1xi1> to vector<8x32xi1>
    %242 = arith.select %241, %237, %212 : vector<8x32xi1>, vector<8x32xf32>
    %cst_34 = arith.constant 0.000000e+00 : f32
    %243 = vector.shape_cast %239 : vector<8x1xi1> to vector<8x1xi1>
    %244 = vector.broadcast %243 : vector<8x1xi1> to vector<8x32xi1>
    %245 = vector.broadcast %cst_34 : f32 to vector<8x32xf32>
    %246 = arith.select %244, %237, %245 : vector<8x32xi1>, vector<8x32xf32>
    %247 = tpu.concatenate %39, %69, %99, %129, %159, %189, %219, %246 in 0 : vector<8x32xf32>, vector<8x32xf32>, vector<8x32xf32>, vector<8x32xf32>, vector<8x32xf32>, vector<8x32xf32>, vector<8x32xf32>, vector<8x32xf32> -> vector<64x32xf32>
    %c0_35 = arith.constant 0 : index
    %c0_36 = arith.constant 0 : index
    %248 = vector.load %arg5[%c0_35, %c0_36] : memref<32x32xf32, #tpu.memory_space<vmem>>, vector<32x32xf32>
    %cst_37 = arith.constant dense<0.000000e+00> : vector<64x32xf32>
    %249 = tpu.matmul %247, %248, %cst_37 {dimension_numbers = #tpu.dot_dimension_numbers<[1], [0], [0], [1], [0, 0, 1, 1], [], []>} : vector<64x32xf32>, vector<32x32xf32>, vector<64x32xf32> -> vector<64x32xf32>
    %c0_38 = arith.constant 0 : index
    %c0_39 = arith.constant 0 : index
    %250 = vector.load %arg6[%c0_38, %c0_39] : memref<1x32xf32, #tpu.memory_space<vmem>>, vector<1x32xf32>
    %251 = vector.broadcast %250 : vector<1x32xf32> to vector<64x32xf32>
    %252 = arith.addf %249, %251 : vector<64x32xf32>
    %c0_40 = arith.constant 0 : index
    %c0_41 = arith.constant 0 : index
    %253 = vector.load %arg12[%c0_40, %c0_41] : memref<32x32xf32, #tpu.memory_space<vmem>>, vector<32x32xf32>
    %cst_42 = arith.constant dense<0.000000e+00> : vector<64x32xf32>
    %254 = tpu.matmul %252, %253, %cst_42 {dimension_numbers = #tpu.dot_dimension_numbers<[1], [0], [0], [1], [0, 0, 1, 1], [], []>} : vector<64x32xf32>, vector<32x32xf32>, vector<64x32xf32> -> vector<64x32xf32>
    %c0_43 = arith.constant 0 : index
    %c0_44 = arith.constant 0 : index
    %255 = vector.load %arg7[%c0_43, %c0_44] : memref<8x32xf32, #tpu.memory_space<vmem>>, vector<8x32xf32>
    %256 = tpu.concatenate %242, %255 in 1 : vector<8x32xf32>, vector<8x32xf32> -> vector<8x64xf32>
    %c0_45 = arith.constant 0 : index
    %c0_46 = arith.constant 0 : index
    %257 = vector.load %arg8[%c0_45, %c0_46] : memref<64x32xf32, #tpu.memory_space<vmem>>, vector<64x32xf32>
    %cst_47 = arith.constant dense<0.000000e+00> : vector<8x32xf32>
    %258 = tpu.matmul %256, %257, %cst_47 {dimension_numbers = #tpu.dot_dimension_numbers<[1], [0], [0], [1], [0, 0, 1, 1], [], []>} : vector<8x64xf32>, vector<64x32xf32>, vector<8x32xf32> -> vector<8x32xf32>
    %c0_48 = arith.constant 0 : index
    %c0_49 = arith.constant 0 : index
    %259 = vector.load %arg9[%c0_48, %c0_49] : memref<1x32xf32, #tpu.memory_space<vmem>>, vector<1x32xf32>
    %260 = vector.broadcast %259 : vector<1x32xf32> to vector<8x32xf32>
    %261 = arith.addf %258, %260 : vector<8x32xf32>
    %c0_50 = arith.constant 0 : index
    %c0_51 = arith.constant 0 : index
    %262 = vector.load %arg10[%c0_50, %c0_51] : memref<64x32xf32, #tpu.memory_space<vmem>>, vector<64x32xf32>
    %cst_52 = arith.constant dense<0.000000e+00> : vector<8x32xf32>
    %263 = tpu.matmul %256, %262, %cst_52 {dimension_numbers = #tpu.dot_dimension_numbers<[1], [0], [0], [1], [0, 0, 1, 1], [], []>} : vector<8x64xf32>, vector<64x32xf32>, vector<8x32xf32> -> vector<8x32xf32>
    %c0_53 = arith.constant 0 : index
    %c0_54 = arith.constant 0 : index
    %264 = vector.load %arg11[%c0_53, %c0_54] : memref<1x32xf32, #tpu.memory_space<vmem>>, vector<1x32xf32>
    %265 = vector.broadcast %264 : vector<1x32xf32> to vector<8x32xf32>
    %266 = arith.addf %263, %265 : vector<8x32xf32>
    %c0_55 = arith.constant 0 : index
    %c0_56 = arith.constant 0 : index
    %267 = vector.load %arg13[%c0_55, %c0_56] : memref<64x32xf32, #tpu.memory_space<vmem>>, vector<64x32xf32>
    %c0_57 = arith.constant 0 : index
    %c0_58 = arith.constant 0 : index
    %268 = vector.load %arg14[%c0_57, %c0_58] : memref<32x128xf32, #tpu.memory_space<vmem>>, vector<32x128xf32>
    %cst_59 = arith.constant dense<0.000000e+00> : vector<64x128xf32>
    %269 = tpu.matmul %267, %268, %cst_59 {dimension_numbers = #tpu.dot_dimension_numbers<[1], [0], [0], [1], [0, 0, 1, 1], [], []>} : vector<64x32xf32>, vector<32x128xf32>, vector<64x128xf32> -> vector<64x128xf32>
    %c0_60 = arith.constant 0 : index
    %c0_61 = arith.constant 0 : index
    %270 = vector.load %arg16[%c0_60, %c0_61] : memref<1x128xf32, #tpu.memory_space<vmem>>, vector<1x128xf32>
    %271 = vector.broadcast %270 : vector<1x128xf32> to vector<64x128xf32>
    %272 = arith.addf %269, %271 : vector<64x128xf32>
    %c0_62 = arith.constant 0 : index
    %c0_63 = arith.constant 0 : index
    %273 = vector.load %arg15[%c0_62, %c0_63] : memref<32x128xf32, #tpu.memory_space<vmem>>, vector<32x128xf32>
    %c0_64 = arith.constant 0 : index
    %c0_65 = arith.constant 0 : index
    %274 = vector.load %arg17[%c0_64, %c0_65] : memref<8x64xf32, #tpu.memory_space<vmem>>, vector<8x64xf32>
    %c0_66 = arith.constant 0 : index
    %c0_67 = arith.constant 0 : index
    %275 = vector.load %arg18[%c0_66, %c0_67] : memref<64x32xf32, #tpu.memory_space<vmem>>, vector<64x32xf32>
    %276 = vector.extract_strided_slice %272 {offsets = [0, 0], sizes = [8, 128], strides = [1, 1]} : vector<64x128xf32> to vector<8x128xf32>
    %cst_68 = arith.constant dense<0.000000e+00> : vector<8x128xf32>
    %277 = tpu.matmul %261, %273, %cst_68 {dimension_numbers = #tpu.dot_dimension_numbers<[1], [0], [0], [1], [0, 0, 1, 1], [], []>} : vector<8x32xf32>, vector<32x128xf32>, vector<8x128xf32> -> vector<8x128xf32>
    %278 = arith.addf %276, %277 : vector<8x128xf32>
    %279 = arith.negf %278 : vector<8x128xf32>
    %280 = math.exp %279 : vector<8x128xf32>
    %cst_69 = arith.constant 1.000000e+00 : f32
    %281 = vector.broadcast %cst_69 : f32 to vector<8x128xf32>
    %282 = arith.addf %281, %280 : vector<8x128xf32>
    %283 = arith.divf %281, %282 : vector<8x128xf32>
    %284 = math.tanh %278 : vector<8x128xf32>
    %285 = vector.extract_strided_slice %283 {offsets = [0, 0], sizes = [8, 32], strides = [1, 1]} : vector<8x128xf32> to vector<8x32xf32>
    %286 = vector.extract_strided_slice %283 {offsets = [0, 32], sizes = [8, 32], strides = [1, 1]} : vector<8x128xf32> to vector<8x32xf32>
    %287 = vector.extract_strided_slice %284 {offsets = [0, 64], sizes = [8, 32], strides = [1, 1]} : vector<8x128xf32> to vector<8x32xf32>
    %288 = vector.extract_strided_slice %283 {offsets = [0, 96], sizes = [8, 32], strides = [1, 1]} : vector<8x128xf32> to vector<8x32xf32>
    %289 = arith.mulf %286, %266 : vector<8x32xf32>
    %290 = arith.mulf %285, %287 : vector<8x32xf32>
    %291 = arith.addf %289, %290 : vector<8x32xf32>
    %292 = math.tanh %291 : vector<8x32xf32>
    %293 = arith.mulf %288, %292 : vector<8x32xf32>
    %cst_70 = arith.constant dense<0.000000e+00> : vector<8x64xf32>
    %294 = tpu.matmul %293, %254, %cst_70 {dimension_numbers = #tpu.dot_dimension_numbers<[1], [1], [0], [0], [0, 0, 1, 0], [], []>} : vector<8x32xf32>, vector<64x32xf32>, vector<8x64xf32> -> vector<8x64xf32>
    %295 = arith.addf %294, %274 : vector<8x64xf32>
    %cst_71 = arith.constant dense<0xFF800000> : vector<8xf32>
    %296 = vector.multi_reduction <maximumf>, %295, %cst_71 [1] : vector<8x64xf32> to vector<8xf32>
    %297 = vector.shape_cast %296 : vector<8xf32> to vector<8x1xf32>
    %298 = vector.broadcast %297 : vector<8x1xf32> to vector<8x64xf32>
    %299 = arith.subf %295, %298 : vector<8x64xf32>
    %300 = math.exp %299 : vector<8x64xf32>
    %cst_72 = arith.constant dense<0.000000e+00> : vector<8xf32>
    %301 = vector.multi_reduction <add>, %300, %cst_72 [1] : vector<8x64xf32> to vector<8xf32>
    %302 = vector.shape_cast %301 : vector<8xf32> to vector<8x1xf32>
    %303 = tpu.reciprocal %302 {approx = true} : vector<8x1xf32> -> vector<8x1xf32>
    %304 = vector.broadcast %303 : vector<8x1xf32> to vector<8x64xf32>
    %305 = arith.mulf %300, %304 : vector<8x64xf32>
    %cst_73 = arith.constant dense<0.000000e+00> : vector<8x32xf32>
    %306 = tpu.matmul %305, %252, %cst_73 {dimension_numbers = #tpu.dot_dimension_numbers<[1], [0], [0], [1], [0, 0, 1, 1], [], []>} : vector<8x64xf32>, vector<64x32xf32>, vector<8x32xf32> -> vector<8x32xf32>
    %307 = tpu.concatenate %306, %293 in 1 : vector<8x32xf32>, vector<8x32xf32> -> vector<8x64xf32>
    %cst_74 = arith.constant dense<0.000000e+00> : vector<8x32xf32>
    %308 = tpu.matmul %307, %275, %cst_74 {dimension_numbers = #tpu.dot_dimension_numbers<[1], [0], [0], [1], [0, 0, 1, 1], [], []>} : vector<8x64xf32>, vector<64x32xf32>, vector<8x32xf32> -> vector<8x32xf32>
    %309 = math.tanh %308 : vector<8x32xf32>
    %310 = vector.extract_strided_slice %272 {offsets = [8, 0], sizes = [8, 128], strides = [1, 1]} : vector<64x128xf32> to vector<8x128xf32>
    %cst_75 = arith.constant dense<0.000000e+00> : vector<8x128xf32>
    %311 = tpu.matmul %293, %273, %cst_75 {dimension_numbers = #tpu.dot_dimension_numbers<[1], [0], [0], [1], [0, 0, 1, 1], [], []>} : vector<8x32xf32>, vector<32x128xf32>, vector<8x128xf32> -> vector<8x128xf32>
    %312 = arith.addf %310, %311 : vector<8x128xf32>
    %313 = arith.negf %312 : vector<8x128xf32>
    %314 = math.exp %313 : vector<8x128xf32>
    %cst_76 = arith.constant 1.000000e+00 : f32
    %315 = vector.broadcast %cst_76 : f32 to vector<8x128xf32>
    %316 = arith.addf %315, %314 : vector<8x128xf32>
    %317 = arith.divf %315, %316 : vector<8x128xf32>
    %318 = math.tanh %312 : vector<8x128xf32>
    %319 = vector.extract_strided_slice %317 {offsets = [0, 0], sizes = [8, 32], strides = [1, 1]} : vector<8x128xf32> to vector<8x32xf32>
    %320 = vector.extract_strided_slice %317 {offsets = [0, 32], sizes = [8, 32], strides = [1, 1]} : vector<8x128xf32> to vector<8x32xf32>
    %321 = vector.extract_strided_slice %318 {offsets = [0, 64], sizes = [8, 32], strides = [1, 1]} : vector<8x128xf32> to vector<8x32xf32>
    %322 = vector.extract_strided_slice %317 {offsets = [0, 96], sizes = [8, 32], strides = [1, 1]} : vector<8x128xf32> to vector<8x32xf32>
    %323 = arith.mulf %320, %291 : vector<8x32xf32>
    %324 = arith.mulf %319, %321 : vector<8x32xf32>
    %325 = arith.addf %323, %324 : vector<8x32xf32>
    %326 = math.tanh %325 : vector<8x32xf32>
    %327 = arith.mulf %322, %326 : vector<8x32xf32>
    %cst_77 = arith.constant dense<0.000000e+00> : vector<8x64xf32>
    %328 = tpu.matmul %327, %254, %cst_77 {dimension_numbers = #tpu.dot_dimension_numbers<[1], [1], [0], [0], [0, 0, 1, 0], [], []>} : vector<8x32xf32>, vector<64x32xf32>, vector<8x64xf32> -> vector<8x64xf32>
    %329 = arith.addf %328, %274 : vector<8x64xf32>
    %cst_78 = arith.constant dense<0xFF800000> : vector<8xf32>
    %330 = vector.multi_reduction <maximumf>, %329, %cst_78 [1] : vector<8x64xf32> to vector<8xf32>
    %331 = vector.shape_cast %330 : vector<8xf32> to vector<8x1xf32>
    %332 = vector.broadcast %331 : vector<8x1xf32> to vector<8x64xf32>
    %333 = arith.subf %329, %332 : vector<8x64xf32>
    %334 = math.exp %333 : vector<8x64xf32>
    %cst_79 = arith.constant dense<0.000000e+00> : vector<8xf32>
    %335 = vector.multi_reduction <add>, %334, %cst_79 [1] : vector<8x64xf32> to vector<8xf32>
    %336 = vector.shape_cast %335 : vector<8xf32> to vector<8x1xf32>
    %337 = tpu.reciprocal %336 {approx = true} : vector<8x1xf32> -> vector<8x1xf32>
    %338 = vector.broadcast %337 : vector<8x1xf32> to vector<8x64xf32>
    %339 = arith.mulf %334, %338 : vector<8x64xf32>
    %cst_80 = arith.constant dense<0.000000e+00> : vector<8x32xf32>
    %340 = tpu.matmul %339, %252, %cst_80 {dimension_numbers = #tpu.dot_dimension_numbers<[1], [0], [0], [1], [0, 0, 1, 1], [], []>} : vector<8x64xf32>, vector<64x32xf32>, vector<8x32xf32> -> vector<8x32xf32>
    %341 = tpu.concatenate %340, %327 in 1 : vector<8x32xf32>, vector<8x32xf32> -> vector<8x64xf32>
    %cst_81 = arith.constant dense<0.000000e+00> : vector<8x32xf32>
    %342 = tpu.matmul %341, %275, %cst_81 {dimension_numbers = #tpu.dot_dimension_numbers<[1], [0], [0], [1], [0, 0, 1, 1], [], []>} : vector<8x64xf32>, vector<64x32xf32>, vector<8x32xf32> -> vector<8x32xf32>
    %343 = math.tanh %342 : vector<8x32xf32>
    %344 = vector.extract_strided_slice %272 {offsets = [16, 0], sizes = [8, 128], strides = [1, 1]} : vector<64x128xf32> to vector<8x128xf32>
    %cst_82 = arith.constant dense<0.000000e+00> : vector<8x128xf32>
    %345 = tpu.matmul %327, %273, %cst_82 {dimension_numbers = #tpu.dot_dimension_numbers<[1], [0], [0], [1], [0, 0, 1, 1], [], []>} : vector<8x32xf32>, vector<32x128xf32>, vector<8x128xf32> -> vector<8x128xf32>
    %346 = arith.addf %344, %345 : vector<8x128xf32>
    %347 = arith.negf %346 : vector<8x128xf32>
    %348 = math.exp %347 : vector<8x128xf32>
    %cst_83 = arith.constant 1.000000e+00 : f32
    %349 = vector.broadcast %cst_83 : f32 to vector<8x128xf32>
    %350 = arith.addf %349, %348 : vector<8x128xf32>
    %351 = arith.divf %349, %350 : vector<8x128xf32>
    %352 = math.tanh %346 : vector<8x128xf32>
    %353 = vector.extract_strided_slice %351 {offsets = [0, 0], sizes = [8, 32], strides = [1, 1]} : vector<8x128xf32> to vector<8x32xf32>
    %354 = vector.extract_strided_slice %351 {offsets = [0, 32], sizes = [8, 32], strides = [1, 1]} : vector<8x128xf32> to vector<8x32xf32>
    %355 = vector.extract_strided_slice %352 {offsets = [0, 64], sizes = [8, 32], strides = [1, 1]} : vector<8x128xf32> to vector<8x32xf32>
    %356 = vector.extract_strided_slice %351 {offsets = [0, 96], sizes = [8, 32], strides = [1, 1]} : vector<8x128xf32> to vector<8x32xf32>
    %357 = arith.mulf %354, %325 : vector<8x32xf32>
    %358 = arith.mulf %353, %355 : vector<8x32xf32>
    %359 = arith.addf %357, %358 : vector<8x32xf32>
    %360 = math.tanh %359 : vector<8x32xf32>
    %361 = arith.mulf %356, %360 : vector<8x32xf32>
    %cst_84 = arith.constant dense<0.000000e+00> : vector<8x64xf32>
    %362 = tpu.matmul %361, %254, %cst_84 {dimension_numbers = #tpu.dot_dimension_numbers<[1], [1], [0], [0], [0, 0, 1, 0], [], []>} : vector<8x32xf32>, vector<64x32xf32>, vector<8x64xf32> -> vector<8x64xf32>
    %363 = arith.addf %362, %274 : vector<8x64xf32>
    %cst_85 = arith.constant dense<0xFF800000> : vector<8xf32>
    %364 = vector.multi_reduction <maximumf>, %363, %cst_85 [1] : vector<8x64xf32> to vector<8xf32>
    %365 = vector.shape_cast %364 : vector<8xf32> to vector<8x1xf32>
    %366 = vector.broadcast %365 : vector<8x1xf32> to vector<8x64xf32>
    %367 = arith.subf %363, %366 : vector<8x64xf32>
    %368 = math.exp %367 : vector<8x64xf32>
    %cst_86 = arith.constant dense<0.000000e+00> : vector<8xf32>
    %369 = vector.multi_reduction <add>, %368, %cst_86 [1] : vector<8x64xf32> to vector<8xf32>
    %370 = vector.shape_cast %369 : vector<8xf32> to vector<8x1xf32>
    %371 = tpu.reciprocal %370 {approx = true} : vector<8x1xf32> -> vector<8x1xf32>
    %372 = vector.broadcast %371 : vector<8x1xf32> to vector<8x64xf32>
    %373 = arith.mulf %368, %372 : vector<8x64xf32>
    %cst_87 = arith.constant dense<0.000000e+00> : vector<8x32xf32>
    %374 = tpu.matmul %373, %252, %cst_87 {dimension_numbers = #tpu.dot_dimension_numbers<[1], [0], [0], [1], [0, 0, 1, 1], [], []>} : vector<8x64xf32>, vector<64x32xf32>, vector<8x32xf32> -> vector<8x32xf32>
    %375 = tpu.concatenate %374, %361 in 1 : vector<8x32xf32>, vector<8x32xf32> -> vector<8x64xf32>
    %cst_88 = arith.constant dense<0.000000e+00> : vector<8x32xf32>
    %376 = tpu.matmul %375, %275, %cst_88 {dimension_numbers = #tpu.dot_dimension_numbers<[1], [0], [0], [1], [0, 0, 1, 1], [], []>} : vector<8x64xf32>, vector<64x32xf32>, vector<8x32xf32> -> vector<8x32xf32>
    %377 = math.tanh %376 : vector<8x32xf32>
    %378 = vector.extract_strided_slice %272 {offsets = [24, 0], sizes = [8, 128], strides = [1, 1]} : vector<64x128xf32> to vector<8x128xf32>
    %cst_89 = arith.constant dense<0.000000e+00> : vector<8x128xf32>
    %379 = tpu.matmul %361, %273, %cst_89 {dimension_numbers = #tpu.dot_dimension_numbers<[1], [0], [0], [1], [0, 0, 1, 1], [], []>} : vector<8x32xf32>, vector<32x128xf32>, vector<8x128xf32> -> vector<8x128xf32>
    %380 = arith.addf %378, %379 : vector<8x128xf32>
    %381 = arith.negf %380 : vector<8x128xf32>
    %382 = math.exp %381 : vector<8x128xf32>
    %cst_90 = arith.constant 1.000000e+00 : f32
    %383 = vector.broadcast %cst_90 : f32 to vector<8x128xf32>
    %384 = arith.addf %383, %382 : vector<8x128xf32>
    %385 = arith.divf %383, %384 : vector<8x128xf32>
    %386 = math.tanh %380 : vector<8x128xf32>
    %387 = vector.extract_strided_slice %385 {offsets = [0, 0], sizes = [8, 32], strides = [1, 1]} : vector<8x128xf32> to vector<8x32xf32>
    %388 = vector.extract_strided_slice %385 {offsets = [0, 32], sizes = [8, 32], strides = [1, 1]} : vector<8x128xf32> to vector<8x32xf32>
    %389 = vector.extract_strided_slice %386 {offsets = [0, 64], sizes = [8, 32], strides = [1, 1]} : vector<8x128xf32> to vector<8x32xf32>
    %390 = vector.extract_strided_slice %385 {offsets = [0, 96], sizes = [8, 32], strides = [1, 1]} : vector<8x128xf32> to vector<8x32xf32>
    %391 = arith.mulf %388, %359 : vector<8x32xf32>
    %392 = arith.mulf %387, %389 : vector<8x32xf32>
    %393 = arith.addf %391, %392 : vector<8x32xf32>
    %394 = math.tanh %393 : vector<8x32xf32>
    %395 = arith.mulf %390, %394 : vector<8x32xf32>
    %cst_91 = arith.constant dense<0.000000e+00> : vector<8x64xf32>
    %396 = tpu.matmul %395, %254, %cst_91 {dimension_numbers = #tpu.dot_dimension_numbers<[1], [1], [0], [0], [0, 0, 1, 0], [], []>} : vector<8x32xf32>, vector<64x32xf32>, vector<8x64xf32> -> vector<8x64xf32>
    %397 = arith.addf %396, %274 : vector<8x64xf32>
    %cst_92 = arith.constant dense<0xFF800000> : vector<8xf32>
    %398 = vector.multi_reduction <maximumf>, %397, %cst_92 [1] : vector<8x64xf32> to vector<8xf32>
    %399 = vector.shape_cast %398 : vector<8xf32> to vector<8x1xf32>
    %400 = vector.broadcast %399 : vector<8x1xf32> to vector<8x64xf32>
    %401 = arith.subf %397, %400 : vector<8x64xf32>
    %402 = math.exp %401 : vector<8x64xf32>
    %cst_93 = arith.constant dense<0.000000e+00> : vector<8xf32>
    %403 = vector.multi_reduction <add>, %402, %cst_93 [1] : vector<8x64xf32> to vector<8xf32>
    %404 = vector.shape_cast %403 : vector<8xf32> to vector<8x1xf32>
    %405 = tpu.reciprocal %404 {approx = true} : vector<8x1xf32> -> vector<8x1xf32>
    %406 = vector.broadcast %405 : vector<8x1xf32> to vector<8x64xf32>
    %407 = arith.mulf %402, %406 : vector<8x64xf32>
    %cst_94 = arith.constant dense<0.000000e+00> : vector<8x32xf32>
    %408 = tpu.matmul %407, %252, %cst_94 {dimension_numbers = #tpu.dot_dimension_numbers<[1], [0], [0], [1], [0, 0, 1, 1], [], []>} : vector<8x64xf32>, vector<64x32xf32>, vector<8x32xf32> -> vector<8x32xf32>
    %409 = tpu.concatenate %408, %395 in 1 : vector<8x32xf32>, vector<8x32xf32> -> vector<8x64xf32>
    %cst_95 = arith.constant dense<0.000000e+00> : vector<8x32xf32>
    %410 = tpu.matmul %409, %275, %cst_95 {dimension_numbers = #tpu.dot_dimension_numbers<[1], [0], [0], [1], [0, 0, 1, 1], [], []>} : vector<8x64xf32>, vector<64x32xf32>, vector<8x32xf32> -> vector<8x32xf32>
    %411 = math.tanh %410 : vector<8x32xf32>
    %412 = vector.extract_strided_slice %272 {offsets = [32, 0], sizes = [8, 128], strides = [1, 1]} : vector<64x128xf32> to vector<8x128xf32>
    %cst_96 = arith.constant dense<0.000000e+00> : vector<8x128xf32>
    %413 = tpu.matmul %395, %273, %cst_96 {dimension_numbers = #tpu.dot_dimension_numbers<[1], [0], [0], [1], [0, 0, 1, 1], [], []>} : vector<8x32xf32>, vector<32x128xf32>, vector<8x128xf32> -> vector<8x128xf32>
    %414 = arith.addf %412, %413 : vector<8x128xf32>
    %415 = arith.negf %414 : vector<8x128xf32>
    %416 = math.exp %415 : vector<8x128xf32>
    %cst_97 = arith.constant 1.000000e+00 : f32
    %417 = vector.broadcast %cst_97 : f32 to vector<8x128xf32>
    %418 = arith.addf %417, %416 : vector<8x128xf32>
    %419 = arith.divf %417, %418 : vector<8x128xf32>
    %420 = math.tanh %414 : vector<8x128xf32>
    %421 = vector.extract_strided_slice %419 {offsets = [0, 0], sizes = [8, 32], strides = [1, 1]} : vector<8x128xf32> to vector<8x32xf32>
    %422 = vector.extract_strided_slice %419 {offsets = [0, 32], sizes = [8, 32], strides = [1, 1]} : vector<8x128xf32> to vector<8x32xf32>
    %423 = vector.extract_strided_slice %420 {offsets = [0, 64], sizes = [8, 32], strides = [1, 1]} : vector<8x128xf32> to vector<8x32xf32>
    %424 = vector.extract_strided_slice %419 {offsets = [0, 96], sizes = [8, 32], strides = [1, 1]} : vector<8x128xf32> to vector<8x32xf32>
    %425 = arith.mulf %422, %393 : vector<8x32xf32>
    %426 = arith.mulf %421, %423 : vector<8x32xf32>
    %427 = arith.addf %425, %426 : vector<8x32xf32>
    %428 = math.tanh %427 : vector<8x32xf32>
    %429 = arith.mulf %424, %428 : vector<8x32xf32>
    %cst_98 = arith.constant dense<0.000000e+00> : vector<8x64xf32>
    %430 = tpu.matmul %429, %254, %cst_98 {dimension_numbers = #tpu.dot_dimension_numbers<[1], [1], [0], [0], [0, 0, 1, 0], [], []>} : vector<8x32xf32>, vector<64x32xf32>, vector<8x64xf32> -> vector<8x64xf32>
    %431 = arith.addf %430, %274 : vector<8x64xf32>
    %cst_99 = arith.constant dense<0xFF800000> : vector<8xf32>
    %432 = vector.multi_reduction <maximumf>, %431, %cst_99 [1] : vector<8x64xf32> to vector<8xf32>
    %433 = vector.shape_cast %432 : vector<8xf32> to vector<8x1xf32>
    %434 = vector.broadcast %433 : vector<8x1xf32> to vector<8x64xf32>
    %435 = arith.subf %431, %434 : vector<8x64xf32>
    %436 = math.exp %435 : vector<8x64xf32>
    %cst_100 = arith.constant dense<0.000000e+00> : vector<8xf32>
    %437 = vector.multi_reduction <add>, %436, %cst_100 [1] : vector<8x64xf32> to vector<8xf32>
    %438 = vector.shape_cast %437 : vector<8xf32> to vector<8x1xf32>
    %439 = tpu.reciprocal %438 {approx = true} : vector<8x1xf32> -> vector<8x1xf32>
    %440 = vector.broadcast %439 : vector<8x1xf32> to vector<8x64xf32>
    %441 = arith.mulf %436, %440 : vector<8x64xf32>
    %cst_101 = arith.constant dense<0.000000e+00> : vector<8x32xf32>
    %442 = tpu.matmul %441, %252, %cst_101 {dimension_numbers = #tpu.dot_dimension_numbers<[1], [0], [0], [1], [0, 0, 1, 1], [], []>} : vector<8x64xf32>, vector<64x32xf32>, vector<8x32xf32> -> vector<8x32xf32>
    %443 = tpu.concatenate %442, %429 in 1 : vector<8x32xf32>, vector<8x32xf32> -> vector<8x64xf32>
    %cst_102 = arith.constant dense<0.000000e+00> : vector<8x32xf32>
    %444 = tpu.matmul %443, %275, %cst_102 {dimension_numbers = #tpu.dot_dimension_numbers<[1], [0], [0], [1], [0, 0, 1, 1], [], []>} : vector<8x64xf32>, vector<64x32xf32>, vector<8x32xf32> -> vector<8x32xf32>
    %445 = math.tanh %444 : vector<8x32xf32>
    %446 = vector.extract_strided_slice %272 {offsets = [40, 0], sizes = [8, 128], strides = [1, 1]} : vector<64x128xf32> to vector<8x128xf32>
    %cst_103 = arith.constant dense<0.000000e+00> : vector<8x128xf32>
    %447 = tpu.matmul %429, %273, %cst_103 {dimension_numbers = #tpu.dot_dimension_numbers<[1], [0], [0], [1], [0, 0, 1, 1], [], []>} : vector<8x32xf32>, vector<32x128xf32>, vector<8x128xf32> -> vector<8x128xf32>
    %448 = arith.addf %446, %447 : vector<8x128xf32>
    %449 = arith.negf %448 : vector<8x128xf32>
    %450 = math.exp %449 : vector<8x128xf32>
    %cst_104 = arith.constant 1.000000e+00 : f32
    %451 = vector.broadcast %cst_104 : f32 to vector<8x128xf32>
    %452 = arith.addf %451, %450 : vector<8x128xf32>
    %453 = arith.divf %451, %452 : vector<8x128xf32>
    %454 = math.tanh %448 : vector<8x128xf32>
    %455 = vector.extract_strided_slice %453 {offsets = [0, 0], sizes = [8, 32], strides = [1, 1]} : vector<8x128xf32> to vector<8x32xf32>
    %456 = vector.extract_strided_slice %453 {offsets = [0, 32], sizes = [8, 32], strides = [1, 1]} : vector<8x128xf32> to vector<8x32xf32>
    %457 = vector.extract_strided_slice %454 {offsets = [0, 64], sizes = [8, 32], strides = [1, 1]} : vector<8x128xf32> to vector<8x32xf32>
    %458 = vector.extract_strided_slice %453 {offsets = [0, 96], sizes = [8, 32], strides = [1, 1]} : vector<8x128xf32> to vector<8x32xf32>
    %459 = arith.mulf %456, %427 : vector<8x32xf32>
    %460 = arith.mulf %455, %457 : vector<8x32xf32>
    %461 = arith.addf %459, %460 : vector<8x32xf32>
    %462 = math.tanh %461 : vector<8x32xf32>
    %463 = arith.mulf %458, %462 : vector<8x32xf32>
    %cst_105 = arith.constant dense<0.000000e+00> : vector<8x64xf32>
    %464 = tpu.matmul %463, %254, %cst_105 {dimension_numbers = #tpu.dot_dimension_numbers<[1], [1], [0], [0], [0, 0, 1, 0], [], []>} : vector<8x32xf32>, vector<64x32xf32>, vector<8x64xf32> -> vector<8x64xf32>
    %465 = arith.addf %464, %274 : vector<8x64xf32>
    %cst_106 = arith.constant dense<0xFF800000> : vector<8xf32>
    %466 = vector.multi_reduction <maximumf>, %465, %cst_106 [1] : vector<8x64xf32> to vector<8xf32>
    %467 = vector.shape_cast %466 : vector<8xf32> to vector<8x1xf32>
    %468 = vector.broadcast %467 : vector<8x1xf32> to vector<8x64xf32>
    %469 = arith.subf %465, %468 : vector<8x64xf32>
    %470 = math.exp %469 : vector<8x64xf32>
    %cst_107 = arith.constant dense<0.000000e+00> : vector<8xf32>
    %471 = vector.multi_reduction <add>, %470, %cst_107 [1] : vector<8x64xf32> to vector<8xf32>
    %472 = vector.shape_cast %471 : vector<8xf32> to vector<8x1xf32>
    %473 = tpu.reciprocal %472 {approx = true} : vector<8x1xf32> -> vector<8x1xf32>
    %474 = vector.broadcast %473 : vector<8x1xf32> to vector<8x64xf32>
    %475 = arith.mulf %470, %474 : vector<8x64xf32>
    %cst_108 = arith.constant dense<0.000000e+00> : vector<8x32xf32>
    %476 = tpu.matmul %475, %252, %cst_108 {dimension_numbers = #tpu.dot_dimension_numbers<[1], [0], [0], [1], [0, 0, 1, 1], [], []>} : vector<8x64xf32>, vector<64x32xf32>, vector<8x32xf32> -> vector<8x32xf32>
    %477 = tpu.concatenate %476, %463 in 1 : vector<8x32xf32>, vector<8x32xf32> -> vector<8x64xf32>
    %cst_109 = arith.constant dense<0.000000e+00> : vector<8x32xf32>
    %478 = tpu.matmul %477, %275, %cst_109 {dimension_numbers = #tpu.dot_dimension_numbers<[1], [0], [0], [1], [0, 0, 1, 1], [], []>} : vector<8x64xf32>, vector<64x32xf32>, vector<8x32xf32> -> vector<8x32xf32>
    %479 = math.tanh %478 : vector<8x32xf32>
    %480 = vector.extract_strided_slice %272 {offsets = [48, 0], sizes = [8, 128], strides = [1, 1]} : vector<64x128xf32> to vector<8x128xf32>
    %cst_110 = arith.constant dense<0.000000e+00> : vector<8x128xf32>
    %481 = tpu.matmul %463, %273, %cst_110 {dimension_numbers = #tpu.dot_dimension_numbers<[1], [0], [0], [1], [0, 0, 1, 1], [], []>} : vector<8x32xf32>, vector<32x128xf32>, vector<8x128xf32> -> vector<8x128xf32>
    %482 = arith.addf %480, %481 : vector<8x128xf32>
    %483 = arith.negf %482 : vector<8x128xf32>
    %484 = math.exp %483 : vector<8x128xf32>
    %cst_111 = arith.constant 1.000000e+00 : f32
    %485 = vector.broadcast %cst_111 : f32 to vector<8x128xf32>
    %486 = arith.addf %485, %484 : vector<8x128xf32>
    %487 = arith.divf %485, %486 : vector<8x128xf32>
    %488 = math.tanh %482 : vector<8x128xf32>
    %489 = vector.extract_strided_slice %487 {offsets = [0, 0], sizes = [8, 32], strides = [1, 1]} : vector<8x128xf32> to vector<8x32xf32>
    %490 = vector.extract_strided_slice %487 {offsets = [0, 32], sizes = [8, 32], strides = [1, 1]} : vector<8x128xf32> to vector<8x32xf32>
    %491 = vector.extract_strided_slice %488 {offsets = [0, 64], sizes = [8, 32], strides = [1, 1]} : vector<8x128xf32> to vector<8x32xf32>
    %492 = vector.extract_strided_slice %487 {offsets = [0, 96], sizes = [8, 32], strides = [1, 1]} : vector<8x128xf32> to vector<8x32xf32>
    %493 = arith.mulf %490, %461 : vector<8x32xf32>
    %494 = arith.mulf %489, %491 : vector<8x32xf32>
    %495 = arith.addf %493, %494 : vector<8x32xf32>
    %496 = math.tanh %495 : vector<8x32xf32>
    %497 = arith.mulf %492, %496 : vector<8x32xf32>
    %cst_112 = arith.constant dense<0.000000e+00> : vector<8x64xf32>
    %498 = tpu.matmul %497, %254, %cst_112 {dimension_numbers = #tpu.dot_dimension_numbers<[1], [1], [0], [0], [0, 0, 1, 0], [], []>} : vector<8x32xf32>, vector<64x32xf32>, vector<8x64xf32> -> vector<8x64xf32>
    %499 = arith.addf %498, %274 : vector<8x64xf32>
    %cst_113 = arith.constant dense<0xFF800000> : vector<8xf32>
    %500 = vector.multi_reduction <maximumf>, %499, %cst_113 [1] : vector<8x64xf32> to vector<8xf32>
    %501 = vector.shape_cast %500 : vector<8xf32> to vector<8x1xf32>
    %502 = vector.broadcast %501 : vector<8x1xf32> to vector<8x64xf32>
    %503 = arith.subf %499, %502 : vector<8x64xf32>
    %504 = math.exp %503 : vector<8x64xf32>
    %cst_114 = arith.constant dense<0.000000e+00> : vector<8xf32>
    %505 = vector.multi_reduction <add>, %504, %cst_114 [1] : vector<8x64xf32> to vector<8xf32>
    %506 = vector.shape_cast %505 : vector<8xf32> to vector<8x1xf32>
    %507 = tpu.reciprocal %506 {approx = true} : vector<8x1xf32> -> vector<8x1xf32>
    %508 = vector.broadcast %507 : vector<8x1xf32> to vector<8x64xf32>
    %509 = arith.mulf %504, %508 : vector<8x64xf32>
    %cst_115 = arith.constant dense<0.000000e+00> : vector<8x32xf32>
    %510 = tpu.matmul %509, %252, %cst_115 {dimension_numbers = #tpu.dot_dimension_numbers<[1], [0], [0], [1], [0, 0, 1, 1], [], []>} : vector<8x64xf32>, vector<64x32xf32>, vector<8x32xf32> -> vector<8x32xf32>
    %511 = tpu.concatenate %510, %497 in 1 : vector<8x32xf32>, vector<8x32xf32> -> vector<8x64xf32>
    %cst_116 = arith.constant dense<0.000000e+00> : vector<8x32xf32>
    %512 = tpu.matmul %511, %275, %cst_116 {dimension_numbers = #tpu.dot_dimension_numbers<[1], [0], [0], [1], [0, 0, 1, 1], [], []>} : vector<8x64xf32>, vector<64x32xf32>, vector<8x32xf32> -> vector<8x32xf32>
    %513 = math.tanh %512 : vector<8x32xf32>
    %514 = vector.extract_strided_slice %272 {offsets = [56, 0], sizes = [8, 128], strides = [1, 1]} : vector<64x128xf32> to vector<8x128xf32>
    %cst_117 = arith.constant dense<0.000000e+00> : vector<8x128xf32>
    %515 = tpu.matmul %497, %273, %cst_117 {dimension_numbers = #tpu.dot_dimension_numbers<[1], [0], [0], [1], [0, 0, 1, 1], [], []>} : vector<8x32xf32>, vector<32x128xf32>, vector<8x128xf32> -> vector<8x128xf32>
    %516 = arith.addf %514, %515 : vector<8x128xf32>
    %517 = arith.negf %516 : vector<8x128xf32>
    %518 = math.exp %517 : vector<8x128xf32>
    %cst_118 = arith.constant 1.000000e+00 : f32
    %519 = vector.broadcast %cst_118 : f32 to vector<8x128xf32>
    %520 = arith.addf %519, %518 : vector<8x128xf32>
    %521 = arith.divf %519, %520 : vector<8x128xf32>
    %522 = math.tanh %516 : vector<8x128xf32>
    %523 = vector.extract_strided_slice %521 {offsets = [0, 0], sizes = [8, 32], strides = [1, 1]} : vector<8x128xf32> to vector<8x32xf32>
    %524 = vector.extract_strided_slice %521 {offsets = [0, 32], sizes = [8, 32], strides = [1, 1]} : vector<8x128xf32> to vector<8x32xf32>
    %525 = vector.extract_strided_slice %522 {offsets = [0, 64], sizes = [8, 32], strides = [1, 1]} : vector<8x128xf32> to vector<8x32xf32>
    %526 = vector.extract_strided_slice %521 {offsets = [0, 96], sizes = [8, 32], strides = [1, 1]} : vector<8x128xf32> to vector<8x32xf32>
    %527 = arith.mulf %524, %495 : vector<8x32xf32>
    %528 = arith.mulf %523, %525 : vector<8x32xf32>
    %529 = arith.addf %527, %528 : vector<8x32xf32>
    %530 = math.tanh %529 : vector<8x32xf32>
    %531 = arith.mulf %526, %530 : vector<8x32xf32>
    %cst_119 = arith.constant dense<0.000000e+00> : vector<8x64xf32>
    %532 = tpu.matmul %531, %254, %cst_119 {dimension_numbers = #tpu.dot_dimension_numbers<[1], [1], [0], [0], [0, 0, 1, 0], [], []>} : vector<8x32xf32>, vector<64x32xf32>, vector<8x64xf32> -> vector<8x64xf32>
    %533 = arith.addf %532, %274 : vector<8x64xf32>
    %cst_120 = arith.constant dense<0xFF800000> : vector<8xf32>
    %534 = vector.multi_reduction <maximumf>, %533, %cst_120 [1] : vector<8x64xf32> to vector<8xf32>
    %535 = vector.shape_cast %534 : vector<8xf32> to vector<8x1xf32>
    %536 = vector.broadcast %535 : vector<8x1xf32> to vector<8x64xf32>
    %537 = arith.subf %533, %536 : vector<8x64xf32>
    %538 = math.exp %537 : vector<8x64xf32>
    %cst_121 = arith.constant dense<0.000000e+00> : vector<8xf32>
    %539 = vector.multi_reduction <add>, %538, %cst_121 [1] : vector<8x64xf32> to vector<8xf32>
    %540 = vector.shape_cast %539 : vector<8xf32> to vector<8x1xf32>
    %541 = tpu.reciprocal %540 {approx = true} : vector<8x1xf32> -> vector<8x1xf32>
    %542 = vector.broadcast %541 : vector<8x1xf32> to vector<8x64xf32>
    %543 = arith.mulf %538, %542 : vector<8x64xf32>
    %cst_122 = arith.constant dense<0.000000e+00> : vector<8x32xf32>
    %544 = tpu.matmul %543, %252, %cst_122 {dimension_numbers = #tpu.dot_dimension_numbers<[1], [0], [0], [1], [0, 0, 1, 1], [], []>} : vector<8x64xf32>, vector<64x32xf32>, vector<8x32xf32> -> vector<8x32xf32>
    %545 = tpu.concatenate %544, %531 in 1 : vector<8x32xf32>, vector<8x32xf32> -> vector<8x64xf32>
    %cst_123 = arith.constant dense<0.000000e+00> : vector<8x32xf32>
    %546 = tpu.matmul %545, %275, %cst_123 {dimension_numbers = #tpu.dot_dimension_numbers<[1], [0], [0], [1], [0, 0, 1, 1], [], []>} : vector<8x64xf32>, vector<64x32xf32>, vector<8x32xf32> -> vector<8x32xf32>
    %547 = math.tanh %546 : vector<8x32xf32>
    %548 = tpu.concatenate %309, %343, %377, %411, %445, %479, %513, %547 in 0 : vector<8x32xf32>, vector<8x32xf32>, vector<8x32xf32>, vector<8x32xf32>, vector<8x32xf32>, vector<8x32xf32>, vector<8x32xf32>, vector<8x32xf32> -> vector<64x32xf32>
    %c0_124 = arith.constant 0 : index
    %c0_125 = arith.constant 0 : index
    %549 = vector.load %arg23[%c0_124, %c0_125] : memref<64x32xf32, #tpu.memory_space<vmem>>, vector<64x32xf32>
    tpu.vector_store %arg23[%c0_124, %c0_125], %548 {strides = array<i32>} : memref<64x32xf32, #tpu.memory_space<vmem>>, vector<64x32xf32>,
    %c0_126 = arith.constant 0 : index
    %c0_127 = arith.constant 0 : index
    %550 = vector.load %arg19[%c0_126, %c0_127] : memref<32x64xf32, #tpu.memory_space<vmem>>, vector<32x64xf32>
    %cst_128 = arith.constant dense<0.000000e+00> : vector<64x64xf32>
    %551 = tpu.matmul %548, %550, %cst_128 {dimension_numbers = #tpu.dot_dimension_numbers<[1], [0], [0], [1], [0, 0, 1, 1], [], []>} : vector<64x32xf32>, vector<32x64xf32>, vector<64x64xf32> -> vector<64x64xf32>
    %c0_129 = arith.constant 0 : index
    %c0_130 = arith.constant 0 : index
    %552 = vector.load %arg20[%c0_129, %c0_130] : memref<1x64xf32, #tpu.memory_space<vmem>>, vector<1x64xf32>
    %553 = vector.broadcast %552 : vector<1x64xf32> to vector<64x64xf32>
    %554 = arith.addf %551, %553 : vector<64x64xf32>
    %c0_131 = arith.constant 0 : index
    %c0_132 = arith.constant 0 : index
    %555 = vector.load %arg21[%c0_131, %c0_132] : memref<64x64xf32, #tpu.memory_space<vmem>>, vector<64x64xf32>
    tpu.vector_store %arg21[%c0_131, %c0_132], %554 {strides = array<i32>} : memref<64x64xf32, #tpu.memory_space<vmem>>, vector<64x64xf32>,
    %cst_133 = arith.constant dense<0xFF800000> : vector<64xf32>
    %556 = vector.multi_reduction <maximumf>, %554, %cst_133 [1] : vector<64x64xf32> to vector<64xf32>
    %557 = vector.shape_cast %556 : vector<64xf32> to vector<64x1xf32>
    %558 = vector.broadcast %557 : vector<64x1xf32> to vector<64x64xf32>
    %559 = arith.subf %554, %558 : vector<64x64xf32>
    %560 = math.exp %559 : vector<64x64xf32>
    %cst_134 = arith.constant dense<0.000000e+00> : vector<64xf32>
    %561 = vector.multi_reduction <add>, %560, %cst_134 [1] : vector<64x64xf32> to vector<64xf32>
    %562 = vector.shape_cast %561 : vector<64xf32> to vector<64x1xf32>
    %563 = vector.broadcast %562 : vector<64x1xf32> to vector<64x64xf32>
    %564 = arith.divf %560, %563 : vector<64x64xf32>
    %c0_135 = arith.constant 0 : index
    %c0_136 = arith.constant 0 : index
    %565 = vector.load %arg22[%c0_135, %c0_136] : memref<64x64xf32, #tpu.memory_space<vmem>>, vector<64x64xf32>
    tpu.vector_store %arg22[%c0_135, %c0_136], %564 {strides = array<i32>} : memref<64x64xf32, #tpu.memory_space<vmem>>, vector<64x64xf32>,
    return
  }
}

</mosaic_0001>

<bundles_post_ra>
// kernel: seq_model_forward.1
= control target key start
LH: loop header
LB: loop body
LE: loop exit
PB: predicated region body
PF: predicated region fallthrough
CT: control target
= control target key end

     0   :  { %vm90_vm0 = vcmask 261120   ;;  %v6213_v2 = vmov 0.0   ;;  %vm6214_vm1 = vmmov 0   ;;  %v6215_v17 = vmov 0   ;;  %s8004_s2 = inlined_call_operand.vmem [shape: f32[32,128], index: 2, kind: input, shape index: {}]   ;;  %s8005_s0 = inlined_call_operand.vmem [shape: f32[64,32], index: 0, kind: input, shape index: {}]   ;;  %s8006_s3 = inlined_call_operand.vmem [shape: f32[32,128], index: 3, kind: input, shape index: {}]   ;;  %s8007_s1 = inlined_call_operand.vmem [shape: s32[8,1], index: 1, kind: input, shape index: {}]   ;;  %s8008_s4 = inlined_call_operand.vmem [shape: f32[1,128], index: 4, kind: input, shape index: {}]   ;;  %s8009_s5 = inlined_call_operand.vmem [shape: f32[32,32], index: 5, kind: input, shape index: {}]   ;;  %s8010_s12 = inlined_call_operand.vmem [shape: f32[32,32], index: 12, kind: input, shape index: {}]   ;;  %s8011_s8 = inlined_call_operand.vmem [shape: f32[64,32], index: 8, kind: input, shape index: {}]   ;;  %s8012_s6 = inlined_call_operand.vmem [shape: f32[1,32], index: 6, kind: input, shape index: {}]   ;;  %s8013_s7 = inlined_call_operand.vmem [shape: f32[8,32], index: 7, kind: input, shape index: {}]   ;;  %s8014_s10 = inlined_call_operand.vmem [shape: f32[64,32], index: 10, kind: input, shape index: {}]   ;;  %s8015_s14 = inlined_call_operand.vmem [shape: f32[32,128], index: 14, kind: input, shape index: {}]   ;;  %s8016_s13 = inlined_call_operand.vmem [shape: f32[64,32], index: 13, kind: input, shape index: {}]   ;;  %s8017_s15 = inlined_call_operand.vmem [shape: f32[32,128], index: 15, kind: input, shape index: {}]   ;;  %s8018_s9 = inlined_call_operand.vmem [shape: f32[1,32], index: 9, kind: input, shape index: {}, may-alias: {9,11}]   ;;  %s8019_s11 = inlined_call_operand.vmem [shape: f32[1,32], index: 11, kind: input, shape index: {}, may-alias: {9,11}]   ;;  %s8020_s16 = inlined_call_operand.vmem [shape: f32[1,128], index: 16, kind: input, shape index: {}]   ;;  %s8021_s17 = inlined_call_operand.vmem [shape: f32[8,64], index: 17, kind: input, shape index: {}]   ;;  %s8022_s18 = inlined_call_operand.vmem [shape: f32[64,32], index: 18, kind: input, shape index: {}]   ;;  %s8023_s23 = inlined_call_operand.vmem [shape: f32[64,32], index: 23, kind: output, shape index: {2}]   ;;  %s8024_s19 = inlined_call_operand.vmem [shape: f32[32,64], index: 19, kind: input, shape index: {}]   ;;  %s8025_s20 = inlined_call_operand.vmem [shape: f32[1,64], index: 20, kind: input, shape index: {}]   ;;  %s8026_s21 = inlined_call_operand.vmem [shape: f32[64,64], index: 21, kind: output, shape index: {0}]   ;;  %s8027_s22 = inlined_call_operand.vmem [shape: f32[64,64], index: 22, kind: output, shape index: {1}]  }
   0x1   :  { %8034 = sst [smem:[#allocation2_spill]] %s8004_s2  ;;  %5245 = vmatprep.subr.mxu1 %v6213_v2  ;;  %5253 = vmatprep.mubr.msk.f32.mxu1 %vm6214_vm1, %v6213_v2  ;;  %s6217_s2 = smov 32  }
   0x2   :  { %8035 = sst [smem:[#allocation3_spill]] %s8005_s0  ;;  %5989 = vset.pattern.permute.xlu1 %v6215_v17  ;;  %5990 = vset.pattern.permute.xlu0 %v6215_v17 }
   0x3   :  { %8036 = sst [smem:[#allocation4_spill]] %s8006_s3 }
   0x4   :  { %8037 = sst [smem:[#allocation5_spill]] %s8007_s1  ;;  %s6216_s1 = smov 64  }
   0x5   :  { %8038 = sst [smem:[#allocation6_spill]] %s8008_s4 }
   0x6   :  { %8039 = sst [smem:[#allocation7_spill]] %s8009_s5 }
   0x7   :  { %8040 = sst [smem:[#allocation8_spill]] %s8010_s12 }
   0x8   :  { %8041 = sst [smem:[#allocation9_spill]] %s8011_s8 }
   0x9   :  { %s8042_s24 = sld [smem:[#allocation2_spill]] }
   0xa   :  { %s8043_s3 = sld [smem:[#allocation3_spill]] }
   0xb   :  { %s8044_s29 = sld [smem:[#allocation4_spill]] }
   0xc   :  { %s8045_s12 = sld [smem:[#allocation5_spill]] }
   0xd   :  { %s8046_s28 = sld [smem:[#allocation6_spill]] }
   0xe   :  { %s8047_s30 = sld [smem:[#allocation7_spill]] }
   0xf   :  { %v82_v0 = vld [vmem:[%s8042_s24 + $0x18] sm:$0xff]  ;;  %v81_v1 = vld [vmem:[%s8042_s24 + $0x10] sm:$0xff]  ;;  %v80_v4 = vld [vmem:[%s8042_s24 + $0x8] sm:$0xff]  ;;  %s8048_s8 = sld [smem:[#allocation8_spill]] }
  0x10   :  { %5214 = vmatprep.subr.mxu0 %v82_v0  ;;  %v71_v3 = vld [vmem:[%s8043_s3] sm:$0xff]  ;;  %v72_v8 = vld [vmem:[%s8043_s3 + $0x8] sm:$0xff]  ;;  %v73_v10 = vld [vmem:[%s8043_s3 + $0x10] sm:$0xff] }
  0x11   :  { %5215 = vmatpush3.msra.mxu0 %v82_v0  ;;  %5222 = vmatprep.mubr.msk.f32.mxu0 %vm90_vm0, %v71_v3  ;;  %v6357_v5 = vld [vmem:[%s8044_s29 + $0x18] sm:$0xff]  ;;  %v79_v6 = vld [vmem:[%s8042_s24] sm:$0xff]  ;;  %v6366_v7 = vld [vmem:[%s8044_s29 + $0x10] sm:$0xff] }
  0x12   :  { %5216 = vmatprep.subr.mxu0 %v81_v1  ;;  %5246 = vmatpush3.msra.mxu1 %v6357_v5  ;;  %v6376_v9 = vld [vmem:[%s8044_s29 + $0x8] sm:$0xff]  ;;  %v74_v11 = vld [vmem:[%s8043_s3 + $0x18] sm:$0xff]  ;;  %v6394_v12 = vld [vmem:[%s8044_s29] sm:$0xff] }
  0x13   :  { %5217 = vmatpush3.msra.mxu0 %v81_v1  ;;  %5247 = vmatprep.subr.mxu1 %v6213_v2  ;;  %v75_v13 = vld [vmem:[%s8043_s3 + $0x20] sm:$0xff]  ;;  %v76_v14 = vld [vmem:[%s8043_s3 + $0x28] sm:$0xff]  ;;  %v77_v15 = vld [vmem:[%s8043_s3 + $0x30] sm:$0xff] }
  0x14   :  { %5218 = vmatprep.subr.mxu0 %v80_v4  ;;  %5248 = vmatpush3.msra.mxu1 %v6366_v7  ;;  %v78_v16 = vld [vmem:[%s8043_s3 + $0x38] sm:$0xff]  ;;  %v6439_v18 = vld [vmem:[%s8045_s12] sm:$0xff]  ;;  %s8049_s3 = sld [smem:[#allocation9_spill]] }
  0x15   :  { %5219 = vmatpush3.msra.mxu0 %v80_v4  ;;  %5249 = vmatprep.subr.mxu1 %v6213_v2  ;;  %vm323_vm2 = vcmp.gt.s32.totalorder %v6439_v18, 0  ;;  %v4673_v20 = vld [vmem:[%s8046_s28] ss:$0 sm:$0xff]  ;;  %vm431_vm4 = vcmp.gt.s32.totalorder %v6439_v18, 1  ;;  %vm540_vm6 = vcmp.gt.s32.totalorder %v6439_v18, 2  ;;  %vm649_vm8 = vcmp.gt.s32.totalorder %v6439_v18, 3 }
  0x16   :  { %5220 = vmatprep.subr.mxu0 %v79_v6  ;;  %5250 = vmatpush3.msra.mxu1 %v6376_v9  ;;  %v324_v19 = vsel %vm323_vm2, 1, %v6215_v17  ;;  %v432_v60 = vsel %vm431_vm4, 1, %v6215_v17  ;;  %vm758_vm10 = vcmp.gt.s32.totalorder %v6439_v18, 4  ;;  %vm867_vm12 = vcmp.gt.s32.totalorder %v6439_v18, 5 }
  0x17   :  { %5221 = vmatpush3.msra.mxu0 %v79_v6  ;;  %5251 = vmatprep.subr.mxu1 %v6213_v2  ;;  %vm976_vm14 = vcmp.gt.s32.totalorder %v6439_v18, 6  ;;  %vm1085_vm2 = vcmp.gt.s32.totalorder %v6439_v18, 7  ;;  %vm1402_vm4 = vcmask 523264  }
  0x18   :  { %5223 = vmatmul.mubr.msk.f32.vlgmr.msra.gmra.mxu0 %vm90_vm0, %v72_v8  ;;  %5234 = vmatprep.subr.mxu0 %v6213_v2 }
  0x19   :  { %5235 = vmatpush3.msra.mxu0 %v6357_v5  ;;  %5225 = vmatprep.mubr.msk.f32.mxu0 %vm90_vm0, %v73_v10 }
  0x1a   :  { %5236 = vmatprep.subr.mxu0 %v6213_v2  ;;  %5252 = vmatpush3.msra.mxu1 %v6394_v12 }
  0x1b   :  { %5237 = vmatpush3.msra.mxu0 %v6366_v7  ;;  %5267 = vmatprep.subr.mxu1 %v6213_v2 }
  0x1c   :  { %5226 = vmatmul.mubr.msk.f32.gmra.mxu0 %vm90_vm0, %v74_v11  ;;  %5238 = vmatprep.subr.mxu0 %v6213_v2 }
  0x1d   :  { %5228 = vmatprep.mubr.msk.f32.mxu0 %vm90_vm0, %v75_v13  ;;  %5239 = vmatpush3.msra.mxu0 %v6376_v9 }
  0x1e   :  { %5240 = vmatprep.subr.mxu0 %v6213_v2  ;;  %326 = vperm.xlu1 %5989, %v324_v19  }
  0x1f   :  { %5241 = vmatpush3.msra.mxu0 %v6394_v12 }
  0x20   :  { %5229 = vmatmul.mubr.msk.f32.gmra.mxu0 %vm90_vm0, %v76_v14  ;;  %5256 = vmatprep.subr.mxu0 %v6213_v2 }
  0x21   :  { %5231 = vmatprep.mubr.msk.f32.mxu0 %vm90_vm0, %v77_v15 }
  0x24   :  { %5232 = vmatmul.mubr.msk.f32.gmra.mxu0 %vm90_vm0, %v78_v16 }
  0x25   :  { %5242 = vmatprep.mubr.msk.f32.mxu0 %vm6214_vm1, %v6213_v2 }
  0x28   :  { %5243 = vmatmul.mubr.f32.vlgmr.msra.gmra.mxu0 %v6213_v2 }
  0x29   :  { %5257 = vmatpush3.msra.mxu0 %v6357_v5  ;;  %5264 = vmatprep.mubr.msk.f32.mxu0 %vm6214_vm1, %v6213_v2 }
  0x2a   :  { %5258 = vmatprep.subr.mxu0 %v6213_v2 }
  0x2b   :  { %5259 = vmatpush3.msra.mxu0 %v6366_v7 }
  0x2c   :  { %5260 = vmatprep.subr.mxu0 %v6213_v2 }
  0x2d   :  { %5261 = vmatpush3.msra.mxu0 %v6376_v9 }
  0x2e   :  { %5262 = vmatprep.subr.mxu0 %v6213_v2 }
  0x2f   :  { %5263 = vmatpush3.msra.mxu0 %v6394_v12 }
  0x30   :  { %5278 = vmatprep.subr.mxu0 %v6213_v2 }
  0x99   :  { %v327_v51 = vpop.permute.xlu1 %326 }
  0x9a   :  { %vm328_vm3 = vcmp.eq.s32.totalorder %v327_v51, 1 }
  0xd8   :  { %v5224_v21 = vpop.f32.mrf.mxu0 }
  0xd9   :  { %v187_v22 = vadd.f32 %v5224_v21, %v4673_v20 }
  0xda   :  { %v181_v23 = vpop.f32.mrf.mxu0 }
  0xdb   :  { %v182_v35 = vadd.f32 %v4673_v20, %v181_v23 }
  0xdc   :  { %v5227_v24 = vpop.f32.mrf.mxu0 }
  0xdd   :  { %v6447_v25 = vadd.f32 %v5227_v24, %v4673_v20  ;;  %v541_v24 = vsel %vm540_vm6, 1, %v6215_v17 }
  0xde   :  { %v191_v26 = vpop.f32.mrf.mxu0 }
  0xdf   :  { %v6449_v27 = vadd.f32 %v4673_v20, %v191_v26 }
  0xe0   :  { %v5230_v28 = vpop.f32.mrf.mxu0 }
  0xe1   :  { %v6451_v29 = vadd.f32 %v5230_v28, %v4673_v20 }
  0xe2   :  { %v201_v30 = vpop.f32.mrf.mxu0 }
  0xe3   :  { %v6453_v31 = vadd.f32 %v4673_v20, %v201_v30 }
  0xe4   :  { %v5233_v32 = vpop.f32.mrf.mxu0 }
  0xe5   :  { %v6455_v33 = vadd.f32 %v5233_v32, %v4673_v20 }
  0xe6   :  { %v211_v34 = vpop.f32.mrf.mxu0 }
  0xe7   :  { %v6457_v36 = vadd.f32 %v4673_v20, %v211_v34 }
  0xe8   :  { %v294_v37 = vpop.f32.mrf.mxu0 }
  0xe9   :  { %v298_v38 = vadd.f32 %v294_v37, %v182_v35 }
  0xea   :  { %v5244_v39 = vpop.f32.mrf.mxu0 }
  0xeb   :  { %5991 = vtanh.f32 %v298_v38  ;;  %v4682_v41 = vmul.f32 -1.442695, %v298_v38 }
  0xed   :  { %5993 = vpow2.f32 %v4682_v41 }
  0xf8   :  { %v5992_v40 = vpop.eup %5991 }
  0xf9   :  { %308 = vrot.lane.b32.xlu0 %v5992_v40, %s6216_s1 }
  0xfa   :  { %v5994_v42 = vpop.eup %5993 }
  0xfb   :  { %v302_v43 = vadd.f32 1.0, %v5994_v42 }
  0xfd   :  { %5995 = vrcp.f32 %v302_v43 }
 0x10a   :  { %v5996_v44 = vpop.eup %5995 }
 0x10b   :  { %v306_v47 = vmul.f32 0.0, %v5996_v44 }
 0x16b   :  { %v309_v45 = vpop.permute.xlu0 %308 }
 0x16c   :  { %v311_v46 = vmul.f32 %v5996_v44, %v309_v45 }
 0x16e   :  { %313 = vrot.lane.b32.xlu0 %v311_v46, %s6217_s2 }
 0x1e0   :  { %v314_v48 = vpop.permute.xlu0 %313 }
 0x1e1   :  { %v316_v49 = vadd.f32 %v314_v48, %v306_v47 }
 0x1e3   :  { %5997 = vtanh.f32 %v316_v49  ;;  %v330_v4 = vsel %vm328_vm3, %v316_v49, 0.0 }
 0x1f0   :  { %v5998_v50 = vpop.eup %5997 }
 0x1f1   :  { %319 = vrot.lane.b32.xlu1 %v5998_v50, %s6216_s1  ;;  %v650_v50 = vsel %vm649_vm8, 1, %v6215_v17 }
 0x263   :  { %v320_v52 = vpop.permute.xlu1 %319 }
 0x264   :  { %v322_v53 = vmul.f32 %v5996_v44, %v320_v52 }
 0x266   :  { %v329_v54 = vsel %vm328_vm3, %v322_v53, 0.0 }
 0x267   :  { %332 = vrot.lane.b32.xlu0 %v329_v54, %s6217_s2 }
 0x2d9   :  { %v6464_v55 = vpop.permute.xlu0 %332 }
 0x2da   :  { %5254 = vmatmul.mubr.msk.f32.vlgmr.msra.gmra.mxu1 %vm90_vm0, %v6464_v55 }
 0x2db   :  { %5268 = vmatpush3.msra.mxu1 %v6357_v5  ;;  %5275 = vmatprep.mubr.msk.f32.mxu1 %vm6214_vm1, %v6213_v2 }
 0x2dc   :  { %5269 = vmatprep.subr.mxu1 %v6213_v2 }
 0x2dd   :  { %5270 = vmatpush3.msra.mxu1 %v6366_v7 }
 0x2de   :  { %5271 = vmatprep.subr.mxu1 %v6213_v2 }
 0x2df   :  { %5272 = vmatpush3.msra.mxu1 %v6376_v9 }
 0x2e0   :  { %5273 = vmatprep.subr.mxu1 %v6213_v2 }
 0x2e1   :  { %5274 = vmatpush3.msra.mxu1 %v6394_v12 }
 0x2e2   :  { %5289 = vmatprep.subr.mxu1 %v6213_v2 }
 0x39a   :  { %v402_v56 = vpop.f32.mrf.mxu1 }
 0x39b   :  { %v406_v57 = vadd.f32 %v402_v56, %v187_v22 }
 0x39c   :  { %v5255_v58 = vpop.f32.mrf.mxu1 }
 0x39d   :  { %5999 = vtanh.f32 %v406_v57  ;;  %v4684_v61 = vmul.f32 -1.442695, %v406_v57 }
 0x39f   :  { %6001 = vpow2.f32 %v4684_v61 }
 0x3aa   :  { %v6000_v59 = vpop.eup %5999 }
 0x3ab   :  { %416 = vrot.lane.b32.xlu1 %v6000_v59, %s6216_s1 }
 0x3ac   :  { %v6002_v62 = vpop.eup %6001 }
 0x3ad   :  { %v410_v63 = vadd.f32 1.0, %v6002_v62 }
 0x3af   :  { %434 = vperm.xlu1 %5989, %v432_v60   ;;  %6003 = vrcp.f32 %v410_v63 }
 0x3bc   :  { %v6004_v0 = vpop.eup %6003 }
 0x3bd   :  { %v414_v6 = vmul.f32 %v6004_v0, %v330_v4 }
 0x41d   :  { %v417_v1 = vpop.permute.xlu1 %416 }
 0x41e   :  { %v419_v3 = vmul.f32 %v6004_v0, %v417_v1 }
 0x420   :  { %421 = vrot.lane.b32.xlu0 %v419_v3, %s6217_s2 }
 0x42a   :  { %v6484_v13 = vpop.permute.xlu1 %434 }
 0x42b   :  { %vm436_vm5 = vcmp.eq.s32.totalorder %v6484_v13, 1 }
 0x492   :  { %v422_v8 = vpop.permute.xlu0 %421 }
 0x493   :  { %v424_v10 = vadd.f32 %v422_v8, %v414_v6 }
 0x495   :  { %6005 = vtanh.f32 %v424_v10 }
 0x4a2   :  { %v6006_v11 = vpop.eup %6005 }
 0x4a3   :  { %427 = vrot.lane.b32.xlu0 %v6006_v11, %s6216_s1  ;;  %v759_v11 = vsel %vm758_vm10, 1, %v6215_v17 }
 0x515   :  { %v428_v14 = vpop.permute.xlu0 %427 }
 0x516   :  { %v6486_v15 = vmul.f32 %v6004_v0, %v428_v14 }
 0x518   :  { %v437_v16 = vsel %vm436_vm5, %v6486_v15, %v329_v54  ;;  %v439_v18 = vsel %vm436_vm5, %v6486_v15, 0.0 }
 0x519   :  { %441 = vrot.lane.b32.xlu1 %v437_v16, %s6217_s2 }
 0x58b   :  { %v442_v19 = vpop.permute.xlu1 %441 }
 0x58c   :  { %5265 = vmatmul.mubr.msk.f32.vlgmr.msra.gmra.mxu0 %vm90_vm0, %v442_v19 }
 0x58d   :  { %5279 = vmatpush3.msra.mxu0 %v6357_v5  ;;  %5286 = vmatprep.mubr.msk.f32.mxu0 %vm6214_vm1, %v6213_v2 }
 0x58e   :  { %5280 = vmatprep.subr.mxu0 %v6213_v2 }
 0x58f   :  { %5281 = vmatpush3.msra.mxu0 %v6366_v7 }
 0x590   :  { %5282 = vmatprep.subr.mxu0 %v6213_v2 }
 0x591   :  { %5283 = vmatpush3.msra.mxu0 %v6376_v9 }
 0x592   :  { %5284 = vmatprep.subr.mxu0 %v6213_v2 }
 0x593   :  { %5285 = vmatpush3.msra.mxu0 %v6394_v12 }
 0x594   :  { %5300 = vmatprep.subr.mxu0 %v6213_v2 }
 0x64c   :  { %v511_v20 = vpop.f32.mrf.mxu0 }
 0x64d   :  { %v515_v21 = vadd.f32 %v511_v20, %v6449_v27  ;;  %v438_v27 = vsel %vm436_vm5, %v424_v10, %v330_v4 }
 0x64e   :  { %v5266_v22 = vpop.f32.mrf.mxu0 }
 0x64f   :  { %6007 = vtanh.f32 %v515_v21  ;;  %v4686_v26 = vmul.f32 -1.442695, %v515_v21 }
 0x651   :  { %6009 = vpow2.f32 %v4686_v26 }
 0x65c   :  { %v6008_v23 = vpop.eup %6007 }
 0x65d   :  { %525 = vrot.lane.b32.xlu0 %v6008_v23, %s6216_s1 }
 0x65e   :  { %v6010_v28 = vpop.eup %6009 }
 0x65f   :  { %v519_v30 = vadd.f32 1.0, %v6010_v28 }
 0x661   :  { %543 = vperm.xlu0 %5990, %v541_v24   ;;  %6011 = vrcp.f32 %v519_v30 }
 0x66e   :  { %v6012_v32 = vpop.eup %6011 }
 0x66f   :  { %v523_v37 = vmul.f32 %v6012_v32, %v438_v27 }
 0x6cf   :  { %v526_v34 = vpop.permute.xlu0 %525 }
 0x6d0   :  { %v528_v35 = vmul.f32 %v6012_v32, %v526_v34 }
 0x6d2   :  { %530 = vrot.lane.b32.xlu1 %v528_v35, %s6217_s2 }
 0x6dc   :  { %v6512_v41 = vpop.permute.xlu0 %543 }
 0x6dd   :  { %vm545_vm7 = vcmp.eq.s32.totalorder %v6512_v41, 1 }
 0x744   :  { %v531_v38 = vpop.permute.xlu1 %530 }
 0x745   :  { %v533_v39 = vadd.f32 %v531_v38, %v523_v37 }
 0x747   :  { %6013 = vtanh.f32 %v533_v39 }
 0x754   :  { %v6014_v40 = vpop.eup %6013 }
 0x755   :  { %536 = vrot.lane.b32.xlu1 %v6014_v40, %s6216_s1 }
 0x7c7   :  { %v537_v42 = vpop.permute.xlu1 %536 }
 0x7c8   :  { %v6514_v43 = vmul.f32 %v6012_v32, %v537_v42 }
 0x7ca   :  { %v546_v44 = vsel %vm545_vm7, %v6514_v43, %v437_v16 }
 0x7cb   :  { %550 = vrot.lane.b32.xlu1 %v546_v44, %s6217_s2 }
 0x83d   :  { %v551_v45 = vpop.permute.xlu1 %550 }
 0x83e   :  { %5276 = vmatmul.mubr.msk.f32.vlgmr.msra.gmra.mxu1 %vm90_vm0, %v551_v45 }
 0x83f   :  { %5290 = vmatpush3.msra.mxu1 %v6357_v5  ;;  %5297 = vmatprep.mubr.msk.f32.mxu1 %vm6214_vm1, %v6213_v2 }
 0x840   :  { %5291 = vmatprep.subr.mxu1 %v6213_v2 }
 0x841   :  { %5292 = vmatpush3.msra.mxu1 %v6366_v7 }
 0x842   :  { %5293 = vmatprep.subr.mxu1 %v6213_v2 }
 0x843   :  { %5294 = vmatpush3.msra.mxu1 %v6376_v9 }
 0x844   :  { %5295 = vmatprep.subr.mxu1 %v6213_v2 }
 0x845   :  { %5296 = vmatpush3.msra.mxu1 %v6394_v12 }
 0x846   :  { %5311 = vmatprep.subr.mxu1 %v6213_v2 }
 0x8fe   :  { %v620_v46 = vpop.f32.mrf.mxu1 }
 0x8ff   :  { %v624_v47 = vadd.f32 %v620_v46, %v6447_v25  ;;  %v547_v25 = vsel %vm545_vm7, %v533_v39, %v438_v27 }
 0x900   :  { %v5277_v48 = vpop.f32.mrf.mxu1 }
 0x901   :  { %6015 = vtanh.f32 %v624_v47  ;;  %v4688_v51 = vmul.f32 -1.442695, %v624_v47 }
 0x903   :  { %6017 = vpow2.f32 %v4688_v51 }
 0x90e   :  { %v6016_v49 = vpop.eup %6015 }
 0x90f   :  { %634 = vrot.lane.b32.xlu0 %v6016_v49, %s6216_s1 }
 0x910   :  { %v6018_v52 = vpop.eup %6017 }
 0x911   :  { %v628_v53 = vadd.f32 1.0, %v6018_v52 }
 0x913   :  { %652 = vperm.xlu0 %5990, %v650_v50   ;;  %6019 = vrcp.f32 %v628_v53 }
 0x920   :  { %v6020_v54 = vpop.eup %6019 }
 0x921   :  { %v632_v58 = vmul.f32 %v6020_v54, %v547_v25 }
 0x981   :  { %v635_v56 = vpop.permute.xlu0 %634 }
 0x982   :  { %v637_v57 = vmul.f32 %v6020_v54, %v635_v56 }
 0x984   :  { %639 = vrot.lane.b32.xlu1 %v637_v57, %s6217_s2 }
 0x98e   :  { %v6540_v62 = vpop.permute.xlu0 %652 }
 0x98f   :  { %vm654_vm9 = vcmp.eq.s32.totalorder %v6540_v62, 1 }
 0x9f6   :  { %v640_v59 = vpop.permute.xlu1 %639 }
 0x9f7   :  { %v642_v60 = vadd.f32 %v640_v59, %v632_v58  ;;  %v977_v59 = vsel %vm976_vm14, 1, %v6215_v17 }
 0x9f9   :  { %6021 = vtanh.f32 %v642_v60 }
 0xa06   :  { %v6022_v61 = vpop.eup %6021 }
 0xa07   :  { %645 = vrot.lane.b32.xlu1 %v6022_v61, %s6216_s1 }
 0xa79   :  { %v646_v63 = vpop.permute.xlu1 %645 }
 0xa7a   :  { %v6542_v0 = vmul.f32 %v6020_v54, %v646_v63 }
 0xa7c   :  { %v655_v1 = vsel %vm654_vm9, %v6542_v0, %v546_v44 }
 0xa7d   :  { %659 = vrot.lane.b32.xlu0 %v655_v1, %s6217_s2 }
 0xaef   :  { %v660_v3 = vpop.permute.xlu0 %659 }
 0xaf0   :  { %5287 = vmatmul.mubr.msk.f32.vlgmr.msra.gmra.mxu0 %vm90_vm0, %v660_v3 }
 0xaf1   :  { %5301 = vmatpush3.msra.mxu0 %v6357_v5  ;;  %5308 = vmatprep.mubr.msk.f32.mxu0 %vm6214_vm1, %v6213_v2 }
 0xaf2   :  { %5302 = vmatprep.subr.mxu0 %v6213_v2 }
 0xaf3   :  { %5303 = vmatpush3.msra.mxu0 %v6366_v7 }
 0xaf4   :  { %5304 = vmatprep.subr.mxu0 %v6213_v2 }
 0xaf5   :  { %5305 = vmatpush3.msra.mxu0 %v6376_v9 }
 0xaf6   :  { %5306 = vmatprep.subr.mxu0 %v6213_v2 }
 0xaf7   :  { %5307 = vmatpush3.msra.mxu0 %v6394_v12 }
 0xbb0   :  { %v729_v4 = vpop.f32.mrf.mxu0 }
 0xbb1   :  { %v733_v6 = vadd.f32 %v729_v4, %v6453_v31  ;;  %v656_v31 = vsel %vm654_vm9, %v642_v60, %v547_v25 }
 0xbb2   :  { %v5288_v8 = vpop.f32.mrf.mxu0 }
 0xbb3   :  { %6023 = vtanh.f32 %v733_v6  ;;  %v4690_v14 = vmul.f32 -1.442695, %v733_v6 }
 0xbb5   :  { %6025 = vpow2.f32 %v4690_v14 }
 0xbc0   :  { %v6024_v10 = vpop.eup %6023 }
 0xbc1   :  { %743 = vrot.lane.b32.xlu1 %v6024_v10, %s6216_s1 }
 0xbc2   :  { %v6026_v16 = vpop.eup %6025 }
 0xbc3   :  { %v737_v19 = vadd.f32 1.0, %v6026_v16 }
 0xbc5   :  { %761 = vperm.xlu1 %5989, %v759_v11   ;;  %6027 = vrcp.f32 %v737_v19 }
 0xbd2   :  { %v6028_v20 = vpop.eup %6027 }
 0xbd3   :  { %v741_v23 = vmul.f32 %v6028_v20, %v656_v31 }
 0xc33   :  { %v744_v21 = vpop.permute.xlu1 %743 }
 0xc34   :  { %v746_v22 = vmul.f32 %v6028_v20, %v744_v21 }
 0xc36   :  { %748 = vrot.lane.b32.xlu0 %v746_v22, %s6217_s2 }
 0xc40   :  { %v6567_v30 = vpop.permute.xlu1 %761 }
 0xc41   :  { %vm763_vm11 = vcmp.eq.s32.totalorder %v6567_v30, 1  ;;  %v6723_v30 = vld [vmem:[%s8012_s6] ss:$0 sm:$0xff] }
 0xca8   :  { %v749_v24 = vpop.permute.xlu0 %748 }
 0xca9   :  { %v751_v26 = vadd.f32 %v749_v24, %v741_v23  ;;  %v1096_v23 = vld [vmem:[%s8047_s30 + $0x18] sm:$0xff]  ;;  %v1095_v24 = vld [vmem:[%s8047_s30 + $0x10] sm:$0xff] }
 0xcaa   :  { %5322 = vmatprep.subr.mxu0 %v1096_v23 }
 0xcab   :  { %6029 = vtanh.f32 %v751_v26 }
 0xcb8   :  { %v6030_v28 = vpop.eup %6029 }
 0xcb9   :  { %754 = vrot.lane.b32.xlu0 %v6030_v28, %s6216_s1  ;;  %v1093_v28 = vld [vmem:[%s8047_s30] sm:$0xff] }
 0xd2b   :  { %v755_v32 = vpop.permute.xlu0 %754 }
 0xd2c   :  { %v6569_v34 = vmul.f32 %v6028_v20, %v755_v32  ;;  %v1086_v32 = vsel %vm1085_vm2, 1, %v6215_v17 }
 0xd2e   :  { %v764_v35 = vsel %vm763_vm11, %v6569_v34, %v655_v1  ;;  %v766_v41 = vsel %vm763_vm11, %v6569_v34, 0.0 }
 0xd2f   :  { %768 = vrot.lane.b32.xlu1 %v764_v35, %s6217_s2 }
 0xda1   :  { %v769_v27 = vpop.permute.xlu1 %768 }
 0xda2   :  { %5298 = vmatmul.mubr.msk.f32.vlgmr.msra.gmra.mxu1 %vm90_vm0, %v769_v27 }
 0xda3   :  { %5312 = vmatpush3.msra.mxu1 %v6357_v5  ;;  %5319 = vmatprep.mubr.msk.f32.mxu1 %vm6214_vm1, %v6213_v2 }
 0xda4   :  { %5313 = vmatprep.subr.mxu1 %v6213_v2 }
 0xda5   :  { %5314 = vmatpush3.msra.mxu1 %v6366_v7  ;;  %v868_v7 = vsel %vm867_vm12, 1, %v6215_v17 }
 0xda6   :  { %5315 = vmatprep.subr.mxu1 %v6213_v2 }
 0xda7   :  { %5316 = vmatpush3.msra.mxu1 %v6376_v9 }
 0xda8   :  { %5317 = vmatprep.subr.mxu1 %v6213_v2 }
 0xda9   :  { %5318 = vmatpush3.msra.mxu1 %v6394_v12 }
 0xe62   :  { %v838_v37 = vpop.f32.mrf.mxu1 }
 0xe63   :  { %v842_v38 = vadd.f32 %v838_v37, %v6451_v29  ;;  %v765_v29 = vsel %vm763_vm11, %v751_v26, %v656_v31 }
 0xe64   :  { %v5299_v39 = vpop.f32.mrf.mxu1 }
 0xe65   :  { %6031 = vtanh.f32 %v842_v38  ;;  %v4692_v40 = vmul.f32 -1.442695, %v842_v38 }
 0xe67   :  { %6033 = vpow2.f32 %v4692_v40  ;;  %v1245_v40 = vld [vmem:[%s8048_s8 + $0x8] sm:$0xff] }
 0xe72   :  { %v6032_v5 = vpop.eup %6031 }
 0xe73   :  { %852 = vrot.lane.b32.xlu0 %v6032_v5, %s6216_s1  ;;  %v1247_v5 = vld [vmem:[%s8048_s8 + $0x18] sm:$0xff] }
 0xe74   :  { %v6034_v9 = vpop.eup %6033  ;;  %5342 = vmatprep.subr.mxu1 %v1247_v5 }
 0xe75   :  { %v846_v42 = vadd.f32 1.0, %v6034_v9  ;;  %v1244_v9 = vld [vmem:[%s8048_s8] sm:$0xff] }
 0xe77   :  { %870 = vperm.xlu0 %5990, %v868_v7   ;;  %6035 = vrcp.f32 %v846_v42  ;;  %v1246_v7 = vld [vmem:[%s8048_s8 + $0x10] sm:$0xff] }
 0xe84   :  { %v6036_v44 = vpop.eup %6035 }
 0xe85   :  { %v850_v46 = vmul.f32 %v6036_v44, %v765_v29 }
 0xee5   :  { %v853_v12 = vpop.permute.xlu0 %852 }
 0xee6   :  { %v855_v45 = vmul.f32 %v6036_v44, %v853_v12 }
 0xee8   :  { %857 = vrot.lane.b32.xlu1 %v855_v45, %s6217_s2 }
 0xef2   :  { %v6594_v50 = vpop.permute.xlu0 %870 }
 0xef3   :  { %vm872_vm13 = vcmp.eq.s32.totalorder %v6594_v50, 1  ;;  %v1391_v50 = vld [vmem:[%s8049_s3 + $0x20] sm:$0xff] }
 0xf5a   :  { %v858_v47 = vpop.permute.xlu1 %857 }
 0xf5b   :  { %v860_v48 = vadd.f32 %v858_v47, %v850_v46  ;;  %v1394_v46 = vld [vmem:[%s8049_s3 + $0x38] sm:$0xff]  ;;  %v1393_v47 = vld [vmem:[%s8049_s3 + $0x30] sm:$0xff] }
 0xf5d   :  { %6037 = vtanh.f32 %v860_v48 }
 0xf6a   :  { %v6038_v49 = vpop.eup %6037 }
 0xf6b   :  { %863 = vrot.lane.b32.xlu1 %v6038_v49, %s6216_s1  ;;  %v548_v49 = vsel %vm545_vm7, %v6514_v43, 0.0 }
 0xfdd   :  { %v864_v51 = vpop.permute.xlu1 %863 }
 0xfde   :  { %v6596_v52 = vmul.f32 %v6036_v44, %v864_v51  ;;  %v1390_v51 = vld [vmem:[%s8049_s3 + $0x18] sm:$0xff] }
 0xfe0   :  { %v873_v53 = vsel %vm872_vm13, %v6596_v52, %v764_v35  ;;  %v657_v35 = vsel %vm654_vm9, %v6542_v0, 0.0  ;;  %v875_v17 = vsel %vm872_vm13, %v6596_v52, 0.0 }
 0xfe1   :  { %877 = vrot.lane.b32.xlu0 %v873_v53, %s6217_s2 }
0x1053   :  { %v878_v54 = vpop.permute.xlu0 %877 }
0x1054   :  { %5309 = vmatmul.mubr.msk.f32.vlgmr.msra.gmra.mxu0 %vm90_vm0, %v878_v54 }
0x1055   :  { %5330 = vmatprep.mubr.msk.f32.mxu0 %vm90_vm0, %v6464_v55  ;;  %5323 = vmatpush3.msra.mxu0 %v1096_v23  ;;  %v1571_v23 = vld [vmem:[%s8015_s14 + $0x10] sm:$0xff] }
0x1056   :  { %5324 = vmatprep.subr.mxu0 %v1095_v24 }
0x1057   :  { %5325 = vmatpush3.msra.mxu0 %v1095_v24  ;;  %v1477_v24 = vld [vmem:[%s8014_s10 + $0x8] sm:$0xff] }
0x1114   :  { %v947_v56 = vpop.f32.mrf.mxu0 }
0x1115   :  { %v951_v57 = vadd.f32 %v947_v56, %v6457_v36  ;;  %v6613_v36 = vsel %vm872_vm13, %v860_v48, %v765_v29  ;;  %v1392_v48 = vld [vmem:[%s8049_s3 + $0x28] sm:$0xff]  ;;  %v1389_v56 = vld [vmem:[%s8049_s3 + $0x10] sm:$0xff] }
0x1116   :  { %v5310_v25 = vpop.f32.mrf.mxu0 }
0x1117   :  { %6039 = vtanh.f32 %v951_v57  ;;  %v4694_v60 = vmul.f32 -1.442695, %v951_v57  ;;  %v1388_v57 = vld [vmem:[%s8049_s3 + $0x8] sm:$0xff]  ;;  %v1387_v25 = vld [vmem:[%s8049_s3] sm:$0xff] }
0x1119   :  { %6041 = vpow2.f32 %v4694_v60 }
0x1124   :  { %v6040_v58 = vpop.eup %6039 }
0x1125   :  { %961 = vrot.lane.b32.xlu1 %v6040_v58, %s6216_s1 }
0x1126   :  { %v6042_v61 = vpop.eup %6041 }
0x1127   :  { %v955_v63 = vadd.f32 1.0, %v6042_v61 }
0x1129   :  { %979 = vperm.xlu1 %5989, %v977_v59   ;;  %6043 = vrcp.f32 %v955_v63 }
0x1136   :  { %v6044_v1 = vpop.eup %6043 }
0x1137   :  { %v959_v4 = vmul.f32 %v6044_v1, %v6613_v36 }
0x1197   :  { %v962_v55 = vpop.permute.xlu1 %961 }
0x1198   :  { %v964_v3 = vmul.f32 %v6044_v1, %v962_v55  ;;  %v1377_v55 = vld [vmem:[%s8013_s7] sm:$0xff] }
0x119a   :  { %966 = vrot.lane.b32.xlu0 %v964_v3, %s6217_s2 }
0x11a4   :  { %v6620_v11 = vpop.permute.xlu1 %979 }
0x11a5   :  { %vm981_vm15 = vcmp.eq.s32.totalorder %v6620_v11, 1 }
0x120c   :  { %v967_v6 = vpop.permute.xlu0 %966 }
0x120d   :  { %v6616_v8 = vadd.f32 %v967_v6, %v959_v4  ;;  %v1483_v6 = vld [vmem:[%s8014_s10 + $0x38] sm:$0xff] }
0x120f   :  { %6045 = vtanh.f32 %v6616_v8  ;;  %v983_v42 = vsel %vm981_vm15, %v6616_v8, %v6613_v36  ;;  %v1482_v8 = vld [vmem:[%s8014_s10 + $0x30] sm:$0xff] }
0x121c   :  { %v6046_v10 = vpop.eup %6045 }
0x121d   :  { %972 = vrot.lane.b32.xlu0 %v6046_v10, %s6216_s1  ;;  %v1481_v10 = vld [vmem:[%s8014_s10 + $0x28] sm:$0xff] }
0x128f   :  { %v973_v14 = vpop.permute.xlu0 %972 }
0x1290   :  { %v6622_v16 = vmul.f32 %v6044_v1, %v973_v14 }
0x1292   :  { %v6628_v19 = vsel %vm981_vm15, %v6622_v16, %v873_v53  ;;  %v984_v43 = vsel %vm981_vm15, %v6622_v16, 0.0 }
0x1293   :  { %986 = vrot.lane.b32.xlu1 %v6628_v19, %s6217_s2 }
0x1305   :  { %v987_v20 = vpop.permute.xlu1 %986 }
0x1306   :  { %5320 = vmatmul.mubr.msk.f32.vlgmr.msra.gmra.mxu1 %vm90_vm0, %v987_v20  ;;  %v1480_v20 = vld [vmem:[%s8014_s10 + $0x20] sm:$0xff] }
0x1307   :  { %5343 = vmatpush3.msra.mxu1 %v1247_v5 }
0x1308   :  { %5344 = vmatprep.subr.mxu1 %v1246_v7 }
0x1309   :  { %5345 = vmatpush3.msra.mxu1 %v1246_v7 }
0x130a   :  { %5346 = vmatprep.subr.mxu1 %v1245_v40 }
0x130b   :  { %5347 = vmatpush3.msra.mxu1 %v1245_v40 }
0x130c   :  { %5348 = vmatprep.subr.mxu1 %v1244_v9 }
0x130d   :  { %5349 = vmatpush3.msra.mxu1 %v1244_v9 }
0x130e   :  { %5381 = vmatprep.subr.mxu1 %v6213_v2 }
0x13c6   :  { %v1056_v21 = vpop.f32.mrf.mxu1 }
0x13c7   :  { %v1060_v22 = vadd.f32 %v1056_v21, %v6455_v33  ;;  %v1094_v33 = vld [vmem:[%s8047_s30 + $0x8] sm:$0xff]  ;;  %v1479_v21 = vld [vmem:[%s8014_s10 + $0x18] sm:$0xff] }
0x13c8   :  { %v5321_v31 = vpop.f32.mrf.mxu1  ;;  %5326 = vmatprep.subr.mxu0 %v1094_v33 }
0x13c9   :  { %6047 = vtanh.f32 %v1060_v22  ;;  %5327 = vmatpush3.msra.mxu0 %v1094_v33  ;;  %v4696_v27 = vmul.f32 -1.442695, %v1060_v22  ;;  %v1572_v22 = vld [vmem:[%s8015_s14 + $0x18] sm:$0xff]  ;;  %v1478_v31 = vld [vmem:[%s8014_s10 + $0x10] sm:$0xff]  ;;  %v1476_v33 = vld [vmem:[%s8014_s10] sm:$0xff] }
0x13ca   :  { %5328 = vmatprep.subr.mxu0 %v1093_v28 }
0x13cb   :  { %5329 = vmatpush3.msra.mxu0 %v1093_v28  ;;  %6049 = vpow2.f32 %v4696_v27  ;;  %v1569_v28 = vld [vmem:[%s8015_s14] sm:$0xff] }
0x13cc   :  { %5362 = vmatprep.subr.mxu0 %v6213_v2 }
0x13d6   :  { %v6048_v26 = vpop.eup %6047 }
0x13d7   :  { %1070 = vrot.lane.b32.xlu0 %v6048_v26, %s6216_s1  ;;  %v1570_v26 = vld [vmem:[%s8015_s14 + $0x8] sm:$0xff] }
0x13d8   :  { %v6050_v37 = vpop.eup %6049 }
0x13d9   :  { %v1064_v38 = vadd.f32 1.0, %v6050_v37 }
0x13db   :  { %1088 = vperm.xlu0 %5990, %v1086_v32   ;;  %6051 = vrcp.f32 %v1064_v38  ;;  %v1561_v32 = vld [vmem:[%s8016_s13] sm:$0xff] }
0x13df   :  { %1111 = vrot.lane.b32.xlu0 %v439_v18, %s6217_s2  ;;  %v1562_v18 = vld [vmem:[%s8016_s13 + $0x8] sm:$0xff] }
0x13e3   :  { %1115 = vrot.lane.b32.xlu0 %v657_v35, %s6217_s2 }
0x13e7   :  { %1119 = vrot.lane.b32.xlu0 %v875_v17, %s6217_s2 }
0x13e8   :  { %v6662_v13 = vpop.eup %6051 }
0x13e9   :  { %v1068_v44 = vmul.f32 %v6662_v13, %v983_v42  ;;  %v6853_v42 = vld [vmem:[%s8017_s15 + $0x18] sm:$0xff] }
0x1449   :  { %v1071_v15 = vpop.permute.xlu0 %1070 }
0x144a   :  { %v1073_v39 = vmul.f32 %v6662_v13, %v1071_v15 }
0x144c   :  { %1075 = vrot.lane.b32.xlu1 %v1073_v39, %s6217_s2 }
0x1456   :  { %v6666_v62 = vpop.permute.xlu0 %1088 }
0x1457   :  { %vm1090_vm3 = vcmp.eq.s32.totalorder %v6666_v62, 1 }
0x145a   :  { %v1112_v0 = vpop.permute.xlu0 %1111 }
0x145b   :  { %5331 = vmatmul.mubr.msk.f32.vlgmr.msra.gmra.mxu0 %vm90_vm0, %v1112_v0 }
0x145c   :  { %5363 = vmatpush3.msra.mxu0 %v1394_v46 }
0x145d   :  { %5364 = vmatprep.subr.mxu0 %v6213_v2 }
0x145e   :  { %5365 = vmatpush3.msra.mxu0 %v1393_v47  ;;  %v1116_v60 = vpop.permute.xlu0 %1115 }
0x145f   :  { %5366 = vmatprep.subr.mxu0 %v6213_v2 }
0x1460   :  { %5367 = vmatpush3.msra.mxu0 %v1392_v48 }
0x1461   :  { %5368 = vmatprep.subr.mxu0 %v6213_v2 }
0x1462   :  { %5369 = vmatpush3.msra.mxu0 %v1391_v50  ;;  %v1120_v36 = vpop.permute.xlu0 %1119 }
0x1463   :  { %5370 = vmatprep.subr.mxu0 %v6213_v2 }
0x1464   :  { %5371 = vmatpush3.msra.mxu0 %v1390_v51 }
0x1465   :  { %5372 = vmatprep.subr.mxu0 %v6213_v2 }
0x1466   :  { %5373 = vmatpush3.msra.mxu0 %v1389_v56 }
0x1467   :  { %5374 = vmatprep.subr.mxu0 %v6213_v2 }
0x1468   :  { %5375 = vmatpush3.msra.mxu0 %v1388_v57 }
0x1469   :  { %5376 = vmatprep.subr.mxu0 %v6213_v2 }
0x146a   :  { %5377 = vmatpush3.msra.mxu0 %v1387_v25 }
0x146b   :  { %5400 = vmatprep.subr.mxu0 %v1572_v22 }
0x14be   :  { %v1076_v12 = vpop.permute.xlu1 %1075 }
0x14bf   :  { %v1078_v45 = vadd.f32 %v1076_v12, %v1068_v44  ;;  %v6859_v44 = vld [vmem:[%s8017_s15 + $0x10] sm:$0xff]  ;;  %v6868_v12 = vld [vmem:[%s8017_s15 + $0x8] sm:$0xff] }
0x14c1   :  { %6053 = vtanh.f32 %v1078_v45  ;;  %v4714_v45 = vld [vmem:[%s8018_s9] ss:$0 sm:$0xff] }
0x14ce   :  { %v6054_v29 = vpop.eup %6053 }
0x14cf   :  { %1081 = vrot.lane.b32.xlu1 %v6054_v29, %s6216_s1  ;;  %v6878_v29 = vld [vmem:[%s8017_s15] sm:$0xff] }
0x14d3   :  { %1113 = vrot.lane.b32.xlu1 %v548_v49, %s6217_s2 }
0x14d7   :  { %1117 = vrot.lane.b32.xlu1 %v766_v41, %s6217_s2 }
0x14db   :  { %1121 = vrot.lane.b32.xlu1 %v984_v43, %s6217_s2 }
0x151b   :  { %v5332_v52 = vpop.f32.mrf.mxu0 }
0x151c   :  { %v6729_v54 = vadd.f32 %v5332_v52, %v6723_v30 }
0x151d   :  { %v1205_v34 = vpop.f32.mrf.mxu0 }
0x151e   :  { %v6726_v53 = vadd.f32 %v6723_v30, %v1205_v34 }
0x1520   :  { %5350 = vmatprep.mubr.msk.f32.mxu1 %vm90_vm0, %v6726_v53 }
0x1521   :  { %5351 = vmatmul.mubr.msk.f32.vlgmr.msra.gmra.mxu1 %vm90_vm0, %v6729_v54 }
0x1522   :  { %5382 = vmatpush3.msra.mxu1 %v1483_v6 }
0x1523   :  { %5383 = vmatprep.subr.mxu1 %v6213_v2 }
0x1524   :  { %5384 = vmatpush3.msra.mxu1 %v1482_v8 }
0x1525   :  { %5385 = vmatprep.subr.mxu1 %v6213_v2 }
0x1526   :  { %5386 = vmatpush3.msra.mxu1 %v1481_v10 }
0x1527   :  { %5387 = vmatprep.subr.mxu1 %v6213_v2 }
0x1528   :  { %5388 = vmatpush3.msra.mxu1 %v1480_v20  ;;  %v1563_v20 = vld [vmem:[%s8016_s13 + $0x10] sm:$0xff] }
0x1529   :  { %5389 = vmatprep.subr.mxu1 %v6213_v2 }
0x152a   :  { %5390 = vmatpush3.msra.mxu1 %v1479_v21  ;;  %v1564_v21 = vld [vmem:[%s8016_s13 + $0x18] sm:$0xff] }
0x152b   :  { %5391 = vmatprep.subr.mxu1 %v6213_v2 }
0x152c   :  { %5392 = vmatpush3.msra.mxu1 %v1478_v31  ;;  %v1566_v31 = vld [vmem:[%s8016_s13 + $0x28] sm:$0xff] }
0x152d   :  { %5393 = vmatprep.subr.mxu1 %v6213_v2 }
0x152e   :  { %5394 = vmatpush3.msra.mxu1 %v1477_v24  ;;  %v1568_v24 = vld [vmem:[%s8016_s13 + $0x38] sm:$0xff] }
0x152f   :  { %5395 = vmatprep.subr.mxu1 %v6213_v2 }
0x1530   :  { %5396 = vmatpush3.msra.mxu1 %v1476_v33 }
0x1531   :  { %5420 = vmatprep.subr.mxu1 %v6213_v2 }
0x1541   :  { %v1082_v58 = vpop.permute.xlu1 %1081 }
0x1542   :  { %v1084_v59 = vmul.f32 %v6662_v13, %v1082_v58  ;;  %v6934_v58 = vld [vmem:[%s8020_s16] ss:$0 sm:$0xff] }
0x1544   :  { %v1092_v61 = vsel %vm1090_vm3, %v1084_v59, 0.0  ;;  %v1091_v63 = vsel %vm1090_vm3, %v1084_v59, %v6628_v19 }
0x1545   :  { %1123 = vrot.lane.b32.xlu0 %v1092_v61, %s6217_s2  ;;  %1379 = vrot.lane.b32.xlu1 %v1091_v63, %s6217_s2  ;;  %v1114_v1 = vpop.permute.xlu1 %1113 }
0x1546   :  { %5333 = vmatprep.mubr.msk.f32.mxu0 %vm90_vm0, %v1114_v1 }
0x1547   :  { %5334 = vmatmul.mubr.msk.f32.gmra.mxu0 %vm90_vm0, %v1116_v60 }
0x1549   :  { %1383 = vrot.lane.b32.xlu0 %v1377_v55, %s6217_s2  ;;  %v1118_v3 = vpop.permute.xlu1 %1117 }
0x154a   :  { %5336 = vmatprep.mubr.msk.f32.mxu0 %vm90_vm0, %v1118_v3 }
0x154b   :  { %5337 = vmatmul.mubr.msk.f32.gmra.mxu0 %vm90_vm0, %v1120_v36 }
0x154d   :  { %v1122_v4 = vpop.permute.xlu1 %1121 }
0x154e   :  { %5339 = vmatprep.mubr.msk.f32.mxu0 %vm90_vm0, %v1122_v4 }
0x15b7   :  { %v1124_v11 = vpop.permute.xlu0 %1123  ;;  %v1380_v14 = vpop.permute.xlu1 %1379 }
0x15b8   :  { %5340 = vmatmul.mubr.msk.f32.gmra.mxu0 %vm90_vm0, %v1124_v11 }
0x15b9   :  { %5378 = vmatprep.mubr.msk.f32.mxu0 %vm6214_vm1, %v6213_v2 }
0x15bb   :  { %v1384_v16 = vpop.permute.xlu0 %1383 }
0x15bc   :  { %v1386_v19 = vsel %vm90_vm0, %v1380_v14, %v1384_v16 }
0x15bd   :  { %5379 = vmatmul.mubr.msk.f32.vlgmr.msra.gmra.mxu0 %vm1402_vm4, %v1386_v19 }
0x15be   :  { %5401 = vmatpush3.msra.mxu0 %v1572_v22  ;;  %5408 = vmatprep.mubr.msk.f32.mxu0 %vm90_vm0, %v1561_v32  ;;  %v1565_v22 = vld [vmem:[%s8016_s13 + $0x20] sm:$0xff] }
0x15bf   :  { %5402 = vmatprep.subr.mxu0 %v1571_v23 }
0x15c0   :  { %5403 = vmatpush3.msra.mxu0 %v1571_v23  ;;  %v1567_v23 = vld [vmem:[%s8016_s13 + $0x30] sm:$0xff] }
0x15c1   :  { %5404 = vmatprep.subr.mxu0 %v1570_v26 }
0x15c2   :  { %5405 = vmatpush3.msra.mxu0 %v1570_v26 }
0x15c3   :  { %5406 = vmatprep.subr.mxu0 %v1569_v28 }
0x15c4   :  { %5407 = vmatpush3.msra.mxu0 %v1569_v28 }
0x15c5   :  { %5431 = vmatprep.subr.mxu0 %v6213_v2  ;;  %5409 = vmatmul.mubr.msk.f32.vlgmr.msra.gmra.mxu0 %vm90_vm0, %v1562_v18 }
0x15c6   :  { %5411 = vmatprep.mubr.msk.f32.mxu0 %vm90_vm0, %v1563_v20 }
0x15c9   :  { %5412 = vmatmul.mubr.msk.f32.gmra.mxu0 %vm90_vm0, %v1564_v21 }
0x15ca   :  { %5414 = vmatprep.mubr.msk.f32.mxu0 %vm90_vm0, %v1565_v22  ;;  %v7054_v22 = vld [vmem:[%s8022_s18 + $0x38] sm:$0xff] }
0x15cd   :  { %5415 = vmatmul.mubr.msk.f32.gmra.mxu0 %vm90_vm0, %v1566_v31  ;;  %v7060_v31 = vld [vmem:[%s8022_s18 + $0x30] sm:$0xff] }
0x15ce   :  { %5417 = vmatprep.mubr.msk.f32.mxu0 %vm90_vm0, %v1567_v23 }
0x15d1   :  { %5418 = vmatmul.mubr.msk.f32.gmra.mxu0 %vm90_vm0, %v1568_v24  ;;  %v7077_v24 = vld [vmem:[%s8022_s18 + $0x20] sm:$0xff] }
0x15d2   :  { %5447 = vmatprep.mubr.msk.f32.mxu0 %vm6214_vm1, %v6213_v2 }
0x15e1   :  { %v6903_v47 = vpop.f32.mrf.mxu1 }
0x15e3   :  { %v6905_v48 = vpop.f32.mrf.mxu1 }
0x1607   :  { %v5335_v35 = vpop.f32.mrf.mxu0 }
0x1608   :  { %v6822_v37 = vadd.f32 %v5335_v35, %v6723_v30 }
0x1609   :  { %v1215_v17 = vpop.f32.mrf.mxu0 }
0x160a   :  { %v6819_v27 = vadd.f32 %v6723_v30, %v1215_v17 }
0x160b   :  { %v5338_v38 = vpop.f32.mrf.mxu0 }
0x160c   :  { %5353 = vmatprep.mubr.msk.f32.mxu1 %vm90_vm0, %v6819_v27  ;;  %v6832_v39 = vadd.f32 %v5338_v38, %v6723_v30 }
0x160d   :  { %v1225_v13 = vpop.f32.mrf.mxu0  ;;  %5354 = vmatmul.mubr.msk.f32.gmra.mxu1 %vm90_vm0, %v6822_v37 }
0x160e   :  { %v6829_v15 = vadd.f32 %v6723_v30, %v1225_v13 }
0x1610   :  { %5356 = vmatprep.mubr.msk.f32.mxu1 %vm90_vm0, %v6829_v15 }
0x1611   :  { %5357 = vmatmul.mubr.msk.f32.gmra.mxu1 %vm90_vm0, %v6832_v39 }
0x1678   :  { %v5341_v62 = vpop.f32.mrf.mxu0 }
0x1679   :  { %v6842_v7 = vadd.f32 %v5341_v62, %v6723_v30 }
0x167a   :  { %v1235_v0 = vpop.f32.mrf.mxu0 }
0x167b   :  { %v6839_v5 = vadd.f32 %v6723_v30, %v1235_v0  ;;  %v4716_v30 = vld [vmem:[%s8019_s11] ss:$0 sm:$0xff] }
0x167c   :  { %v7036_v0 = vld [vmem:[%s8021_s17] sm:$0xff] }
0x167d   :  { %5359 = vmatprep.mubr.msk.f32.mxu1 %vm90_vm0, %v6839_v5  ;;  %v1472_v40 = vpop.f32.mrf.mxu0 }
0x167e   :  { %5360 = vmatmul.mubr.msk.f32.gmra.mxu1 %vm90_vm0, %v6842_v7  ;;  %v1473_v46 = vadd.f32 %v4714_v45, %v1472_v40 }
0x167f   :  { %v5380_v9 = vpop.f32.mrf.mxu0  ;;  %5397 = vmatprep.mubr.msk.f32.mxu1 %vm6214_vm1, %v6213_v2 }
0x1682   :  { %5398 = vmatmul.mubr.msk.f32.vlgmr.msra.gmra.mxu1 %vm1402_vm4, %v1386_v19 }
0x1683   :  { %5421 = vmatpush3.msra.mxu1 %v6853_v42  ;;  %5428 = vmatprep.mubr.msk.f32.mxu1 %vm6214_vm1, %v6213_v2 }
0x1684   :  { %5422 = vmatprep.subr.mxu1 %v6213_v2 }
0x1685   :  { %5423 = vmatpush3.msra.mxu1 %v6859_v44  ;;  %v6925_v56 = vpop.f32.mrf.mxu0 }
0x1686   :  { %5424 = vmatprep.subr.mxu1 %v6213_v2 }
0x1687   :  { %5425 = vmatpush3.msra.mxu1 %v6868_v12  ;;  %v1670_v59 = vpop.f32.mrf.mxu0 }
0x1688   :  { %5426 = vmatprep.subr.mxu1 %v6213_v2  ;;  %v1671_v60 = vadd.f32 %v6934_v58, %v1670_v59 }
0x1689   :  { %5427 = vmatpush3.msra.mxu1 %v6878_v29  ;;  %v7021_v18 = vpop.f32.mrf.mxu0 }
0x168a   :  { %5429 = vmatmul.mubr.msk.f32.vlgmr.msra.gmra.mxu1 %vm90_vm0, %v1473_v46  ;;  %5450 = vmatprep.subr.mxu1 %v6213_v2 }
0x168b   :  { %5451 = vmatpush3.msra.mxu1 %v6842_v7  ;;  %5466 = vmatprep.mubr.msk.f32.mxu1 %vm6214_vm1, %v6213_v2  ;;  %v7023_v35 = vpop.f32.mrf.mxu0 }
0x168c   :  { %5452 = vmatprep.subr.mxu1 %v6213_v2 }
0x168d   :  { %5453 = vmatpush3.msra.mxu1 %v6839_v5  ;;  %v7025_v17 = vpop.f32.mrf.mxu0 }
0x168e   :  { %5454 = vmatprep.subr.mxu1 %v6213_v2 }
0x168f   :  { %5455 = vmatpush3.msra.mxu1 %v6832_v39  ;;  %v7027_v38 = vpop.f32.mrf.mxu0 }
0x1690   :  { %5456 = vmatprep.subr.mxu1 %v6213_v2 }
0x1691   :  { %5457 = vmatpush3.msra.mxu1 %v6829_v15  ;;  %v7029_v13 = vpop.f32.mrf.mxu0 }
0x1692   :  { %5458 = vmatprep.subr.mxu1 %v6213_v2 }
0x1693   :  { %5459 = vmatpush3.msra.mxu1 %v6822_v37  ;;  %v7031_v62 = vpop.f32.mrf.mxu0 }
0x1694   :  { %5460 = vmatprep.subr.mxu1 %v6213_v2 }
0x1695   :  { %5461 = vmatpush3.msra.mxu1 %v6819_v27 }
0x1696   :  { %5462 = vmatprep.subr.mxu1 %v6213_v2 }
0x1697   :  { %5463 = vmatpush3.msra.mxu1 %v6729_v54 }
0x1698   :  { %5464 = vmatprep.subr.mxu1 %v6213_v2 }
0x1699   :  { %5465 = vmatpush3.msra.mxu1 %v6726_v53 }
0x169a   :  { %5469 = vmatprep.subr.mxu1 %v6213_v2 }
0x16cd   :  { %v6907_v49 = vpop.f32.mrf.mxu1 }
0x16cf   :  { %v6909_v50 = vpop.f32.mrf.mxu1 }
0x16d1   :  { %v6911_v51 = vpop.f32.mrf.mxu1 }
0x16d3   :  { %v6913_v41 = vpop.f32.mrf.mxu1 }
0x173e   :  { %v6915_v43 = vpop.f32.mrf.mxu1 }
0x173f   :  { %5432 = vmatpush3.xpose.msk.msra.mxu0 %vm90_vm0, %v6915_v43 }
0x1740   :  { %v6919_v52 = vpop.f32.mrf.mxu1  ;;  %5433 = vmatprep.subr.mxu0 %v6213_v2 }
0x1742   :  { %v1557_v34 = vpop.f32.mrf.mxu1 }
0x1743   :  { %v1558_v57 = vadd.f32 %v4716_v30, %v1557_v34  ;;  %5434 = vmatpush3.xpose.msk.msra.mxu0 %vm90_vm0, %v6919_v52  ;;  %v1676_v30 = vadd.f32 %v6925_v56, %v6934_v58 }
0x1744   :  { %v5399_v25 = vpop.f32.mrf.mxu1  ;;  %5435 = vmatprep.subr.mxu0 %v6213_v2 }
0x1745   :  { %1804 = vrot.lane.b32.xlu0 %v1558_v57, %s6217_s2 }
0x1747   :  { %5436 = vmatpush3.xpose.msk.msra.mxu0 %vm90_vm0, %v6911_v51 }
0x1748   :  { %5437 = vmatprep.subr.mxu0 %v6213_v2 }
0x174a   :  { %v1791_v61 = vpop.f32.mrf.mxu1 }
0x174b   :  { %v1795_v63 = vadd.f32 %v1791_v61, %v1671_v60  ;;  %5438 = vmatpush3.xpose.msk.msra.mxu0 %vm90_vm0, %v6913_v41 }
0x174c   :  { %v5430_v1 = vpop.f32.mrf.mxu1  ;;  %5439 = vmatprep.subr.mxu0 %v6213_v2 }
0x174d   :  { %6055 = vtanh.f32 %v1795_v63  ;;  %v4728_v3 = vmul.f32 -1.442695, %v1795_v63 }
0x174f   :  { %5440 = vmatpush3.xpose.msk.msra.mxu0 %vm90_vm0, %v6907_v49  ;;  %6057 = vpow2.f32 %v4728_v3 }
0x1750   :  { %5441 = vmatprep.subr.mxu0 %v6213_v2 }
0x1753   :  { %5442 = vmatpush3.xpose.msk.msra.mxu0 %vm90_vm0, %v6909_v50 }
0x1754   :  { %5443 = vmatprep.subr.mxu0 %v6213_v2 }
0x1757   :  { %5444 = vmatpush3.xpose.msk.msra.mxu0 %vm90_vm0, %v6903_v47 }
0x1758   :  { %5445 = vmatprep.subr.mxu0 %v6213_v2 }
0x175a   :  { %v6056_v55 = vpop.eup %6055 }
0x175b   :  { %1809 = vrot.lane.b32.xlu1 %v6056_v55, %s6216_s1  ;;  %5446 = vmatpush3.xpose.msk.msra.mxu0 %vm90_vm0, %v6905_v48 }
0x175c   :  { %5488 = vmatprep.subr.mxu0 %v6213_v2  ;;  %v6058_v36 = vpop.eup %6057 }
0x175d   :  { %v1799_v4 = vadd.f32 1.0, %v6058_v36 }
0x175f   :  { %6059 = vrcp.f32 %v1799_v4 }
0x176c   :  { %v6060_v6 = vpop.eup %6059 }
0x17b7   :  { %v1805_v11 = vpop.permute.xlu0 %1804 }
0x17b8   :  { %v1807_v14 = vmul.f32 %v6060_v6, %v1805_v11 }
0x17cd   :  { %v1810_v8 = vpop.permute.xlu1 %1809 }
0x17ce   :  { %v1812_v10 = vmul.f32 %v6060_v6, %v1810_v8 }
0x17d0   :  { %1814 = vrot.lane.b32.xlu1 %v1812_v10, %s6217_s2 }
0x1842   :  { %v1815_v16 = vpop.permute.xlu1 %1814 }
0x1843   :  { %v6957_v19 = vadd.f32 %v1815_v16, %v1807_v14 }
0x1845   :  { %6061 = vtanh.f32 %v6957_v19 }
0x1852   :  { %v6062_v26 = vpop.eup %6061 }
0x1853   :  { %1820 = vrot.lane.b32.xlu0 %v6062_v26, %s6216_s1  ;;  %v7084_v26 = vld [vmem:[%s8022_s18 + $0x18] sm:$0xff] }
0x18c5   :  { %v1821_v33 = vpop.permute.xlu0 %1820 }
0x18c6   :  { %v6987_v28 = vmul.f32 %v6060_v6, %v1821_v33  ;;  %v7091_v33 = vld [vmem:[%s8022_s18 + $0x10] sm:$0xff] }
0x18c8   :  { %1825 = vrot.lane.b32.xlu1 %v6987_v28, %s6217_s2 }
0x193a   :  { %v1826_v32 = vpop.permute.xlu1 %1825 }
0x193b   :  { %5448 = vmatmul.mubr.msk.f32.vlgmr.msra.gmra.mxu0 %vm90_vm0, %v1826_v32 }
0x193c   :  { %5489 = vmatpush3.msra.mxu0 %v6853_v42  ;;  %5496 = vmatprep.mubr.msk.f32.mxu0 %vm6214_vm1, %v6213_v2 }
0x193d   :  { %5490 = vmatprep.subr.mxu0 %v6213_v2 }
0x193e   :  { %5491 = vmatpush3.msra.mxu0 %v6859_v44 }
0x193f   :  { %5492 = vmatprep.subr.mxu0 %v6213_v2 }
0x1940   :  { %5493 = vmatpush3.msra.mxu0 %v6868_v12 }
0x1941   :  { %5494 = vmatprep.subr.mxu0 %v6213_v2 }
0x1942   :  { %5495 = vmatpush3.msra.mxu0 %v6878_v29 }
0x1943   :  { %5497 = vmatmul.mubr.msk.f32.vlgmr.msra.gmra.mxu0 %vm90_vm0, %v1826_v32  ;;  %5518 = vmatprep.subr.mxu0 %v6213_v2  ;;  %v7107_v32 = vld [vmem:[%s8022_s18] sm:$0xff] }
0x1944   :  { %5519 = vmatpush3.msra.mxu0 %v6842_v7  ;;  %5534 = vmatprep.mubr.msk.f32.mxu0 %vm6214_vm1, %v6213_v2 }
0x1945   :  { %5520 = vmatprep.subr.mxu0 %v6213_v2 }
0x1946   :  { %5521 = vmatpush3.msra.mxu0 %v6839_v5 }
0x1947   :  { %5522 = vmatprep.subr.mxu0 %v6213_v2 }
0x1948   :  { %5523 = vmatpush3.msra.mxu0 %v6832_v39 }
0x1949   :  { %5524 = vmatprep.subr.mxu0 %v6213_v2 }
0x194a   :  { %5525 = vmatpush3.msra.mxu0 %v6829_v15 }
0x194b   :  { %5526 = vmatprep.subr.mxu0 %v6213_v2 }
0x194c   :  { %5527 = vmatpush3.msra.mxu0 %v6822_v37 }
0x194d   :  { %5528 = vmatprep.subr.mxu0 %v6213_v2 }
0x194e   :  { %5529 = vmatpush3.msra.mxu0 %v6819_v27 }
0x194f   :  { %5530 = vmatprep.subr.mxu0 %v6213_v2 }
0x1950   :  { %5531 = vmatpush3.msra.mxu0 %v6729_v54 }
0x1951   :  { %5532 = vmatprep.subr.mxu0 %v6213_v2 }
0x1952   :  { %5533 = vmatpush3.msra.mxu0 %v6726_v53 }
0x1953   :  { %5537 = vmatprep.subr.mxu0 %v6213_v2 }
0x19fb   :  { %v1919_v40 = vpop.f32.mrf.mxu0 }
0x19fc   :  { %v1920_v9 = vadd.f32 %v1919_v40, %v7036_v0 }
0x19fd   :  { %v5449_v45 = vpop.f32.mrf.mxu0 }
0x19fe   :  { %v1923_v46 = vsel %vm1402_vm4, %v1920_v9, -inf }
0x19ff   :  { %1924 = vmax.xlane.f32.xlu0 %v1923_v46 }
0x1a03   :  { %v2151_v34 = vpop.f32.mrf.mxu0 }
0x1a04   :  { %v2155_v57 = vadd.f32 %v2151_v34, %v1676_v30 }
0x1a05   :  { %v5498_v25 = vpop.f32.mrf.mxu0 }
0x1a06   :  { %6063 = vtanh.f32 %v2155_v57  ;;  %v4741_v60 = vmul.f32 -1.442695, %v2155_v57 }
0x1a08   :  { %6065 = vpow2.f32 %v4741_v60 }
0x1a13   :  { %v6064_v59 = vpop.eup %6063 }
0x1a15   :  { %2165 = vrot.lane.b32.xlu0 %v6064_v59, %s6216_s1  ;;  %v6066_v55 = vpop.eup %6065 }
0x1a16   :  { %v2159_v3 = vadd.f32 1.0, %v6066_v55 }
0x1a88   :  { %v1925_v61 = vpop.xlane.xlu0 %1924 }
0x1a89   :  { %v1926_v63 = vsub.f32 %v1920_v9, %v1925_v61 }
0x1a8b   :  { %v1927_v1 = vmul.f32 1.442695, %v1926_v63 }
0x1a8c   :  { %v2166_v56 = vpop.permute.xlu0 %2165 }
0x1a8d   :  { %6067 = vpow2.f32 %v1927_v1 }
0x1a8e   :  { %6069 = vrcp.f32 %v2159_v3  ;;  %v1681_v3 = vadd.f32 %v6934_v58, %v7023_v35 }
0x1a9a   :  { %v6068_v36 = vpop.eup %6067 }
0x1a9b   :  { %v1929_v4 = vsel %vm1402_vm4, %v6068_v36, 0.0  ;;  %v6070_v6 = vpop.eup %6069 }
0x1a9c   :  { %1930 = vadd.xlane.f32.xlu1 %v1929_v4  ;;  %v2168_v8 = vmul.f32 %v6070_v6, %v2166_v56  ;;  %v2163_v11 = vmul.f32 %v6070_v6, %v6957_v19  ;;  %v7069_v19 = vld [vmem:[%s8022_s18 + $0x28] sm:$0xff] }
0x1aad   :  { %2170 = vrot.lane.b32.xlu1 %v2168_v8, %s6217_s2 }
0x1ab1   :  { %2007 = vrot.lane.b32.xlu1 %v6987_v28, %s6216_s1  ;;  %v7098_v28 = vld [vmem:[%s8022_s18 + $0x8] sm:$0xff] }
0x1b25   :  { %v1931_v10 = vpop.xlane.xlu1 %1930 }
0x1b26   :  { %6071 = vrcp.f32 %v1931_v10 }
0x1b29   :  { %v2171_v14 = vpop.permute.xlu1 %2170 }
0x1b2a   :  { %v7048_v16 = vadd.f32 %v2171_v14, %v2163_v11 }
0x1b2c   :  { %6073 = vtanh.f32 %v7048_v16 }
0x1b2d   :  { %v2008_v45 = vpop.permute.xlu1 %2007 }
0x1b33   :  { %v6072_v20 = vpop.eup %6071 }
0x1b34   :  { %v1933_v21 = vmul.f32 %v6072_v20, %v6068_v36 }
0x1b36   :  { %5467 = vmatmul.mubr.msk.f32.vlgmr.msra.gmra.mxu1 %vm1402_vm4, %v1933_v21 }
0x1b37   :  { %5470 = vmatpush3.msra.mxu1 %v7054_v22  ;;  %5485 = vmatprep.mubr.msk.f32.mxu1 %vm6214_vm1, %v6213_v2 }
0x1b38   :  { %5471 = vmatprep.subr.mxu1 %v6213_v2 }
0x1b39   :  { %v6074_v23 = vpop.eup %6073  ;;  %5472 = vmatpush3.msra.mxu1 %v7060_v31 }
0x1b3a   :  { %2176 = vrot.lane.b32.xlu0 %v6074_v23, %s6216_s1  ;;  %5473 = vmatprep.subr.mxu1 %v6213_v2 }
0x1b3b   :  { %5474 = vmatpush3.msra.mxu1 %v7069_v19 }
0x1b3c   :  { %5475 = vmatprep.subr.mxu1 %v6213_v2 }
0x1b3d   :  { %5476 = vmatpush3.msra.mxu1 %v7077_v24 }
0x1b3e   :  { %5477 = vmatprep.subr.mxu1 %v6213_v2 }
0x1b3f   :  { %5478 = vmatpush3.msra.mxu1 %v7084_v26 }
0x1b40   :  { %5479 = vmatprep.subr.mxu1 %v6213_v2 }
0x1b41   :  { %5480 = vmatpush3.msra.mxu1 %v7091_v33 }
0x1b42   :  { %5481 = vmatprep.subr.mxu1 %v6213_v2 }
0x1b43   :  { %5482 = vmatpush3.msra.mxu1 %v7098_v28 }
0x1b44   :  { %5483 = vmatprep.subr.mxu1 %v6213_v2 }
0x1b45   :  { %5484 = vmatpush3.msra.mxu1 %v7107_v32 }
0x1b46   :  { %5499 = vmatprep.subr.mxu1 %v6213_v2 }
0x1bac   :  { %v2177_v40 = vpop.permute.xlu0 %2176 }
0x1bad   :  { %v7111_v9 = vmul.f32 %v6070_v6, %v2177_v40 }
0x1baf   :  { %2181 = vrot.lane.b32.xlu0 %v7111_v9, %s6217_s2 }
0x1bf6   :  { %v2003_v46 = vpop.f32.mrf.mxu1 }
0x1bf7   :  { %v2010_v30 = vsel %vm90_vm0, %v2003_v46, %v2008_v45 }
0x1bf8   :  { %v5468_v34 = vpop.f32.mrf.mxu1  ;;  %5486 = vmatmul.mubr.msk.f32.vlgmr.msra.gmra.mxu1 %vm1402_vm4, %v2010_v30 }
0x1bf9   :  { %5500 = vmatpush3.xpose.msk.msra.mxu1 %vm90_vm0, %v6915_v43  ;;  %5515 = vmatprep.mubr.msk.f32.mxu1 %vm6214_vm1, %v6213_v2 }
0x1bfa   :  { %5501 = vmatprep.subr.mxu1 %v6213_v2 }
0x1bfd   :  { %5502 = vmatpush3.xpose.msk.msra.mxu1 %vm90_vm0, %v6919_v52 }
0x1bfe   :  { %5503 = vmatprep.subr.mxu1 %v6213_v2 }
0x1c01   :  { %5504 = vmatpush3.xpose.msk.msra.mxu1 %vm90_vm0, %v6911_v51 }
0x1c02   :  { %5505 = vmatprep.subr.mxu1 %v6213_v2 }
0x1c05   :  { %5506 = vmatpush3.xpose.msk.msra.mxu1 %vm90_vm0, %v6913_v41 }
0x1c06   :  { %5507 = vmatprep.subr.mxu1 %v6213_v2 }
0x1c09   :  { %5508 = vmatpush3.xpose.msk.msra.mxu1 %vm90_vm0, %v6907_v49 }
0x1c0a   :  { %5509 = vmatprep.subr.mxu1 %v6213_v2 }
0x1c0d   :  { %5510 = vmatpush3.xpose.msk.msra.mxu1 %vm90_vm0, %v6909_v50 }
0x1c0e   :  { %5511 = vmatprep.subr.mxu1 %v6213_v2 }
0x1c11   :  { %5512 = vmatpush3.xpose.msk.msra.mxu1 %vm90_vm0, %v6903_v47 }
0x1c12   :  { %5513 = vmatprep.subr.mxu1 %v6213_v2 }
0x1c15   :  { %5514 = vmatpush3.xpose.msk.msra.mxu1 %vm90_vm0, %v6905_v48 }
0x1c16   :  { %5556 = vmatprep.subr.mxu1 %v6213_v2 }
0x1c21   :  { %v2182_v57 = vpop.permute.xlu0 %2181 }
0x1c22   :  { %5516 = vmatmul.mubr.msk.f32.vlgmr.msra.gmra.mxu1 %vm90_vm0, %v2182_v57 }
0x1c23   :  { %5557 = vmatpush3.msra.mxu1 %v6853_v42  ;;  %5564 = vmatprep.mubr.msk.f32.mxu1 %vm6214_vm1, %v6213_v2 }
0x1c24   :  { %5558 = vmatprep.subr.mxu1 %v6213_v2 }
0x1c25   :  { %5559 = vmatpush3.msra.mxu1 %v6859_v44 }
0x1c26   :  { %5560 = vmatprep.subr.mxu1 %v6213_v2 }
0x1c27   :  { %5561 = vmatpush3.msra.mxu1 %v6868_v12 }
0x1c28   :  { %5562 = vmatprep.subr.mxu1 %v6213_v2 }
0x1c29   :  { %5563 = vmatpush3.msra.mxu1 %v6878_v29 }
0x1c2a   :  { %5565 = vmatmul.mubr.msk.f32.vlgmr.msra.gmra.mxu1 %vm90_vm0, %v2182_v57  ;;  %5586 = vmatprep.subr.mxu1 %v6213_v2 }
0x1c2b   :  { %5587 = vmatpush3.msra.mxu1 %v6842_v7  ;;  %5602 = vmatprep.mubr.msk.f32.mxu1 %vm6214_vm1, %v6213_v2 }
0x1c2c   :  { %5588 = vmatprep.subr.mxu1 %v6213_v2 }
0x1c2d   :  { %5589 = vmatpush3.msra.mxu1 %v6839_v5 }
0x1c2e   :  { %5590 = vmatprep.subr.mxu1 %v6213_v2 }
0x1c2f   :  { %5591 = vmatpush3.msra.mxu1 %v6832_v39 }
0x1c30   :  { %5592 = vmatprep.subr.mxu1 %v6213_v2 }
0x1c31   :  { %5593 = vmatpush3.msra.mxu1 %v6829_v15 }
0x1c32   :  { %5594 = vmatprep.subr.mxu1 %v6213_v2 }
0x1c33   :  { %5595 = vmatpush3.msra.mxu1 %v6822_v37 }
0x1c34   :  { %5596 = vmatprep.subr.mxu1 %v6213_v2 }
0x1c35   :  { %5597 = vmatpush3.msra.mxu1 %v6819_v27 }
0x1c36   :  { %5598 = vmatprep.subr.mxu1 %v6213_v2 }
0x1c37   :  { %5599 = vmatpush3.msra.mxu1 %v6729_v54 }
0x1c38   :  { %5600 = vmatprep.subr.mxu1 %v6213_v2 }
0x1c39   :  { %5601 = vmatpush3.msra.mxu1 %v6726_v53 }
0x1c3a   :  { %5605 = vmatprep.subr.mxu1 %v6213_v2 }
0x1cb8   :  { %v2080_v25 = vpop.f32.mrf.mxu1 }
0x1cb9   :  { %6075 = vtanh.f32 %v2080_v25 }
0x1cba   :  { %v5487_v59 = vpop.f32.mrf.mxu1 }
0x1cc6   :  { %v7173_v60 = vpop.eup %6075 }
0x1cc7   :  { %4409 = vst.msk [vmem:[%s8023_s23] sm:$0xff] %vm90_vm0, %v7173_v60 }
0x1ce2   :  { %v2251_v61 = vpop.f32.mrf.mxu1 }
0x1ce3   :  { %v2252_v63 = vadd.f32 %v2251_v61, %v7036_v0 }
0x1ce4   :  { %v5517_v1 = vpop.f32.mrf.mxu1 }
0x1ce5   :  { %v2255_v55 = vsel %vm1402_vm4, %v2252_v63, -inf }
0x1ce6   :  { %2256 = vmax.xlane.f32.xlu1 %v2255_v55 }
0x1cea   :  { %v2483_v36 = vpop.f32.mrf.mxu1 }
0x1ceb   :  { %v2487_v4 = vadd.f32 %v2483_v36, %v1681_v3 }
0x1cec   :  { %v5566_v56 = vpop.f32.mrf.mxu1 }
0x1ced   :  { %v4754_v21 = vmul.f32 -1.442695, %v2487_v4 }
0x1d6f   :  { %v2257_v6 = vpop.xlane.xlu1 %2256 }
0x1d70   :  { %v2258_v8 = vsub.f32 %v2252_v63, %v2257_v6 }
0x1d72   :  { %v2259_v10 = vmul.f32 1.442695, %v2258_v8 }
0x1d74   :  { %6077 = vpow2.f32 %v2259_v10 }
0x1d75   :  { %6079 = vtanh.f32 %v2487_v4 }
0x1d76   :  { %6081 = vpow2.f32 %v4754_v21  ;;  %v1686_v21 = vadd.f32 %v7021_v18, %v6934_v58 }
0x1d81   :  { %v6078_v11 = vpop.eup %6077 }
0x1d82   :  { %v2261_v14 = vsel %vm1402_vm4, %v6078_v11, 0.0  ;;  %v6080_v20 = vpop.eup %6079 }
0x1d83   :  { %2262 = vadd.xlane.f32.xlu0 %v2261_v14  ;;  %v6082_v35 = vpop.eup %6081 }
0x1d84   :  { %v2491_v23 = vadd.f32 1.0, %v6082_v35 }
0x1d86   :  { %6083 = vrcp.f32 %v2491_v23 }
0x1d93   :  { %v6084_v45 = vpop.eup %6083 }
0x1d99   :  { %2497 = vrot.lane.b32.xlu0 %v6080_v20, %s6216_s1 }
0x1d9d   :  { %2339 = vrot.lane.b32.xlu0 %v7111_v9, %s6216_s1  ;;  %v2495_v9 = vmul.f32 %v6084_v45, %v7048_v16 }
0x1e0c   :  { %v2263_v40 = vpop.xlane.xlu0 %2262 }
0x1e0d   :  { %6085 = vrcp.f32 %v2263_v40 }
0x1e10   :  { %v2498_v46 = vpop.permute.xlu0 %2497 }
0x1e11   :  { %v2500_v30 = vmul.f32 %v6084_v45, %v2498_v46 }
0x1e13   :  { %2502 = vrot.lane.b32.xlu1 %v2500_v30, %s6217_s2 }
0x1e14   :  { %v2340_v63 = vpop.permute.xlu0 %2339 }
0x1e1a   :  { %v6086_v34 = vpop.eup %6085 }
0x1e1b   :  { %v2265_v57 = vmul.f32 %v6086_v34, %v6078_v11 }
0x1e1d   :  { %5535 = vmatmul.mubr.msk.f32.vlgmr.msra.gmra.mxu0 %vm1402_vm4, %v2265_v57 }
0x1e1e   :  { %5538 = vmatpush3.msra.mxu0 %v7054_v22  ;;  %5553 = vmatprep.mubr.msk.f32.mxu0 %vm6214_vm1, %v6213_v2 }
0x1e1f   :  { %5539 = vmatprep.subr.mxu0 %v6213_v2 }
0x1e20   :  { %5540 = vmatpush3.msra.mxu0 %v7060_v31 }
0x1e21   :  { %5541 = vmatprep.subr.mxu0 %v6213_v2 }
0x1e22   :  { %5542 = vmatpush3.msra.mxu0 %v7069_v19 }
0x1e23   :  { %5543 = vmatprep.subr.mxu0 %v6213_v2 }
0x1e24   :  { %5544 = vmatpush3.msra.mxu0 %v7077_v24 }
0x1e25   :  { %5545 = vmatprep.subr.mxu0 %v6213_v2 }
0x1e26   :  { %5546 = vmatpush3.msra.mxu0 %v7084_v26 }
0x1e27   :  { %5547 = vmatprep.subr.mxu0 %v6213_v2 }
0x1e28   :  { %5548 = vmatpush3.msra.mxu0 %v7091_v33 }
0x1e29   :  { %5549 = vmatprep.subr.mxu0 %v6213_v2 }
0x1e2a   :  { %5550 = vmatpush3.msra.mxu0 %v7098_v28 }
0x1e2b   :  { %5551 = vmatprep.subr.mxu0 %v6213_v2 }
0x1e2c   :  { %5552 = vmatpush3.msra.mxu0 %v7107_v32 }
0x1e2d   :  { %5567 = vmatprep.subr.mxu0 %v6213_v2 }
0x1e85   :  { %v2503_v25 = vpop.permute.xlu1 %2502 }
0x1e86   :  { %v7209_v59 = vadd.f32 %v2503_v25, %v2495_v9 }
0x1e88   :  { %6087 = vtanh.f32 %v7209_v59 }
0x1e95   :  { %v6088_v61 = vpop.eup %6087 }
0x1e96   :  { %2508 = vrot.lane.b32.xlu1 %v6088_v61, %s6216_s1 }
0x1edd   :  { %v2335_v1 = vpop.f32.mrf.mxu0 }
0x1ede   :  { %v2342_v55 = vsel %vm90_vm0, %v2335_v1, %v2340_v63 }
0x1edf   :  { %v5536_v3 = vpop.f32.mrf.mxu0  ;;  %5554 = vmatmul.mubr.msk.f32.vlgmr.msra.gmra.mxu0 %vm1402_vm4, %v2342_v55 }
0x1ee0   :  { %5568 = vmatpush3.xpose.msk.msra.mxu0 %vm90_vm0, %v6915_v43  ;;  %5583 = vmatprep.mubr.msk.f32.mxu0 %vm6214_vm1, %v6213_v2 }
0x1ee1   :  { %5569 = vmatprep.subr.mxu0 %v6213_v2 }
0x1ee4   :  { %5570 = vmatpush3.xpose.msk.msra.mxu0 %vm90_vm0, %v6919_v52 }
0x1ee5   :  { %5571 = vmatprep.subr.mxu0 %v6213_v2 }
0x1ee8   :  { %5572 = vmatpush3.xpose.msk.msra.mxu0 %vm90_vm0, %v6911_v51 }
0x1ee9   :  { %5573 = vmatprep.subr.mxu0 %v6213_v2 }
0x1eec   :  { %5574 = vmatpush3.xpose.msk.msra.mxu0 %vm90_vm0, %v6913_v41 }
0x1eed   :  { %5575 = vmatprep.subr.mxu0 %v6213_v2 }
0x1ef0   :  { %5576 = vmatpush3.xpose.msk.msra.mxu0 %vm90_vm0, %v6907_v49 }
0x1ef1   :  { %5577 = vmatprep.subr.mxu0 %v6213_v2 }
0x1ef4   :  { %5578 = vmatpush3.xpose.msk.msra.mxu0 %vm90_vm0, %v6909_v50 }
0x1ef5   :  { %5579 = vmatprep.subr.mxu0 %v6213_v2 }
0x1ef8   :  { %5580 = vmatpush3.xpose.msk.msra.mxu0 %vm90_vm0, %v6903_v47 }
0x1ef9   :  { %5581 = vmatprep.subr.mxu0 %v6213_v2 }
0x1efc   :  { %5582 = vmatpush3.xpose.msk.msra.mxu0 %vm90_vm0, %v6905_v48 }
0x1efd   :  { %5624 = vmatprep.subr.mxu0 %v6213_v2 }
0x1f08   :  { %v2509_v16 = vpop.permute.xlu1 %2508 }
0x1f09   :  { %v7241_v36 = vmul.f32 %v6084_v45, %v2509_v16 }
0x1f0b   :  { %2513 = vrot.lane.b32.xlu1 %v7241_v36, %s6217_s2 }
0x1f7d   :  { %v2514_v4 = vpop.permute.xlu1 %2513 }
0x1f7e   :  { %5584 = vmatmul.mubr.msk.f32.vlgmr.msra.gmra.mxu0 %vm90_vm0, %v2514_v4 }
0x1f7f   :  { %5625 = vmatpush3.msra.mxu0 %v6853_v42  ;;  %5632 = vmatprep.mubr.msk.f32.mxu0 %vm6214_vm1, %v6213_v2 }
0x1f80   :  { %5626 = vmatprep.subr.mxu0 %v6213_v2 }
0x1f81   :  { %5627 = vmatpush3.msra.mxu0 %v6859_v44 }
0x1f82   :  { %5628 = vmatprep.subr.mxu0 %v6213_v2 }
0x1f83   :  { %5629 = vmatpush3.msra.mxu0 %v6868_v12 }
0x1f84   :  { %5630 = vmatprep.subr.mxu0 %v6213_v2 }
0x1f85   :  { %5631 = vmatpush3.msra.mxu0 %v6878_v29 }
0x1f86   :  { %5633 = vmatmul.mubr.msk.f32.vlgmr.msra.gmra.mxu0 %vm90_vm0, %v2514_v4  ;;  %5654 = vmatprep.subr.mxu0 %v6213_v2 }
0x1f87   :  { %5655 = vmatpush3.msra.mxu0 %v6842_v7  ;;  %5670 = vmatprep.mubr.msk.f32.mxu0 %vm6214_vm1, %v6213_v2 }
0x1f88   :  { %5656 = vmatprep.subr.mxu0 %v6213_v2 }
0x1f89   :  { %5657 = vmatpush3.msra.mxu0 %v6839_v5 }
0x1f8a   :  { %5658 = vmatprep.subr.mxu0 %v6213_v2 }
0x1f8b   :  { %5659 = vmatpush3.msra.mxu0 %v6832_v39 }
0x1f8c   :  { %5660 = vmatprep.subr.mxu0 %v6213_v2 }
0x1f8d   :  { %5661 = vmatpush3.msra.mxu0 %v6829_v15 }
0x1f8e   :  { %5662 = vmatprep.subr.mxu0 %v6213_v2 }
0x1f8f   :  { %5663 = vmatpush3.msra.mxu0 %v6822_v37 }
0x1f90   :  { %5664 = vmatprep.subr.mxu0 %v6213_v2 }
0x1f91   :  { %5665 = vmatpush3.msra.mxu0 %v6819_v27 }
0x1f92   :  { %5666 = vmatprep.subr.mxu0 %v6213_v2 }
0x1f93   :  { %5667 = vmatpush3.msra.mxu0 %v6729_v54 }
0x1f94   :  { %5668 = vmatprep.subr.mxu0 %v6213_v2 }
0x1f95   :  { %5669 = vmatpush3.msra.mxu0 %v6726_v53 }
0x1f96   :  { %5673 = vmatprep.subr.mxu0 %v6213_v2 }
0x1f9f   :  { %v2412_v56 = vpop.f32.mrf.mxu0 }
0x1fa0   :  { %6089 = vtanh.f32 %v2412_v56 }
0x1fa1   :  { %v5555_v6 = vpop.f32.mrf.mxu0 }
0x1fad   :  { %v7275_v8 = vpop.eup %6089 }
0x1fae   :  { %4410 = vst.msk [vmem:[%s8023_s23 + $0x8] sm:$0xff] %vm90_vm0, %v7275_v8 }
0x203e   :  { %v2583_v10 = vpop.f32.mrf.mxu0 }
0x203f   :  { %v2584_v11 = vadd.f32 %v2583_v10, %v7036_v0 }
0x2040   :  { %v5585_v14 = vpop.f32.mrf.mxu0 }
0x2041   :  { %v2587_v20 = vsel %vm1402_vm4, %v2584_v11, -inf }
0x2042   :  { %2588 = vmax.xlane.f32.xlu0 %v2587_v20 }
0x2046   :  { %v2815_v35 = vpop.f32.mrf.mxu0 }
0x2047   :  { %v2819_v23 = vadd.f32 %v2815_v35, %v1686_v21 }
0x2048   :  { %v5634_v40 = vpop.f32.mrf.mxu0 }
0x2049   :  { %6091 = vtanh.f32 %v2819_v23  ;;  %v4767_v46 = vmul.f32 -1.442695, %v2819_v23 }
0x204b   :  { %6093 = vpow2.f32 %v4767_v46 }
0x2056   :  { %v6092_v45 = vpop.eup %6091 }
0x2058   :  { %2829 = vrot.lane.b32.xlu0 %v6092_v45, %s6216_s1  ;;  %v6094_v9 = vpop.eup %6093 }
0x2059   :  { %v2823_v25 = vadd.f32 1.0, %v6094_v9 }
0x20cb   :  { %v2589_v30 = vpop.xlane.xlu0 %2588 }
0x20cc   :  { %v2590_v34 = vsub.f32 %v2584_v11, %v2589_v30  ;;  %v1691_v30 = vadd.f32 %v6934_v58, %v7027_v38 }
0x20ce   :  { %v2591_v57 = vmul.f32 1.442695, %v2590_v34 }
0x20cf   :  { %v2830_v18 = vpop.permute.xlu0 %2829 }
0x20d0   :  { %6095 = vpow2.f32 %v2591_v57 }
0x20d1   :  { %6097 = vrcp.f32 %v2823_v25 }
0x20dd   :  { %v6096_v61 = vpop.eup %6095 }
0x20de   :  { %v2593_v63 = vsel %vm1402_vm4, %v6096_v61, 0.0  ;;  %v6098_v1 = vpop.eup %6097 }
0x20df   :  { %2594 = vadd.xlane.f32.xlu1 %v2593_v63  ;;  %v2832_v55 = vmul.f32 %v6098_v1, %v2830_v18  ;;  %v2827_v16 = vmul.f32 %v6098_v1, %v7209_v59 }
0x20f0   :  { %2834 = vrot.lane.b32.xlu1 %v2832_v55, %s6217_s2 }
0x20f4   :  { %2671 = vrot.lane.b32.xlu1 %v7241_v36, %s6216_s1 }
0x2168   :  { %v2595_v3 = vpop.xlane.xlu1 %2594 }
0x2169   :  { %6099 = vrcp.f32 %v2595_v3 }
0x216c   :  { %v2835_v4 = vpop.permute.xlu1 %2834 }
0x216d   :  { %v7292_v56 = vadd.f32 %v2835_v4, %v2827_v16 }
0x216f   :  { %6101 = vtanh.f32 %v7292_v56 }
0x2170   :  { %v2672_v14 = vpop.permute.xlu1 %2671 }
0x2176   :  { %v6100_v6 = vpop.eup %6099 }
0x2177   :  { %v2597_v10 = vmul.f32 %v6100_v6, %v6096_v61 }
0x2179   :  { %5603 = vmatmul.mubr.msk.f32.vlgmr.msra.gmra.mxu1 %vm1402_vm4, %v2597_v10 }
0x217a   :  { %5606 = vmatpush3.msra.mxu1 %v7054_v22  ;;  %5621 = vmatprep.mubr.msk.f32.mxu1 %vm6214_vm1, %v6213_v2 }
0x217b   :  { %5607 = vmatprep.subr.mxu1 %v6213_v2 }
0x217c   :  { %v6102_v36 = vpop.eup %6101  ;;  %5608 = vmatpush3.msra.mxu1 %v7060_v31 }
0x217d   :  { %2840 = vrot.lane.b32.xlu0 %v6102_v36, %s6216_s1  ;;  %5609 = vmatprep.subr.mxu1 %v6213_v2 }
0x217e   :  { %5610 = vmatpush3.msra.mxu1 %v7069_v19 }
0x217f   :  { %5611 = vmatprep.subr.mxu1 %v6213_v2 }
0x2180   :  { %5612 = vmatpush3.msra.mxu1 %v7077_v24 }
0x2181   :  { %5613 = vmatprep.subr.mxu1 %v6213_v2 }
0x2182   :  { %5614 = vmatpush3.msra.mxu1 %v7084_v26 }
0x2183   :  { %5615 = vmatprep.subr.mxu1 %v6213_v2 }
0x2184   :  { %5616 = vmatpush3.msra.mxu1 %v7091_v33 }
0x2185   :  { %5617 = vmatprep.subr.mxu1 %v6213_v2 }
0x2186   :  { %5618 = vmatpush3.msra.mxu1 %v7098_v28 }
0x2187   :  { %5619 = vmatprep.subr.mxu1 %v6213_v2 }
0x2188   :  { %5620 = vmatpush3.msra.mxu1 %v7107_v32 }
0x2189   :  { %5635 = vmatprep.subr.mxu1 %v6213_v2 }
0x21ef   :  { %v2841_v59 = vpop.permute.xlu0 %2840 }
0x21f0   :  { %v7315_v11 = vmul.f32 %v6098_v1, %v2841_v59 }
0x21f2   :  { %2845 = vrot.lane.b32.xlu0 %v7315_v11, %s6217_s2 }
0x2239   :  { %v2667_v20 = vpop.f32.mrf.mxu1 }
0x223a   :  { %v2674_v21 = vsel %vm90_vm0, %v2667_v20, %v2672_v14 }
0x223b   :  { %v5604_v35 = vpop.f32.mrf.mxu1  ;;  %5622 = vmatmul.mubr.msk.f32.vlgmr.msra.gmra.mxu1 %vm1402_vm4, %v2674_v21 }
0x223c   :  { %5636 = vmatpush3.xpose.msk.msra.mxu1 %vm90_vm0, %v6915_v43  ;;  %5651 = vmatprep.mubr.msk.f32.mxu1 %vm6214_vm1, %v6213_v2 }
0x223d   :  { %5637 = vmatprep.subr.mxu1 %v6213_v2 }
0x2240   :  { %5638 = vmatpush3.xpose.msk.msra.mxu1 %vm90_vm0, %v6919_v52 }
0x2241   :  { %5639 = vmatprep.subr.mxu1 %v6213_v2 }
0x2244   :  { %5640 = vmatpush3.xpose.msk.msra.mxu1 %vm90_vm0, %v6911_v51 }
0x2245   :  { %5641 = vmatprep.subr.mxu1 %v6213_v2 }
0x2248   :  { %5642 = vmatpush3.xpose.msk.msra.mxu1 %vm90_vm0, %v6913_v41 }
0x2249   :  { %5643 = vmatprep.subr.mxu1 %v6213_v2 }
0x224c   :  { %5644 = vmatpush3.xpose.msk.msra.mxu1 %vm90_vm0, %v6907_v49 }
0x224d   :  { %5645 = vmatprep.subr.mxu1 %v6213_v2 }
0x2250   :  { %5646 = vmatpush3.xpose.msk.msra.mxu1 %vm90_vm0, %v6909_v50 }
0x2251   :  { %5647 = vmatprep.subr.mxu1 %v6213_v2 }
0x2254   :  { %5648 = vmatpush3.xpose.msk.msra.mxu1 %vm90_vm0, %v6903_v47 }
0x2255   :  { %5649 = vmatprep.subr.mxu1 %v6213_v2 }
0x2258   :  { %5650 = vmatpush3.xpose.msk.msra.mxu1 %vm90_vm0, %v6905_v48 }
0x2259   :  { %5692 = vmatprep.subr.mxu1 %v6213_v2 }
0x2264   :  { %v2846_v23 = vpop.permute.xlu0 %2845 }
0x2265   :  { %5652 = vmatmul.mubr.msk.f32.vlgmr.msra.gmra.mxu1 %vm90_vm0, %v2846_v23 }
0x2266   :  { %5693 = vmatpush3.msra.mxu1 %v6853_v42  ;;  %5700 = vmatprep.mubr.msk.f32.mxu1 %vm6214_vm1, %v6213_v2 }
0x2267   :  { %5694 = vmatprep.subr.mxu1 %v6213_v2 }
0x2268   :  { %5695 = vmatpush3.msra.mxu1 %v6859_v44 }
0x2269   :  { %5696 = vmatprep.subr.mxu1 %v6213_v2 }
0x226a   :  { %5697 = vmatpush3.msra.mxu1 %v6868_v12 }
0x226b   :  { %5698 = vmatprep.subr.mxu1 %v6213_v2 }
0x226c   :  { %5699 = vmatpush3.msra.mxu1 %v6878_v29 }
0x226d   :  { %5701 = vmatmul.mubr.msk.f32.vlgmr.msra.gmra.mxu1 %vm90_vm0, %v2846_v23  ;;  %5722 = vmatprep.subr.mxu1 %v6213_v2 }
0x226e   :  { %5723 = vmatpush3.msra.mxu1 %v6842_v7  ;;  %5738 = vmatprep.mubr.msk.f32.mxu1 %vm6214_vm1, %v6213_v2 }
0x226f   :  { %5724 = vmatprep.subr.mxu1 %v6213_v2 }
0x2270   :  { %5725 = vmatpush3.msra.mxu1 %v6839_v5 }
0x2271   :  { %5726 = vmatprep.subr.mxu1 %v6213_v2 }
0x2272   :  { %5727 = vmatpush3.msra.mxu1 %v6832_v39 }
0x2273   :  { %5728 = vmatprep.subr.mxu1 %v6213_v2 }
0x2274   :  { %5729 = vmatpush3.msra.mxu1 %v6829_v15 }
0x2275   :  { %5730 = vmatprep.subr.mxu1 %v6213_v2 }
0x2276   :  { %5731 = vmatpush3.msra.mxu1 %v6822_v37 }
0x2277   :  { %5732 = vmatprep.subr.mxu1 %v6213_v2 }
0x2278   :  { %5733 = vmatpush3.msra.mxu1 %v6819_v27 }
0x2279   :  { %5734 = vmatprep.subr.mxu1 %v6213_v2 }
0x227a   :  { %5735 = vmatpush3.msra.mxu1 %v6729_v54 }
0x227b   :  { %5736 = vmatprep.subr.mxu1 %v6213_v2 }
0x227c   :  { %5737 = vmatpush3.msra.mxu1 %v6726_v53 }
0x227d   :  { %5741 = vmatprep.subr.mxu1 %v6213_v2 }
0x22fb   :  { %v2744_v42 = vpop.f32.mrf.mxu1 }
0x22fc   :  { %6103 = vtanh.f32 %v2744_v42 }
0x22fd   :  { %v5623_v44 = vpop.f32.mrf.mxu1 }
0x2309   :  { %v7377_v12 = vpop.eup %6103 }
0x230a   :  { %4411 = vst.msk [vmem:[%s8023_s23 + $0x10] sm:$0xff] %vm90_vm0, %v7377_v12 }
0x2325   :  { %v2915_v29 = vpop.f32.mrf.mxu1 }
0x2326   :  { %v2916_v40 = vadd.f32 %v2915_v29, %v7036_v0 }
0x2327   :  { %v5653_v45 = vpop.f32.mrf.mxu1 }
0x2328   :  { %v2919_v46 = vsel %vm1402_vm4, %v2916_v40, -inf  ;;  %v7453_v45 = vld [vmem:[%s8017_s15 + $0x18] sm:$0xff] }
0x2329   :  { %2920 = vmax.xlane.f32.xlu1 %v2919_v46  ;;  %v7462_v46 = vld [vmem:[%s8017_s15 + $0x10] sm:$0xff] }
0x232d   :  { %v3147_v34 = vpop.f32.mrf.mxu1 }
0x232e   :  { %v3151_v57 = vadd.f32 %v3147_v34, %v1691_v30  ;;  %v7469_v30 = vld [vmem:[%s8017_s15 + $0x8] sm:$0xff]  ;;  %v7476_v34 = vld [vmem:[%s8017_s15] sm:$0xff] }
0x232f   :  { %v5702_v9 = vpop.f32.mrf.mxu1 }
0x2330   :  { %v4780_v3 = vmul.f32 -1.442695, %v3151_v57 }
0x23b2   :  { %v2921_v25 = vpop.xlane.xlu1 %2920 }
0x23b3   :  { %v2922_v61 = vsub.f32 %v2916_v40, %v2921_v25 }
0x23b5   :  { %v2923_v63 = vmul.f32 1.442695, %v2922_v61 }
0x23b7   :  { %6105 = vpow2.f32 %v2923_v63 }
0x23b8   :  { %6107 = vtanh.f32 %v3151_v57 }
0x23b9   :  { %6109 = vpow2.f32 %v4780_v3 }
0x23c4   :  { %v6106_v18 = vpop.eup %6105 }
0x23c5   :  { %v2925_v1 = vsel %vm1402_vm4, %v6106_v18, 0.0  ;;  %v6108_v55 = vpop.eup %6107 }
0x23c6   :  { %2926 = vadd.xlane.f32.xlu0 %v2925_v1  ;;  %v6110_v58 = vpop.eup %6109 }
0x23c7   :  { %v3155_v38 = vadd.f32 1.0, %v6110_v58 }
0x23c9   :  { %6111 = vrcp.f32 %v3155_v38 }
0x23d6   :  { %v6112_v4 = vpop.eup %6111 }
0x23dc   :  { %3161 = vrot.lane.b32.xlu0 %v6108_v55, %s6216_s1  ;;  %v7511_v55 = vld [vmem:[%s8020_s16] ss:$0 sm:$0xff] }
0x23dd   :  { %v1696_v3 = vadd.f32 %v7511_v55, %v7025_v17 }
0x23e0   :  { %3003 = vrot.lane.b32.xlu0 %v7315_v11, %s6216_s1  ;;  %v3159_v11 = vmul.f32 %v6112_v4, %v7292_v56 }
0x244f   :  { %v2927_v16 = vpop.xlane.xlu0 %2926 }
0x2450   :  { %6113 = vrcp.f32 %v2927_v16 }
0x2453   :  { %v3162_v6 = vpop.permute.xlu0 %3161 }
0x2454   :  { %v3164_v10 = vmul.f32 %v6112_v4, %v3162_v6 }
0x2456   :  { %3166 = vrot.lane.b32.xlu1 %v3164_v10, %s6217_s2 }
0x2457   :  { %v3004_v35 = vpop.permute.xlu0 %3003 }
0x245d   :  { %v6114_v36 = vpop.eup %6113 }
0x245e   :  { %v2929_v59 = vmul.f32 %v6114_v36, %v6106_v18 }
0x2460   :  { %5671 = vmatmul.mubr.msk.f32.vlgmr.msra.gmra.mxu0 %vm1402_vm4, %v2929_v59 }
0x2461   :  { %5674 = vmatpush3.msra.mxu0 %v7054_v22  ;;  %5689 = vmatprep.mubr.msk.f32.mxu0 %vm6214_vm1, %v6213_v2 }
0x2462   :  { %5675 = vmatprep.subr.mxu0 %v6213_v2 }
0x2463   :  { %5676 = vmatpush3.msra.mxu0 %v7060_v31 }
0x2464   :  { %5677 = vmatprep.subr.mxu0 %v6213_v2 }
0x2465   :  { %5678 = vmatpush3.msra.mxu0 %v7069_v19 }
0x2466   :  { %5679 = vmatprep.subr.mxu0 %v6213_v2 }
0x2467   :  { %5680 = vmatpush3.msra.mxu0 %v7077_v24 }
0x2468   :  { %5681 = vmatprep.subr.mxu0 %v6213_v2 }
0x2469   :  { %5682 = vmatpush3.msra.mxu0 %v7084_v26 }
0x246a   :  { %5683 = vmatprep.subr.mxu0 %v6213_v2 }
0x246b   :  { %5684 = vmatpush3.msra.mxu0 %v7091_v33 }
0x246c   :  { %5685 = vmatprep.subr.mxu0 %v6213_v2 }
0x246d   :  { %5686 = vmatpush3.msra.mxu0 %v7098_v28 }
0x246e   :  { %5687 = vmatprep.subr.mxu0 %v6213_v2 }
0x246f   :  { %5688 = vmatpush3.msra.mxu0 %v7107_v32 }
0x2470   :  { %5703 = vmatprep.subr.mxu0 %v6213_v2 }
0x24c8   :  { %v3167_v14 = vpop.permute.xlu1 %3166 }
0x24c9   :  { %v7413_v20 = vadd.f32 %v3167_v14, %v3159_v11 }
0x24cb   :  { %6115 = vtanh.f32 %v7413_v20 }
0x24d8   :  { %v6116_v21 = vpop.eup %6115 }
0x24d9   :  { %3172 = vrot.lane.b32.xlu1 %v6116_v21, %s6216_s1 }
0x2520   :  { %v2999_v23 = vpop.f32.mrf.mxu0 }
0x2521   :  { %v3006_v42 = vsel %vm90_vm0, %v2999_v23, %v3004_v35 }
0x2522   :  { %v5672_v44 = vpop.f32.mrf.mxu0  ;;  %5690 = vmatmul.mubr.msk.f32.vlgmr.msra.gmra.mxu0 %vm1402_vm4, %v3006_v42 }
0x2523   :  { %5704 = vmatpush3.xpose.msk.msra.mxu0 %vm90_vm0, %v6915_v43  ;;  %5719 = vmatprep.mubr.msk.f32.mxu0 %vm6214_vm1, %v6213_v2 }
0x2524   :  { %5705 = vmatprep.subr.mxu0 %v6213_v2 }
0x2527   :  { %5706 = vmatpush3.xpose.msk.msra.mxu0 %vm90_vm0, %v6919_v52 }
0x2528   :  { %5707 = vmatprep.subr.mxu0 %v6213_v2 }
0x252b   :  { %5708 = vmatpush3.xpose.msk.msra.mxu0 %vm90_vm0, %v6911_v51 }
0x252c   :  { %5709 = vmatprep.subr.mxu0 %v6213_v2 }
0x252f   :  { %5710 = vmatpush3.xpose.msk.msra.mxu0 %vm90_vm0, %v6913_v41 }
0x2530   :  { %5711 = vmatprep.subr.mxu0 %v6213_v2 }
0x2533   :  { %5712 = vmatpush3.xpose.msk.msra.mxu0 %vm90_vm0, %v6907_v49 }
0x2534   :  { %5713 = vmatprep.subr.mxu0 %v6213_v2 }
0x2537   :  { %5714 = vmatpush3.xpose.msk.msra.mxu0 %vm90_vm0, %v6909_v50 }
0x2538   :  { %5715 = vmatprep.subr.mxu0 %v6213_v2 }
0x253b   :  { %5716 = vmatpush3.xpose.msk.msra.mxu0 %vm90_vm0, %v6903_v47 }
0x253c   :  { %5717 = vmatprep.subr.mxu0 %v6213_v2 }
0x253f   :  { %5718 = vmatpush3.xpose.msk.msra.mxu0 %vm90_vm0, %v6905_v48 }
0x2540   :  { %5760 = vmatprep.subr.mxu0 %v6213_v2 }
0x254b   :  { %v3173_v56 = vpop.permute.xlu1 %3172 }
0x254c   :  { %v7445_v29 = vmul.f32 %v6112_v4, %v3173_v56 }
0x254e   :  { %3177 = vrot.lane.b32.xlu1 %v7445_v29, %s6217_s2 }
0x25c0   :  { %v3178_v40 = vpop.permute.xlu1 %3177 }
0x25c1   :  { %5720 = vmatmul.mubr.msk.f32.vlgmr.msra.gmra.mxu0 %vm90_vm0, %v3178_v40 }
0x25c2   :  { %5761 = vmatpush3.msra.mxu0 %v7453_v45  ;;  %5768 = vmatprep.mubr.msk.f32.mxu0 %vm6214_vm1, %v6213_v2 }
0x25c3   :  { %5762 = vmatprep.subr.mxu0 %v6213_v2 }
0x25c4   :  { %5763 = vmatpush3.msra.mxu0 %v7462_v46 }
0x25c5   :  { %5764 = vmatprep.subr.mxu0 %v6213_v2 }
0x25c6   :  { %5765 = vmatpush3.msra.mxu0 %v7469_v30 }
0x25c7   :  { %5766 = vmatprep.subr.mxu0 %v6213_v2 }
0x25c8   :  { %5767 = vmatpush3.msra.mxu0 %v7476_v34 }
0x25c9   :  { %5769 = vmatmul.mubr.msk.f32.vlgmr.msra.gmra.mxu0 %vm90_vm0, %v3178_v40  ;;  %5790 = vmatprep.subr.mxu0 %v6213_v2 }
0x25ca   :  { %5791 = vmatpush3.msra.mxu0 %v6842_v7  ;;  %5806 = vmatprep.mubr.msk.f32.mxu0 %vm6214_vm1, %v6213_v2 }
0x25cb   :  { %5792 = vmatprep.subr.mxu0 %v6213_v2 }
0x25cc   :  { %5793 = vmatpush3.msra.mxu0 %v6839_v5 }
0x25cd   :  { %5794 = vmatprep.subr.mxu0 %v6213_v2 }
0x25ce   :  { %5795 = vmatpush3.msra.mxu0 %v6832_v39 }
0x25cf   :  { %5796 = vmatprep.subr.mxu0 %v6213_v2 }
0x25d0   :  { %5797 = vmatpush3.msra.mxu0 %v6829_v15 }
0x25d1   :  { %5798 = vmatprep.subr.mxu0 %v6213_v2 }
0x25d2   :  { %5799 = vmatpush3.msra.mxu0 %v6822_v37 }
0x25d3   :  { %5800 = vmatprep.subr.mxu0 %v6213_v2 }
0x25d4   :  { %5801 = vmatpush3.msra.mxu0 %v6819_v27 }
0x25d5   :  { %5802 = vmatprep.subr.mxu0 %v6213_v2 }
0x25d6   :  { %5803 = vmatpush3.msra.mxu0 %v6729_v54 }
0x25d7   :  { %5804 = vmatprep.subr.mxu0 %v6213_v2 }
0x25d8   :  { %5805 = vmatpush3.msra.mxu0 %v6726_v53 }
0x25d9   :  { %5809 = vmatprep.subr.mxu0 %v6213_v2 }
0x25e2   :  { %v3076_v57 = vpop.f32.mrf.mxu0 }
0x25e3   :  { %6117 = vtanh.f32 %v3076_v57 }
0x25e4   :  { %v5691_v9 = vpop.f32.mrf.mxu0 }
0x25f0   :  { %v7499_v25 = vpop.eup %6117 }
0x25f1   :  { %4412 = vst.msk [vmem:[%s8023_s23 + $0x18] sm:$0xff] %vm90_vm0, %v7499_v25 }
0x2681   :  { %v3247_v61 = vpop.f32.mrf.mxu0 }
0x2682   :  { %v3248_v63 = vadd.f32 %v3247_v61, %v7036_v0 }
0x2683   :  { %v5721_v18 = vpop.f32.mrf.mxu0 }
0x2684   :  { %v3251_v1 = vsel %vm1402_vm4, %v3248_v63, -inf  ;;  %v7616_v18 = vld [vmem:[%s8021_s17] sm:$0xff] }
0x2685   :  { %3252 = vmax.xlane.f32.xlu0 %v3251_v1 }
0x2689   :  { %v3479_v58 = vpop.f32.mrf.mxu0 }
0x268a   :  { %v3483_v38 = vadd.f32 %v3479_v58, %v1696_v3 }
0x268b   :  { %v5770_v16 = vpop.f32.mrf.mxu0 }
0x268c   :  { %6119 = vtanh.f32 %v3483_v38  ;;  %v4793_v0 = vmul.f32 -1.442695, %v3483_v38 }
0x268e   :  { %6121 = vpow2.f32 %v4793_v0 }
0x2699   :  { %v6120_v4 = vpop.eup %6119 }
0x269b   :  { %3493 = vrot.lane.b32.xlu0 %v6120_v4, %s6216_s1  ;;  %v6122_v59 = vpop.eup %6121 }
0x269c   :  { %v3487_v11 = vadd.f32 1.0, %v6122_v59  ;;  %v1701_v59 = vadd.f32 %v7511_v55, %v7031_v62 }
0x270e   :  { %v3253_v6 = vpop.xlane.xlu0 %3252 }
0x270f   :  { %v3254_v10 = vsub.f32 %v3248_v63, %v3253_v6 }
0x2711   :  { %v3255_v36 = vmul.f32 1.442695, %v3254_v10 }
0x2712   :  { %v3494_v17 = vpop.permute.xlu0 %3493 }
0x2713   :  { %6123 = vpow2.f32 %v3255_v36 }
0x2714   :  { %6125 = vrcp.f32 %v3487_v11 }
0x2720   :  { %v6124_v14 = vpop.eup %6123 }
0x2721   :  { %v3257_v21 = vsel %vm1402_vm4, %v6124_v14, 0.0  ;;  %v6126_v35 = vpop.eup %6125 }
0x2722   :  { %3258 = vadd.xlane.f32.xlu1 %v3257_v21  ;;  %v3496_v23 = vmul.f32 %v6126_v35, %v3494_v17  ;;  %v3491_v44 = vmul.f32 %v6126_v35, %v7413_v20 }
0x2733   :  { %3498 = vrot.lane.b32.xlu1 %v3496_v23, %s6217_s2 }
0x2737   :  { %3335 = vrot.lane.b32.xlu1 %v7445_v29, %s6216_s1 }
0x27ab   :  { %v3259_v42 = vpop.xlane.xlu1 %3258 }
0x27ac   :  { %6127 = vrcp.f32 %v3259_v42 }
0x27af   :  { %v3499_v56 = vpop.permute.xlu1 %3498 }
0x27b0   :  { %v7521_v40 = vadd.f32 %v3499_v56, %v3491_v44 }
0x27b2   :  { %6129 = vtanh.f32 %v7521_v40 }
0x27b9   :  { %v6128_v57 = vpop.eup %6127 }
0x27ba   :  { %v3261_v9 = vmul.f32 %v6128_v57, %v6124_v14 }
0x27bc   :  { %5739 = vmatmul.mubr.msk.f32.vlgmr.msra.gmra.mxu1 %vm1402_vm4, %v3261_v9  ;;  %v7631_v9 = vld [vmem:[%s8022_s18 + $0x38] sm:$0xff] }
0x27bd   :  { %5742 = vmatpush3.msra.mxu1 %v7054_v22  ;;  %5757 = vmatprep.mubr.msk.f32.mxu1 %vm6214_vm1, %v6213_v2 }
0x27be   :  { %5743 = vmatprep.subr.mxu1 %v6213_v2 }
0x27bf   :  { %v6130_v29 = vpop.eup %6129  ;;  %5744 = vmatpush3.msra.mxu1 %v7060_v31 }
0x27c0   :  { %3504 = vrot.lane.b32.xlu0 %v6130_v29, %s6216_s1  ;;  %5745 = vmatprep.subr.mxu1 %v6213_v2  ;;  %v7640_v29 = vld [vmem:[%s8022_s18 + $0x30] sm:$0xff] }
0x27c1   :  { %5746 = vmatpush3.msra.mxu1 %v7069_v19  ;;  %v3336_v19 = vpop.permute.xlu1 %3335 }
0x27c2   :  { %5747 = vmatprep.subr.mxu1 %v6213_v2 }
0x27c3   :  { %5748 = vmatpush3.msra.mxu1 %v7077_v24 }
0x27c4   :  { %5749 = vmatprep.subr.mxu1 %v6213_v2 }
0x27c5   :  { %5750 = vmatpush3.msra.mxu1 %v7084_v26 }
0x27c6   :  { %5751 = vmatprep.subr.mxu1 %v6213_v2 }
0x27c7   :  { %5752 = vmatpush3.msra.mxu1 %v7091_v33 }
0x27c8   :  { %5753 = vmatprep.subr.mxu1 %v6213_v2 }
0x27c9   :  { %5754 = vmatpush3.msra.mxu1 %v7098_v28 }
0x27ca   :  { %5755 = vmatprep.subr.mxu1 %v6213_v2 }
0x27cb   :  { %5756 = vmatpush3.msra.mxu1 %v7107_v32 }
0x27cc   :  { %5771 = vmatprep.subr.mxu1 %v6213_v2 }
0x2832   :  { %v3505_v22 = vpop.permute.xlu0 %3504 }
0x2833   :  { %v7544_v31 = vmul.f32 %v6126_v35, %v3505_v22  ;;  %v7647_v22 = vld [vmem:[%s8022_s18 + $0x28] sm:$0xff] }
0x2835   :  { %3509 = vrot.lane.b32.xlu0 %v7544_v31, %s6217_s2 }
0x287c   :  { %v3331_v24 = vpop.f32.mrf.mxu1 }
0x287d   :  { %v3338_v26 = vsel %vm90_vm0, %v3331_v24, %v3336_v19  ;;  %v7661_v19 = vld [vmem:[%s8022_s18 + $0x18] sm:$0xff]  ;;  %v7668_v24 = vld [vmem:[%s8022_s18 + $0x10] sm:$0xff] }
0x287e   :  { %v5740_v33 = vpop.f32.mrf.mxu1  ;;  %5758 = vmatmul.mubr.msk.f32.vlgmr.msra.gmra.mxu1 %vm1402_vm4, %v3338_v26  ;;  %v7675_v26 = vld [vmem:[%s8022_s18 + $0x8] sm:$0xff] }
0x287f   :  { %5772 = vmatpush3.xpose.msk.msra.mxu1 %vm90_vm0, %v6915_v43  ;;  %5787 = vmatprep.mubr.msk.f32.mxu1 %vm6214_vm1, %v6213_v2  ;;  %v7682_v33 = vld [vmem:[%s8022_s18] sm:$0xff] }
0x2880   :  { %5773 = vmatprep.subr.mxu1 %v6213_v2 }
0x2883   :  { %5774 = vmatpush3.xpose.msk.msra.mxu1 %vm90_vm0, %v6919_v52 }
0x2884   :  { %5775 = vmatprep.subr.mxu1 %v6213_v2 }
0x2887   :  { %5776 = vmatpush3.xpose.msk.msra.mxu1 %vm90_vm0, %v6911_v51 }
0x2888   :  { %5777 = vmatprep.subr.mxu1 %v6213_v2 }
0x288b   :  { %5778 = vmatpush3.xpose.msk.msra.mxu1 %vm90_vm0, %v6913_v41 }
0x288c   :  { %5779 = vmatprep.subr.mxu1 %v6213_v2 }
0x288f   :  { %5780 = vmatpush3.xpose.msk.msra.mxu1 %vm90_vm0, %v6907_v49 }
0x2890   :  { %5781 = vmatprep.subr.mxu1 %v6213_v2 }
0x2893   :  { %5782 = vmatpush3.xpose.msk.msra.mxu1 %vm90_vm0, %v6909_v50 }
0x2894   :  { %5783 = vmatprep.subr.mxu1 %v6213_v2 }
0x2897   :  { %5784 = vmatpush3.xpose.msk.msra.mxu1 %vm90_vm0, %v6903_v47 }
0x2898   :  { %5785 = vmatprep.subr.mxu1 %v6213_v2 }
0x289b   :  { %5786 = vmatpush3.xpose.msk.msra.mxu1 %vm90_vm0, %v6905_v48 }
0x289c   :  { %5828 = vmatprep.subr.mxu1 %v6213_v2 }
0x28a7   :  { %v3510_v28 = vpop.permute.xlu0 %3509 }
0x28a8   :  { %5788 = vmatmul.mubr.msk.f32.vlgmr.msra.gmra.mxu1 %vm90_vm0, %v3510_v28 }
0x28a9   :  { %5829 = vmatpush3.msra.mxu1 %v7453_v45  ;;  %5836 = vmatprep.mubr.msk.f32.mxu1 %vm6214_vm1, %v6213_v2 }
0x28aa   :  { %5830 = vmatprep.subr.mxu1 %v6213_v2 }
0x28ab   :  { %5831 = vmatpush3.msra.mxu1 %v7462_v46 }
0x28ac   :  { %5832 = vmatprep.subr.mxu1 %v6213_v2 }
0x28ad   :  { %5833 = vmatpush3.msra.mxu1 %v7469_v30 }
0x28ae   :  { %5834 = vmatprep.subr.mxu1 %v6213_v2 }
0x28af   :  { %5835 = vmatpush3.msra.mxu1 %v7476_v34 }
0x28b0   :  { %5837 = vmatmul.mubr.msk.f32.vlgmr.msra.gmra.mxu1 %vm90_vm0, %v3510_v28  ;;  %5858 = vmatprep.subr.mxu1 %v6213_v2 }
0x28b1   :  { %5859 = vmatpush3.msra.mxu1 %v6842_v7  ;;  %5874 = vmatprep.mubr.msk.f32.mxu1 %vm6214_vm1, %v6213_v2 }
0x28b2   :  { %5860 = vmatprep.subr.mxu1 %v6213_v2 }
0x28b3   :  { %5861 = vmatpush3.msra.mxu1 %v6839_v5 }
0x28b4   :  { %5862 = vmatprep.subr.mxu1 %v6213_v2 }
0x28b5   :  { %5863 = vmatpush3.msra.mxu1 %v6832_v39 }
0x28b6   :  { %5864 = vmatprep.subr.mxu1 %v6213_v2 }
0x28b7   :  { %5865 = vmatpush3.msra.mxu1 %v6829_v15 }
0x28b8   :  { %5866 = vmatprep.subr.mxu1 %v6213_v2 }
0x28b9   :  { %5867 = vmatpush3.msra.mxu1 %v6822_v37 }
0x28ba   :  { %5868 = vmatprep.subr.mxu1 %v6213_v2 }
0x28bb   :  { %5869 = vmatpush3.msra.mxu1 %v6819_v27 }
0x28bc   :  { %5870 = vmatprep.subr.mxu1 %v6213_v2 }
0x28bd   :  { %5871 = vmatpush3.msra.mxu1 %v6729_v54 }
0x28be   :  { %5872 = vmatprep.subr.mxu1 %v6213_v2 }
0x28bf   :  { %5873 = vmatpush3.msra.mxu1 %v6726_v53 }
0x28c0   :  { %5877 = vmatprep.subr.mxu1 %v6213_v2 }
0x293e   :  { %v3408_v32 = vpop.f32.mrf.mxu1 }
0x293f   :  { %6131 = vtanh.f32 %v3408_v32 }
0x2940   :  { %v5759_v20 = vpop.f32.mrf.mxu1 }
0x294c   :  { %v7606_v61 = vpop.eup %6131 }
0x294d   :  { %4413 = vst.msk [vmem:[%s8023_s23 + $0x20] sm:$0xff] %vm90_vm0, %v7606_v61 }
0x2968   :  { %v3579_v63 = vpop.f32.mrf.mxu1 }
0x2969   :  { %v3580_v1 = vadd.f32 %v7616_v18, %v3579_v63 }
0x296a   :  { %v5789_v3 = vpop.f32.mrf.mxu1 }
0x296b   :  { %v3583_v58 = vsel %vm1402_vm4, %v3580_v1, -inf }
0x296c   :  { %3584 = vmax.xlane.f32.xlu1 %v3583_v58 }
0x2970   :  { %v3811_v38 = vpop.f32.mrf.mxu1 }
0x2971   :  { %v3815_v11 = vadd.f32 %v3811_v38, %v1701_v59 }
0x2972   :  { %v5838_v16 = vpop.f32.mrf.mxu1 }
0x2973   :  { %v4806_v21 = vmul.f32 -1.442695, %v3815_v11 }
0x29f5   :  { %v3585_v4 = vpop.xlane.xlu1 %3584 }
0x29f6   :  { %v3586_v0 = vsub.f32 %v3580_v1, %v3585_v4 }
0x29f8   :  { %v3587_v6 = vmul.f32 1.442695, %v3586_v0 }
0x29fa   :  { %6133 = vpow2.f32 %v3587_v6 }
0x29fb   :  { %6135 = vtanh.f32 %v3815_v11 }
0x29fc   :  { %6137 = vpow2.f32 %v4806_v21 }
0x2a07   :  { %v6134_v10 = vpop.eup %6133 }
0x2a08   :  { %v3589_v36 = vsel %vm1402_vm4, %v6134_v10, 0.0  ;;  %v6136_v14 = vpop.eup %6135 }
0x2a09   :  { %3590 = vadd.xlane.f32.xlu0 %v3589_v36  ;;  %v6138_v17 = vpop.eup %6137 }
0x2a0a   :  { %v3819_v35 = vadd.f32 1.0, %v6138_v17 }
0x2a0c   :  { %6139 = vrcp.f32 %v3819_v35 }
0x2a19   :  { %v6140_v42 = vpop.eup %6139 }
0x2a1a   :  { %v3823_v28 = vmul.f32 %v6140_v42, %v7521_v40 }
0x2a1f   :  { %3825 = vrot.lane.b32.xlu0 %v6136_v14, %s6216_s1 }
0x2a23   :  { %3667 = vrot.lane.b32.xlu0 %v7544_v31, %s6216_s1  ;;  %v7654_v31 = vld [vmem:[%s8022_s18 + $0x20] sm:$0xff] }
0x2a92   :  { %v3591_v23 = vpop.xlane.xlu0 %3590 }
0x2a93   :  { %6141 = vrcp.f32 %v3591_v23 }
0x2a96   :  { %v3826_v44 = vpop.permute.xlu0 %3825 }
0x2a97   :  { %v3828_v56 = vmul.f32 %v6140_v42, %v3826_v44 }
0x2a99   :  { %3830 = vrot.lane.b32.xlu1 %v3828_v56, %s6217_s2 }
0x2a9a   :  { %v3668_v1 = vpop.permute.xlu0 %3667 }
0x2aa0   :  { %v6142_v62 = vpop.eup %6141 }
0x2aa1   :  { %v3593_v57 = vmul.f32 %v6142_v62, %v6134_v10 }
0x2aa3   :  { %5807 = vmatmul.mubr.msk.f32.vlgmr.msra.gmra.mxu0 %vm1402_vm4, %v3593_v57 }
0x2aa4   :  { %5810 = vmatpush3.msra.mxu0 %v7631_v9  ;;  %5825 = vmatprep.mubr.msk.f32.mxu0 %vm6214_vm1, %v6213_v2 }
0x2aa5   :  { %5811 = vmatprep.subr.mxu0 %v6213_v2 }
0x2aa6   :  { %5812 = vmatpush3.msra.mxu0 %v7640_v29 }
0x2aa7   :  { %5813 = vmatprep.subr.mxu0 %v6213_v2 }
0x2aa8   :  { %5814 = vmatpush3.msra.mxu0 %v7647_v22 }
0x2aa9   :  { %5815 = vmatprep.subr.mxu0 %v6213_v2 }
0x2aaa   :  { %5816 = vmatpush3.msra.mxu0 %v7654_v31 }
0x2aab   :  { %5817 = vmatprep.subr.mxu0 %v6213_v2 }
0x2aac   :  { %5818 = vmatpush3.msra.mxu0 %v7661_v19 }
0x2aad   :  { %5819 = vmatprep.subr.mxu0 %v6213_v2 }
0x2aae   :  { %5820 = vmatpush3.msra.mxu0 %v7668_v24 }
0x2aaf   :  { %5821 = vmatprep.subr.mxu0 %v6213_v2 }
0x2ab0   :  { %5822 = vmatpush3.msra.mxu0 %v7675_v26 }
0x2ab1   :  { %5823 = vmatprep.subr.mxu0 %v6213_v2 }
0x2ab2   :  { %5824 = vmatpush3.msra.mxu0 %v7682_v33 }
0x2ab3   :  { %5839 = vmatprep.subr.mxu0 %v6213_v2 }
0x2b0b   :  { %v3831_v32 = vpop.permute.xlu1 %3830 }
0x2b0c   :  { %v7687_v20 = vadd.f32 %v3831_v32, %v3823_v28 }
0x2b0e   :  { %6143 = vtanh.f32 %v7687_v20 }
0x2b1b   :  { %v6144_v63 = vpop.eup %6143 }
0x2b1c   :  { %3836 = vrot.lane.b32.xlu1 %v6144_v63, %s6216_s1 }
0x2b63   :  { %v3663_v3 = vpop.f32.mrf.mxu0 }
0x2b64   :  { %v3670_v58 = vsel %vm90_vm0, %v3663_v3, %v3668_v1 }
0x2b65   :  { %v5808_v38 = vpop.f32.mrf.mxu0  ;;  %5826 = vmatmul.mubr.msk.f32.vlgmr.msra.gmra.mxu0 %vm1402_vm4, %v3670_v58 }
0x2b66   :  { %5840 = vmatpush3.xpose.msk.msra.mxu0 %vm90_vm0, %v6915_v43  ;;  %5855 = vmatprep.mubr.msk.f32.mxu0 %vm6214_vm1, %v6213_v2 }
0x2b67   :  { %5841 = vmatprep.subr.mxu0 %v6213_v2 }
0x2b6a   :  { %5842 = vmatpush3.xpose.msk.msra.mxu0 %vm90_vm0, %v6919_v52 }
0x2b6b   :  { %5843 = vmatprep.subr.mxu0 %v6213_v2 }
0x2b6e   :  { %5844 = vmatpush3.xpose.msk.msra.mxu0 %vm90_vm0, %v6911_v51 }
0x2b6f   :  { %5845 = vmatprep.subr.mxu0 %v6213_v2 }
0x2b72   :  { %5846 = vmatpush3.xpose.msk.msra.mxu0 %vm90_vm0, %v6913_v41 }
0x2b73   :  { %5847 = vmatprep.subr.mxu0 %v6213_v2 }
0x2b76   :  { %5848 = vmatpush3.xpose.msk.msra.mxu0 %vm90_vm0, %v6907_v49 }
0x2b77   :  { %5849 = vmatprep.subr.mxu0 %v6213_v2 }
0x2b7a   :  { %5850 = vmatpush3.xpose.msk.msra.mxu0 %vm90_vm0, %v6909_v50 }
0x2b7b   :  { %5851 = vmatprep.subr.mxu0 %v6213_v2 }
0x2b7e   :  { %5852 = vmatpush3.xpose.msk.msra.mxu0 %vm90_vm0, %v6903_v47 }
0x2b7f   :  { %5853 = vmatprep.subr.mxu0 %v6213_v2 }
0x2b82   :  { %5854 = vmatpush3.xpose.msk.msra.mxu0 %vm90_vm0, %v6905_v48 }
0x2b83   :  { %5896 = vmatprep.subr.mxu0 %v6213_v2 }
0x2b8e   :  { %v3837_v40 = vpop.permute.xlu1 %3836 }
0x2b8f   :  { %v7719_v16 = vmul.f32 %v6140_v42, %v3837_v40 }
0x2b91   :  { %3841 = vrot.lane.b32.xlu1 %v7719_v16, %s6217_s2 }
0x2c03   :  { %v3842_v4 = vpop.permute.xlu1 %3841 }
0x2c04   :  { %5856 = vmatmul.mubr.msk.f32.vlgmr.msra.gmra.mxu0 %vm90_vm0, %v3842_v4 }
0x2c05   :  { %5897 = vmatpush3.msra.mxu0 %v7453_v45  ;;  %5904 = vmatprep.mubr.msk.f32.mxu0 %vm6214_vm1, %v6213_v2 }
0x2c06   :  { %5898 = vmatprep.subr.mxu0 %v6213_v2 }
0x2c07   :  { %5899 = vmatpush3.msra.mxu0 %v7462_v46 }
0x2c08   :  { %5900 = vmatprep.subr.mxu0 %v6213_v2 }
0x2c09   :  { %5901 = vmatpush3.msra.mxu0 %v7469_v30 }
0x2c0a   :  { %5902 = vmatprep.subr.mxu0 %v6213_v2 }
0x2c0b   :  { %5903 = vmatpush3.msra.mxu0 %v7476_v34 }
0x2c0c   :  { %5905 = vmatmul.mubr.msk.f32.vlgmr.msra.gmra.mxu0 %vm90_vm0, %v3842_v4  ;;  %5926 = vmatprep.subr.mxu0 %v6213_v2 }
0x2c0d   :  { %5927 = vmatpush3.msra.mxu0 %v6842_v7  ;;  %5942 = vmatprep.mubr.msk.f32.mxu0 %vm6214_vm1, %v6213_v2 }
0x2c0e   :  { %5928 = vmatprep.subr.mxu0 %v6213_v2 }
0x2c0f   :  { %5929 = vmatpush3.msra.mxu0 %v6839_v5 }
0x2c10   :  { %5930 = vmatprep.subr.mxu0 %v6213_v2 }
0x2c11   :  { %5931 = vmatpush3.msra.mxu0 %v6832_v39 }
0x2c12   :  { %5932 = vmatprep.subr.mxu0 %v6213_v2 }
0x2c13   :  { %5933 = vmatpush3.msra.mxu0 %v6829_v15 }
0x2c14   :  { %5934 = vmatprep.subr.mxu0 %v6213_v2 }
0x2c15   :  { %5935 = vmatpush3.msra.mxu0 %v6822_v37 }
0x2c16   :  { %5936 = vmatprep.subr.mxu0 %v6213_v2 }
0x2c17   :  { %5937 = vmatpush3.msra.mxu0 %v6819_v27 }
0x2c18   :  { %5938 = vmatprep.subr.mxu0 %v6213_v2 }
0x2c19   :  { %5939 = vmatpush3.msra.mxu0 %v6729_v54 }
0x2c1a   :  { %5940 = vmatprep.subr.mxu0 %v6213_v2 }
0x2c1b   :  { %5941 = vmatpush3.msra.mxu0 %v6726_v53  ;;  %v1706_v53 = vadd.f32 %v7511_v55, %v7029_v13 }
0x2c1c   :  { %5945 = vmatprep.subr.mxu0 %v6213_v2 }
0x2c25   :  { %v3740_v39 = vpop.f32.mrf.mxu0 }
0x2c26   :  { %6145 = vtanh.f32 %v3740_v39 }
0x2c27   :  { %v5827_v15 = vpop.f32.mrf.mxu0 }
0x2c33   :  { %v7753_v5 = vpop.eup %6145 }
0x2c34   :  { %4414 = vst.msk [vmem:[%s8023_s23 + $0x28] sm:$0xff] %vm90_vm0, %v7753_v5 }
0x2cc4   :  { %v3911_v27 = vpop.f32.mrf.mxu0 }
0x2cc5   :  { %v3912_v54 = vadd.f32 %v7616_v18, %v3911_v27 }
0x2cc6   :  { %v5857_v37 = vpop.f32.mrf.mxu0 }
0x2cc7   :  { %v3915_v7 = vsel %vm1402_vm4, %v3912_v54, -inf }
0x2cc8   :  { %3916 = vmax.xlane.f32.xlu0 %v3915_v7 }
0x2ccc   :  { %v4143_v45 = vpop.f32.mrf.mxu0 }
0x2ccd   :  { %v4147_v46 = vadd.f32 %v4143_v45, %v1706_v53 }
0x2cce   :  { %v5906_v30 = vpop.f32.mrf.mxu0 }
0x2ccf   :  { %6147 = vtanh.f32 %v4147_v46  ;;  %v4819_v0 = vmul.f32 -1.442695, %v4147_v46 }
0x2cd1   :  { %6149 = vpow2.f32 %v4819_v0 }
0x2cdc   :  { %v6148_v34 = vpop.eup %6147 }
0x2cde   :  { %4157 = vrot.lane.b32.xlu0 %v6148_v34, %s6216_s1  ;;  %v6150_v59 = vpop.eup %6149 }
0x2cdf   :  { %v4151_v11 = vadd.f32 1.0, %v6150_v59 }
0x2d51   :  { %v3917_v6 = vpop.xlane.xlu0 %3916 }
0x2d52   :  { %v3918_v10 = vsub.f32 %v3912_v54, %v3917_v6 }
0x2d54   :  { %v3919_v36 = vmul.f32 1.442695, %v3918_v10 }
0x2d55   :  { %v4158_v13 = vpop.permute.xlu0 %4157 }
0x2d56   :  { %6151 = vpow2.f32 %v3919_v36 }
0x2d57   :  { %6153 = vrcp.f32 %v4151_v11 }
0x2d63   :  { %v6152_v14 = vpop.eup %6151 }
0x2d64   :  { %v3921_v21 = vsel %vm1402_vm4, %v6152_v14, 0.0  ;;  %v6154_v55 = vpop.eup %6153 }
0x2d65   :  { %3922 = vadd.xlane.f32.xlu1 %v3921_v21  ;;  %v4160_v17 = vmul.f32 %v6154_v55, %v4158_v13  ;;  %v4155_v23 = vmul.f32 %v6154_v55, %v7687_v20 }
0x2d76   :  { %4162 = vrot.lane.b32.xlu1 %v4160_v17, %s6217_s2 }
0x2d7a   :  { %3999 = vrot.lane.b32.xlu1 %v7719_v16, %s6216_s1 }
0x2dee   :  { %v3923_v35 = vpop.xlane.xlu1 %3922 }
0x2def   :  { %6155 = vrcp.f32 %v3923_v35 }
0x2df2   :  { %v4163_v42 = vpop.permute.xlu1 %4162 }
0x2df3   :  { %v4165_v44 = vadd.f32 %v4163_v42, %v4155_v23 }
0x2df5   :  { %6157 = vtanh.f32 %v4165_v44 }
0x2df6   :  { %v4000_v20 = vpop.permute.xlu1 %3999 }
0x2dfc   :  { %v6156_v56 = vpop.eup %6155 }
0x2dfd   :  { %v3925_v62 = vmul.f32 %v6156_v56, %v6152_v14 }
0x2dff   :  { %5875 = vmatmul.mubr.msk.f32.vlgmr.msra.gmra.mxu1 %vm1402_vm4, %v3925_v62 }
0x2e00   :  { %5878 = vmatpush3.msra.mxu1 %v7631_v9  ;;  %5893 = vmatprep.mubr.msk.f32.mxu1 %vm6214_vm1, %v6213_v2 }
0x2e01   :  { %5879 = vmatprep.subr.mxu1 %v6213_v2 }
0x2e02   :  { %v6158_v57 = vpop.eup %6157  ;;  %5880 = vmatpush3.msra.mxu1 %v7640_v29 }
0x2e03   :  { %4168 = vrot.lane.b32.xlu0 %v6158_v57, %s6216_s1  ;;  %5881 = vmatprep.subr.mxu1 %v6213_v2 }
0x2e04   :  { %5882 = vmatpush3.msra.mxu1 %v7647_v22 }
0x2e05   :  { %5883 = vmatprep.subr.mxu1 %v6213_v2 }
0x2e06   :  { %5884 = vmatpush3.msra.mxu1 %v7654_v31 }
0x2e07   :  { %5885 = vmatprep.subr.mxu1 %v6213_v2 }
0x2e08   :  { %5886 = vmatpush3.msra.mxu1 %v7661_v19 }
0x2e09   :  { %5887 = vmatprep.subr.mxu1 %v6213_v2 }
0x2e0a   :  { %5888 = vmatpush3.msra.mxu1 %v7668_v24 }
0x2e0b   :  { %5889 = vmatprep.subr.mxu1 %v6213_v2 }
0x2e0c   :  { %5890 = vmatpush3.msra.mxu1 %v7675_v26 }
0x2e0d   :  { %5891 = vmatprep.subr.mxu1 %v6213_v2 }
0x2e0e   :  { %5892 = vmatpush3.msra.mxu1 %v7682_v33 }
0x2e0f   :  { %5907 = vmatprep.subr.mxu1 %v6213_v2 }
0x2e75   :  { %v4169_v28 = vpop.permute.xlu0 %4168 }
0x2e76   :  { %v7790_v32 = vmul.f32 %v6154_v55, %v4169_v28 }
0x2e78   :  { %4173 = vrot.lane.b32.xlu0 %v7790_v32, %s6217_s2 }
0x2ebf   :  { %v3995_v63 = vpop.f32.mrf.mxu1 }
0x2ec0   :  { %v4002_v1 = vsel %vm90_vm0, %v3995_v63, %v4000_v20 }
0x2ec1   :  { %v5876_v3 = vpop.f32.mrf.mxu1  ;;  %5894 = vmatmul.mubr.msk.f32.vlgmr.msra.gmra.mxu1 %vm1402_vm4, %v4002_v1 }
0x2ec2   :  { %5908 = vmatpush3.xpose.msk.msra.mxu1 %vm90_vm0, %v6915_v43  ;;  %5923 = vmatprep.mubr.msk.f32.mxu1 %vm6214_vm1, %v6213_v2 }
0x2ec3   :  { %5909 = vmatprep.subr.mxu1 %v6213_v2 }
0x2ec6   :  { %5910 = vmatpush3.xpose.msk.msra.mxu1 %vm90_vm0, %v6919_v52 }
0x2ec7   :  { %5911 = vmatprep.subr.mxu1 %v6213_v2 }
0x2eca   :  { %5912 = vmatpush3.xpose.msk.msra.mxu1 %vm90_vm0, %v6911_v51  ;;  %v4420_v51 = vld [vmem:[%s8024_s19 + $0x18] sm:$0xff] }
0x2ecb   :  { %5913 = vmatprep.subr.mxu1 %v6213_v2 }
0x2ece   :  { %5914 = vmatpush3.xpose.msk.msra.mxu1 %vm90_vm0, %v6913_v41 }
0x2ecf   :  { %5915 = vmatprep.subr.mxu1 %v6213_v2 }
0x2ed2   :  { %5916 = vmatpush3.xpose.msk.msra.mxu1 %vm90_vm0, %v6907_v49 }
0x2ed3   :  { %5917 = vmatprep.subr.mxu1 %v6213_v2 }
0x2ed6   :  { %5918 = vmatpush3.xpose.msk.msra.mxu1 %vm90_vm0, %v6909_v50  ;;  %v4419_v50 = vld [vmem:[%s8024_s19 + $0x10] sm:$0xff] }
0x2ed7   :  { %5919 = vmatprep.subr.mxu1 %v6213_v2 }
0x2eda   :  { %5920 = vmatpush3.xpose.msk.msra.mxu1 %vm90_vm0, %v6903_v47  ;;  %v4418_v47 = vld [vmem:[%s8024_s19 + $0x8] sm:$0xff] }
0x2edb   :  { %5921 = vmatprep.subr.mxu1 %v6213_v2 }
0x2ede   :  { %5922 = vmatpush3.xpose.msk.msra.mxu1 %vm90_vm0, %v6905_v48  ;;  %v4417_v48 = vld [vmem:[%s8024_s19] sm:$0xff] }
0x2edf   :  { %5964 = vmatprep.subr.mxu1 %v4420_v51 }
0x2eea   :  { %v4174_v49 = vpop.permute.xlu0 %4173 }
0x2eeb   :  { %5924 = vmatmul.mubr.msk.f32.vlgmr.msra.gmra.mxu1 %vm90_vm0, %v4174_v49 }
0x2eec   :  { %5965 = vmatpush3.msra.mxu1 %v4420_v51  ;;  %5972 = vmatprep.mubr.msk.f32.mxu1 %vm90_vm0, %v7173_v60 }
0x2eed   :  { %5966 = vmatprep.subr.mxu1 %v4419_v50 }
0x2eee   :  { %5967 = vmatpush3.msra.mxu1 %v4419_v50 }
0x2eef   :  { %5968 = vmatprep.subr.mxu1 %v4418_v47 }
0x2ef0   :  { %5969 = vmatpush3.msra.mxu1 %v4418_v47 }
0x2ef1   :  { %5970 = vmatprep.subr.mxu1 %v4417_v48 }
0x2ef2   :  { %5971 = vmatpush3.msra.mxu1 %v4417_v48 }
0x2ef3   :  { %5973 = vmatmul.mubr.msk.f32.vlgmr.msra.gmra.mxu1 %vm90_vm0, %v7275_v8 }
0x2ef4   :  { %5975 = vmatprep.mubr.msk.f32.mxu1 %vm90_vm0, %v7377_v12 }
0x2ef7   :  { %5976 = vmatmul.mubr.msk.f32.gmra.mxu1 %vm90_vm0, %v7499_v25 }
0x2ef8   :  { %5978 = vmatprep.mubr.msk.f32.mxu1 %vm90_vm0, %v7606_v61  ;;  %v7856_v61 = vld [vmem:[%s8025_s20] ss:$0 sm:$0xff] }
0x2efb   :  { %5979 = vmatmul.mubr.msk.f32.gmra.mxu1 %vm90_vm0, %v7753_v5 }
0x2f81   :  { %v4072_v41 = vpop.f32.mrf.mxu1 }
0x2f82   :  { %6159 = vtanh.f32 %v4072_v41 }
0x2f83   :  { %v5895_v43 = vpop.f32.mrf.mxu1 }
0x2f8f   :  { %v6160_v52 = vpop.eup %6159 }
0x2f90   :  { %4415 = vst.msk [vmem:[%s8023_s23 + $0x30] sm:$0xff] %vm90_vm0, %v6160_v52  ;;  %5981 = vmatprep.mubr.msk.f32.mxu1 %vm90_vm0, %v6160_v52 }
0x2fab   :  { %v4243_v60 = vpop.f32.mrf.mxu1 }
0x2fac   :  { %v4244_v8 = vadd.f32 %v7616_v18, %v4243_v60 }
0x2fad   :  { %v5925_v12 = vpop.f32.mrf.mxu1 }
0x2fae   :  { %v4247_v25 = vsel %vm1402_vm4, %v4244_v8, -inf }
0x2faf   :  { %4248 = vmax.xlane.f32.xlu1 %v4247_v25 }
0x2fb3   :  { %v5974_v58 = vpop.f32.mrf.mxu1 }
0x2fb4   :  { %v7859_v38 = vadd.f32 %v5974_v58, %v7856_v61 }
0x2fb5   :  { %v4518_v40 = vpop.f32.mrf.mxu1 }
0x2fb6   :  { %4558 = vst.msk [vmem:[%s8026_s21 + $0x8] sm:$0xff] %vm1402_vm4, %v7859_v38  ;;  %v7867_v18 = vadd.f32 %v7856_v61, %v4518_v40  ;;  %v4568_v37 = vsel %vm1402_vm4, %v7859_v38, -inf }
0x2fb7   :  { %v5977_v16 = vpop.f32.mrf.mxu1 }
0x2fb8   :  { %4557 = vst.msk [vmem:[%s8026_s21] sm:$0xff] %vm1402_vm4, %v7867_v18  ;;  %v7875_v4 = vadd.f32 %v5977_v16, %v7856_v61  ;;  %v4565_v39 = vsel %vm1402_vm4, %v7867_v18, -inf }
0x2fb9   :  { %v4528_v15 = vpop.f32.mrf.mxu1  ;;  %4566 = vmax.xlane.f32.xlu1 %v4565_v39 }
0x2fba   :  { %4560 = vst.msk [vmem:[%s8026_s21 + $0x18] sm:$0xff] %vm1402_vm4, %v7875_v4  ;;  %v7885_v5 = vadd.f32 %v7856_v61, %v4528_v15  ;;  %v4574_v46 = vsel %vm1402_vm4, %v7875_v4, -inf }
0x2fbb   :  { %v5980_v27 = vpop.f32.mrf.mxu1 }
0x2fbc   :  { %4559 = vst.msk [vmem:[%s8026_s21 + $0x10] sm:$0xff] %vm1402_vm4, %v7885_v5  ;;  %v7893_v54 = vadd.f32 %v5980_v27, %v7856_v61  ;;  %v4571_v45 = vsel %vm1402_vm4, %v7885_v5, -inf }
0x2fbd   :  { %v4538_v7 = vpop.f32.mrf.mxu1  ;;  %4569 = vmax.xlane.f32.xlu1 %v4568_v37 }
0x2fbe   :  { %4562 = vst.msk [vmem:[%s8026_s21 + $0x28] sm:$0xff] %vm1402_vm4, %v7893_v54  ;;  %v7903_v53 = vadd.f32 %v7856_v61, %v4538_v7  ;;  %v4580_v34 = vsel %vm1402_vm4, %v7893_v54, -inf }
0x2fc0   :  { %4561 = vst.msk [vmem:[%s8026_s21 + $0x20] sm:$0xff] %vm1402_vm4, %v7903_v53  ;;  %v4577_v30 = vsel %vm1402_vm4, %v7903_v53, -inf }
0x2fc1   :  { %4572 = vmax.xlane.f32.xlu1 %v4571_v45 }
0x2fc5   :  { %4575 = vmax.xlane.f32.xlu1 %v4574_v46 }
0x2fc9   :  { %4578 = vmax.xlane.f32.xlu1 %v4577_v30 }
0x2fcd   :  { %4581 = vmax.xlane.f32.xlu1 %v4580_v34 }
0x3038   :  { %v4249_v0 = vpop.xlane.xlu1 %4248 }
0x3039   :  { %v4250_v6 = vsub.f32 %v4244_v8, %v4249_v0 }
0x303b   :  { %v4251_v10 = vmul.f32 1.442695, %v4250_v6 }
0x303d   :  { %6161 = vpow2.f32 %v4251_v10 }
0x304a   :  { %v6162_v36 = vpop.eup %6161 }
0x304b   :  { %v4253_v59 = vsel %vm1402_vm4, %v6162_v36, 0.0 }
0x304c   :  { %4254 = vadd.xlane.f32.xlu0 %v4253_v59 }
0x3062   :  { %4331 = vrot.lane.b32.xlu0 %v7790_v32, %s6216_s1 }
0x30d5   :  { %v4255_v11 = vpop.xlane.xlu0 %4254 }
0x30d6   :  { %6163 = vrcp.f32 %v4255_v11 }
0x30e3   :  { %v6164_v14 = vpop.eup %6163 }
0x30e4   :  { %v4257_v21 = vmul.f32 %v6164_v14, %v6162_v36 }
0x30e6   :  { %5943 = vmatmul.mubr.msk.f32.vlgmr.msra.gmra.mxu0 %vm1402_vm4, %v4257_v21 }
0x30e7   :  { %5946 = vmatpush3.msra.mxu0 %v7631_v9  ;;  %5961 = vmatprep.mubr.msk.f32.mxu0 %vm6214_vm1, %v6213_v2  ;;  %v4332_v9 = vpop.permute.xlu0 %4331 }
0x30e8   :  { %5947 = vmatprep.subr.mxu0 %v6213_v2 }
0x30e9   :  { %5948 = vmatpush3.msra.mxu0 %v7640_v29 }
0x30ea   :  { %5949 = vmatprep.subr.mxu0 %v6213_v2 }
0x30eb   :  { %5950 = vmatpush3.msra.mxu0 %v7647_v22 }
0x30ec   :  { %5951 = vmatprep.subr.mxu0 %v6213_v2 }
0x30ed   :  { %5952 = vmatpush3.msra.mxu0 %v7654_v31 }
0x30ee   :  { %5953 = vmatprep.subr.mxu0 %v6213_v2 }
0x30ef   :  { %5954 = vmatpush3.msra.mxu0 %v7661_v19 }
0x30f0   :  { %5955 = vmatprep.subr.mxu0 %v6213_v2 }
0x30f1   :  { %5956 = vmatpush3.msra.mxu0 %v7668_v24 }
0x30f2   :  { %5957 = vmatprep.subr.mxu0 %v6213_v2 }
0x30f3   :  { %5958 = vmatpush3.msra.mxu0 %v7675_v26 }
0x30f4   :  { %5959 = vmatprep.subr.mxu0 %v6213_v2  ;;  %v4567_v2 = vpop.xlane.xlu1 %4566 }
0x30f5   :  { %5960 = vmatpush3.msra.mxu0 %v7682_v33  ;;  %v4589_v33 = vsub.f32 %v7867_v18, %v4567_v2 }
0x30f7   :  { %v4597_v17 = vmul.f32 1.442695, %v4589_v33 }
0x30f8   :  { %v4570_v24 = vpop.xlane.xlu1 %4569 }
0x30f9   :  { %v4590_v35 = vsub.f32 %v7859_v38, %v4570_v24 }
0x30fb   :  { %v4599_v42 = vmul.f32 1.442695, %v4590_v35 }
0x30fc   :  { %v4573_v26 = vpop.xlane.xlu1 %4572 }
0x30fd   :  { %v4591_v44 = vsub.f32 %v7885_v5, %v4573_v26 }
0x30ff   :  { %v4601_v57 = vmul.f32 1.442695, %v4591_v44 }
0x3100   :  { %v4576_v23 = vpop.xlane.xlu1 %4575 }
0x3101   :  { %v4592_v56 = vsub.f32 %v7875_v4, %v4576_v23 }
0x3103   :  { %v4603_v28 = vmul.f32 1.442695, %v4592_v56 }
0x3104   :  { %v4579_v62 = vpop.xlane.xlu1 %4578 }
0x3105   :  { %v4593_v32 = vsub.f32 %v7903_v53, %v4579_v62 }
0x3107   :  { %v4605_v51 = vmul.f32 1.442695, %v4593_v32 }
0x3108   :  { %v4582_v20 = vpop.xlane.xlu1 %4581 }
0x3109   :  { %v4594_v49 = vsub.f32 %v7893_v54, %v4582_v20 }
0x310b   :  { %v4607_v43 = vmul.f32 1.442695, %v4594_v49 }
0x31a6   :  { %v4327_v29 = vpop.f32.mrf.mxu0 }
0x31a7   :  { %v4334_v22 = vsel %vm90_vm0, %v4327_v29, %v4332_v9 }
0x31a8   :  { %v5944_v31 = vpop.f32.mrf.mxu0  ;;  %5962 = vmatmul.mubr.msk.f32.vlgmr.msra.gmra.mxu0 %vm1402_vm4, %v4334_v22 }
0x3268   :  { %v4404_v19 = vpop.f32.mrf.mxu0 }
0x3269   :  { %6165 = vtanh.f32 %v4404_v19 }
0x326a   :  { %v5963_v13 = vpop.f32.mrf.mxu0  ;;  %6167 = vpow2.f32 %v4597_v17 }
0x326b   :  { %6169 = vpow2.f32 %v4599_v42 }
0x326c   :  { %6171 = vpow2.f32 %v4601_v57 }
0x326d   :  { %6173 = vpow2.f32 %v4603_v28 }
0x326e   :  { %6175 = vpow2.f32 %v4605_v51 }
0x326f   :  { %6177 = vpow2.f32 %v4607_v43 }
0x3276   :  { %v6166_v55 = vpop.eup %6165 }
0x3277   :  { %4416 = vst.msk [vmem:[%s8023_s23 + $0x38] sm:$0xff] %vm90_vm0, %v6166_v55  ;;  %5982 = vmatmul.mubr.msk.f32.gmra.mxu1 %vm90_vm0, %v6166_v55  ;;  %v6168_v48 = vpop.eup %6167 }
0x3278   :  { %v4613_v52 = vsel %vm1402_vm4, %v6168_v48, 0.0  ;;  %v6170_v60 = vpop.eup %6169 }
0x3279   :  { %v4616_v8 = vsel %vm1402_vm4, %v6170_v60, 0.0  ;;  %v6172_v12 = vpop.eup %6171 }
0x327a   :  { %v6174_v25 = vpop.eup %6173 }
0x327b   :  { %v4622_v58 = vsel %vm1402_vm4, %v6174_v25, 0.0  ;;  %v6176_v38 = vpop.eup %6175 }
0x327c   :  { %v4625_v40 = vsel %vm1402_vm4, %v6176_v38, 0.0  ;;  %v6178_v18 = vpop.eup %6177 }
0x327d   :  { %v4628_v16 = vsel %vm1402_vm4, %v6178_v18, 0.0 }
0x3337   :  { %v5983_v63 = vpop.f32.mrf.mxu1 }
0x3338   :  { %v4554_v1 = vadd.f32 %v5983_v63, %v7856_v61 }
0x3339   :  { %v4548_v3 = vpop.f32.mrf.mxu1 }
0x333a   :  { %4564 = vst.msk [vmem:[%s8026_s21 + $0x38] sm:$0xff] %vm1402_vm4, %v4554_v1  ;;  %v4549_v50 = vadd.f32 %v7856_v61, %v4548_v3  ;;  %v4586_v47 = vsel %vm1402_vm4, %v4554_v1, -inf  ;;  %v4619_v61 = vsel %vm1402_vm4, %v6172_v12, 0.0 }
0x333b   :  { %4587 = vmax.xlane.f32.xlu1 %v4586_v47 }
0x333c   :  { %4563 = vst.msk [vmem:[%s8026_s21 + $0x30] sm:$0xff] %vm1402_vm4, %v4549_v50  ;;  %v4583_v41 = vsel %vm1402_vm4, %v4549_v50, -inf }
0x333d   :  { %4584 = vmax.xlane.f32.xlu0 %v4583_v41 }
0x333f   :  { %4614 = vadd.xlane.f32.xlu1 %v4613_v52 }
0x3343   :  { %4617 = vadd.xlane.f32.xlu1 %v4616_v8 }
0x3347   :  { %4620 = vadd.xlane.f32.xlu1 %v4619_v61 }
0x334b   :  { %4623 = vadd.xlane.f32.xlu1 %v4622_v58 }
0x334f   :  { %4626 = vadd.xlane.f32.xlu1 %v4625_v40 }
0x3353   :  { %4629 = vadd.xlane.f32.xlu1 %v4628_v16 }
0x33c4   :  { %v4588_v4 = vpop.xlane.xlu1 %4587 }
0x33c5   :  { %v4596_v39 = vsub.f32 %v4554_v1, %v4588_v4 }
0x33c6   :  { %v4585_v15 = vpop.xlane.xlu0 %4584 }
0x33c7   :  { %v4611_v5 = vmul.f32 1.442695, %v4596_v39  ;;  %v4595_v27 = vsub.f32 %v4549_v50, %v4585_v15 }
0x33c8   :  { %v4615_v54 = vpop.xlane.xlu1 %4614 }
0x33c9   :  { %6179 = vpow2.f32 %v4611_v5  ;;  %v4609_v37 = vmul.f32 1.442695, %v4595_v27 }
0x33ca   :  { %6181 = vrcp.f32 %v4615_v54 }
0x33cb   :  { %6183 = vpow2.f32 %v4609_v37 }
0x33cc   :  { %v4618_v7 = vpop.xlane.xlu1 %4617 }
0x33cd   :  { %6185 = vrcp.f32 %v4618_v7 }
0x33d0   :  { %v4621_v53 = vpop.xlane.xlu1 %4620 }
0x33d1   :  { %6187 = vrcp.f32 %v4621_v53 }
0x33d4   :  { %v4624_v45 = vpop.xlane.xlu1 %4623 }
0x33d5   :  { %6189 = vrcp.f32 %v4624_v45 }
0x33d6   :  { %v6180_v46 = vpop.eup %6179 }
0x33d7   :  { %v6182_v30 = vpop.eup %6181  ;;  %v4634_v34 = vsel %vm1402_vm4, %v6180_v46, 0.0 }
0x33d8   :  { %v6184_v0 = vpop.eup %6183  ;;  %v4638_v6 = vmul.f32 %v6182_v30, %v6168_v48  ;;  %4635 = vadd.xlane.f32.xlu1 %v4634_v34  ;;  %v4627_v10 = vpop.xlane.xlu1 %4626 }
0x33d9   :  { %6191 = vrcp.f32 %v4627_v10  ;;  %v4631_v36 = vsel %vm1402_vm4, %v6184_v0, 0.0 }
0x33da   :  { %v6186_v59 = vpop.eup %6185  ;;  %4653 = vst.msk [vmem:[%s8027_s22] sm:$0xff] %vm1402_vm4, %v4638_v6  ;;  %4632 = vadd.xlane.f32.xlu0 %v4631_v36 }
0x33db   :  { %v4640_v11 = vmul.f32 %v6186_v59, %v6170_v60 }
0x33dc   :  { %v4630_v14 = vpop.xlane.xlu1 %4629 }
0x33dd   :  { %4654 = vst.msk [vmem:[%s8027_s22 + $0x8] sm:$0xff] %vm1402_vm4, %v4640_v11  ;;  %6193 = vrcp.f32 %v4630_v14 }
0x33de   :  { %v6188_v21 = vpop.eup %6187 }
0x33df   :  { %v4642_v9 = vmul.f32 %v6188_v21, %v6172_v12 }
0x33e1   :  { %4655 = vst.msk [vmem:[%s8027_s22 + $0x10] sm:$0xff] %vm1402_vm4, %v4642_v9 }
0x33e2   :  { %v6190_v29 = vpop.eup %6189 }
0x33e3   :  { %v4644_v22 = vmul.f32 %v6190_v29, %v6174_v25 }
0x33e5   :  { %4656 = vst.msk [vmem:[%s8027_s22 + $0x18] sm:$0xff] %vm1402_vm4, %v4644_v22 }
0x33e6   :  { %v6192_v31 = vpop.eup %6191 }
0x33e7   :  { %v4646_v19 = vmul.f32 %v6192_v31, %v6176_v38 }
0x33e9   :  { %4657 = vst.msk [vmem:[%s8027_s22 + $0x20] sm:$0xff] %vm1402_vm4, %v4646_v19 }
0x33ea   :  { %v6194_v13 = vpop.eup %6193 }
0x33eb   :  { %v4648_v55 = vmul.f32 %v6194_v13, %v6178_v18 }
0x33ed   :  { %4658 = vst.msk [vmem:[%s8027_s22 + $0x28] sm:$0xff] %vm1402_vm4, %v4648_v55 }
0x3461   :  { %v4636_v2 = vpop.xlane.xlu1 %4635 }
0x3462   :  { %6195 = vrcp.f32 %v4636_v2 }
0x3463   :  { %v4633_v24 = vpop.xlane.xlu0 %4632 }
0x3464   :  { %6197 = vrcp.f32 %v4633_v24 }
0x346f   :  { %v6196_v26 = vpop.eup %6195 }
0x3470   :  { %v4652_v33 = vmul.f32 %v6196_v26, %v6180_v46 }
0x3471   :  { %v6198_v17 = vpop.eup %6197 }
0x3472   :  { %4660 = vst.msk [vmem:[%s8027_s22 + $0x38] sm:$0xff] %vm1402_vm4, %v4652_v33  ;;  %v4650_v35 = vmul.f32 %v6198_v17, %v6184_v0 }
0x3474   :  { %4659 = vst.msk [vmem:[%s8027_s22 + $0x30] sm:$0xff] %vm1402_vm4, %v4650_v35 }

</bundles_post_ra>
